<compile_context>
chip_gen: v6e
topology: v6e:2x2x1
jax: 0.10.0
libtpu: 0.0.40
codegen_flags: <defaults>
</compile_context>

<pallas_src>
import jax
import jax.numpy as jnp
from jax.experimental import pallas as pl
from jax.experimental.pallas import tpu as pltpu


# ----------------------------------------------------------------------------
# Fixed LeNet5 geometry (28x28 input -> 24 -> 12 -> 8 -> 4, as implied by
# fc1 = Linear(16*4*4, 120) in the PyTorch module).
# ----------------------------------------------------------------------------
_K = 5
_H1 = _W1 = 28
_HO1 = _WO1 = 24          # conv1 output spatial
_HP1 = _WP1 = 12          # pool1 output spatial
_HO2 = _WO2 = 8           # conv2 output spatial
_HP2 = _WP2 = 4           # pool2 output spatial
_C1, _C2 = 6, 16
_NFLAT = _C2 * _HP2 * _WP2                 # 256, PyTorch (c, h, w) flatten

_L1 = (_HO1 - 1) * _W1 + _WO1              # 668 conv1 columns (p = ho*28 + wo)
_L2 = (_HO2 - 1) * _WP1 + _WO2             # 92  conv2 columns (p = ho*12 + wo)
_NP1 = _HP1 * _WP1                         # 144 pool1 positions
_NP2 = _HP2 * _WP2                         # 16  pool2 positions
_S1K = 2 * (_HP1 - 1) * _W1 + 2 * (_WP1 - 1) + 1    # 639 pool1 selection K
_S2K = 2 * (_HP2 - 1) * _WP1 + 2 * (_WP2 - 1) + 1   # 79  pool2 selection K


# ----------------------------------------------------------------------------
# The fused kernel (one grid step == one batch sample)
# ----------------------------------------------------------------------------
def _lenet5_kernel(x_ref, w1_ref, b1_ref, w2_ref, b2_ref, s1_ref, s2_ref,
                   wf1_ref, bf1_ref, wf2_ref, bf2_ref, wf3_ref, bf3_ref,
                   out_ref,
                   patch1_ref, patch2_ref, flat_ref):
    cin = x_ref.shape[0]
    x = x_ref[...]                                        # (cin, 784)

    # ---- conv1 (5x5 valid) + ReLU.  Transposed im2col: row = tap*cin + c,
    # column = output position p = ho*28 + wo (columns with wo >= 24 carry
    # harmless finite row-wrapped junk and are never selected downstream).
    for ki in range(_K):
        for kj in range(_K):
            t = ki * _K + kj
            s = ki * _W1 + kj
            patch1_ref[t * cin:(t + 1) * cin, :] = x[:, s:s + _L1]
    y1 = jnp.dot(w1_ref[...], patch1_ref[...], preferred_element_type=jnp.float32)
    act1 = jnp.maximum(y1 + b1_ref[...], 0.0)             # (6, 668)

    # ---- max_pool2d(2): selection matrix s1 picks the (2h, 2w) corner of each
    # 2x2 window; the other three corners are the same matmul applied to
    # lane-shifted slices of act1.  Loop-free, lane-dense (144) outputs.
    s1 = s1_ref[...]
    p00 = jnp.dot(act1[:, 0:_S1K], s1, preferred_element_type=jnp.float32)
    p01 = jnp.dot(act1[:, 1:1 + _S1K], s1, preferred_element_type=jnp.float32)
    p10 = jnp.dot(act1[:, _W1:_W1 + _S1K], s1, preferred_element_type=jnp.float32)
    p11 = jnp.dot(act1[:, _W1 + 1:_W1 + 1 + _S1K], s1,
                  preferred_element_type=jnp.float32)
    pool1 = jnp.maximum(jnp.maximum(p00, p01), jnp.maximum(p10, p11))  # (6, 144)

    # ---- conv2 (5x5 valid) + ReLU, same transposed im2col scheme.
    for ki in range(_K):
        for kj in range(_K):
            t = ki * _K + kj
            s = ki * _WP1 + kj
            patch2_ref[t * _C1:(t + 1) * _C1, :] = pool1[:, s:s + _L2]
    y2 = jnp.dot(w2_ref[...], patch2_ref[...], preferred_element_type=jnp.float32)
    act2 = jnp.maximum(y2 + b2_ref[...], 0.0)             # (16, 92)

    # ---- max_pool2d(2) on conv2 output (same shifted-selection trick).
    s2 = s2_ref[...]
    q00 = jnp.dot(act2[:, 0:_S2K], s2, preferred_element_type=jnp.float32)
    q01 = jnp.dot(act2[:, 1:1 + _S2K], s2, preferred_element_type=jnp.float32)
    q10 = jnp.dot(act2[:, _WP1:_WP1 + _S2K], s2, preferred_element_type=jnp.float32)
    q11 = jnp.dot(act2[:, _WP1 + 1:_WP1 + 1 + _S2K], s2,
                  preferred_element_type=jnp.float32)
    pooled = jnp.maximum(jnp.maximum(q00, q01), jnp.maximum(q10, q11))  # (16, 16)

    # ---- flatten in PyTorch (c, h, w) order: lane = c*16 + hp*4 + wp.
    for c in range(_C2):
        flat_ref[:, c * _NP2:(c + 1) * _NP2] = pooled[c:c + 1, :]

    # ---- fc1 / fc2 (ReLU) and fc3 (logits), all VMEM-resident.
    h = jnp.dot(flat_ref[...], wf1_ref[...], preferred_element_type=jnp.float32)
    h = jnp.maximum(h + bf1_ref[...], 0.0)
    h = jnp.dot(h, wf2_ref[...], preferred_element_type=jnp.float32)
    h = jnp.maximum(h + bf2_ref[...], 0.0)
    out_ref[...] = (jnp.dot(h, wf3_ref[...], preferred_element_type=jnp.float32)
                    + bf3_ref[...])


# ----------------------------------------------------------------------------
# Parameter handling
# ----------------------------------------------------------------------------
def init_params(key, num_classes, num_in_channels):
    """PyTorch-layout parameters (same convention as nn.Conv2d / nn.Linear)."""
    def uniform(key, shape, fan_in):
        bound = 1.0 / jnp.sqrt(fan_in)
        return jax.random.uniform(key, shape, jnp.float32, -bound, bound)

    ks = jax.random.split(key, 10)
    p = {}
    p["conv1_w"] = uniform(ks[0], (_C1, num_in_channels, _K, _K),
                           num_in_channels * _K * _K)
    p["conv1_b"] = uniform(ks[1], (_C1,), num_in_channels * _K * _K)
    p["conv2_w"] = uniform(ks[2], (_C2, _C1, _K, _K), _C1 * _K * _K)
    p["conv2_b"] = uniform(ks[3], (_C2,), _C1 * _K * _K)
    p["fc1_w"] = uniform(ks[4], (120, _NFLAT), _NFLAT)
    p["fc1_b"] = uniform(ks[5], (120,), _NFLAT)
    p["fc2_w"] = uniform(ks[6], (84, 120), 120)
    p["fc2_b"] = uniform(ks[7], (84,), 120)
    p["fc3_w"] = uniform(ks[8], (num_classes, 84), 84)
    p["fc3_b"] = uniform(ks[9], (num_classes,), 84)
    return p


def prepare_params(params):
    """One-time re-layout of weights + pooling selection constants."""
    cin = params["conv1_w"].shape[1]
    prep = {}
    # conv weights -> Cout rows x (ki, kj, ci) cols (matches in-kernel patch rows)
    prep["w1"] = params["conv1_w"].transpose(0, 2, 3, 1).reshape(_C1, _K * _K * cin)
    prep["b1"] = params["conv1_b"].reshape(_C1, 1)
    prep["w2"] = params["conv2_w"].transpose(0, 2, 3, 1).reshape(_C2, _K * _K * _C1)
    prep["b2"] = params["conv2_b"].reshape(_C2, 1)
    # kernel flattens in (c, h, w) order == PyTorch .view order, so fc1 needs
    # only a transpose, no column permutation.
    prep["wf1"] = params["fc1_w"].T
    prep["bf1"] = params["fc1_b"].reshape(1, -1)
    prep["wf2"] = params["fc2_w"].T
    prep["bf2"] = params["fc2_b"].reshape(1, -1)
    prep["wf3"] = params["fc3_w"].T
    prep["bf3"] = params["fc3_b"].reshape(1, -1)
    # exact 0/1 pooling selection matrices: column q of s1/s2 picks the
    # (2h, 2w) corner; the +1 / +row / +row+1 corners are produced in-kernel
    # by slicing the activation before the matmul.
    q1 = jnp.arange(_NP1)
    base1 = 2 * (q1 // _WP1) * _W1 + 2 * (q1 % _WP1)          # < _S1K
    prep["s1"] = (jnp.arange(_S1K)[:, None] == base1[None, :]).astype(jnp.float32)
    q2 = jnp.arange(_NP2)
    base2 = 2 * (q2 // _WP2) * _WP1 + 2 * (q2 % _WP2)         # < _S2K
    prep["s2"] = (jnp.arange(_S2K)[:, None] == base2[None, :]).astype(jnp.float32)
    return prep


_WEIGHT_KEYS = ["w1", "b1", "w2", "b2", "s1", "s2",
                "wf1", "bf1", "wf2", "bf2", "wf3", "bf3"]


# ----------------------------------------------------------------------------
# Forward pass
# ----------------------------------------------------------------------------
def lenet5_forward(prep, x_nchw):
    N, cin, H, W = x_nchw.shape
    assert (H, W) == (_H1, _W1), "LeNet5 (fc1 = 16*4*4) expects 28x28 inputs"
    num_classes = prep["wf3"].shape[1]

    # NCHW -> (batch, cin, h*W + w): channels on sublanes, spatial on lanes.
    x3 = x_nchw.reshape(N, cin, H * W).astype(jnp.float32)

    def full2d(a):
        return pl.BlockSpec(a.shape, lambda i: (0, 0))       # VMEM-resident weight

    in_specs = [pl.BlockSpec((None, cin, H * W), lambda i: (i, 0, 0))]
    in_specs += [full2d(prep[k]) for k in _WEIGHT_KEYS]

    out = pl.pallas_call(
        _lenet5_kernel,
        out_shape=jax.ShapeDtypeStruct((N, 1, num_classes), jnp.float32),
        grid=(N,),
        in_specs=in_specs,
        out_specs=pl.BlockSpec((None, 1, num_classes), lambda i: (i, 0, 0)),
        scratch_shapes=[
            pltpu.VMEM((_K * _K * cin, _L1), jnp.float32),   # conv1 im2col (taps, pos)
            pltpu.VMEM((_K * _K * _C1, _L2), jnp.float32),   # conv2 im2col
            pltpu.VMEM((1, _NFLAT), jnp.float32),            # flattened features
        ],
        compiler_params=pltpu.CompilerParams(
            dimension_semantics=("parallel",)),
    )(x3, *[prep[k] for k in _WEIGHT_KEYS])
    return out.reshape(N, num_classes)


# ----------------------------------------------------------------------------
# Pure-JAX reference (numerical sanity check)
# ----------------------------------------------------------------------------
def lenet5_reference(params, x):
    dn = ("NCHW", "OIHW", "NCHW")
    y = jax.lax.conv_general_dilated(x, params["conv1_w"], (1, 1), "VALID",
                                     dimension_numbers=dn)
    y = jax.nn.relu(y + params["conv1_b"].reshape(1, -1, 1, 1))
    y = jax.lax.reduce_window(y, -jnp.inf, jax.lax.max,
                              (1, 1, 2, 2), (1, 1, 2, 2), "VALID")
    y = jax.lax.conv_general_dilated(y, params["conv2_w"], (1, 1), "VALID",
                                     dimension_numbers=dn)
    y = jax.nn.relu(y + params["conv2_b"].reshape(1, -1, 1, 1))
    y = jax.lax.reduce_window(y, -jnp.inf, jax.lax.max,
                              (1, 1, 2, 2), (1, 1, 2, 2), "VALID")
    y = y.reshape(x.shape[0], -1)                      # PyTorch (c, h, w) flatten
    y = jax.nn.relu(y @ params["fc1_w"].T + params["fc1_b"])
    y = jax.nn.relu(y @ params["fc2_w"].T + params["fc2_b"])
    return y @ params["fc3_w"].T + params["fc3_b"]


if __name__ == "__main__":
    num_classes = 10
    num_in_channels = 1
    batch = 2

    key = jax.random.PRNGKey(0)
    kx, kp = jax.random.split(key)
    x = jax.random.normal(kx, (batch, num_in_channels, _H1, _W1), jnp.float32)
    params = init_params(kp, num_classes, num_in_channels)
    prep = prepare_params(params)                      # one-time weight re-layout

    fwd = jax.jit(lenet5_forward)
    logits = jax.block_until_ready(fwd(prep, x))

    assert logits.shape == (batch, num_classes)
    assert bool(jnp.all(jnp.isfinite(logits)))
    ref = lenet5_reference(params, x)
    assert bool(jnp.allclose(logits, ref, atol=2e-3, rtol=2e-3)), "mismatch vs reference"
    print("KERNEL_OK")
</pallas_src>

<mosaic_0001>
module attributes {stable_mosaic.version = 11 : i64} {
  func.func @_lenet5_kernel(%arg0: i32, %arg1: memref<1x1x784xf32, #tpu.memory_space<vmem>>, %arg2: memref<6x25xf32, #tpu.memory_space<vmem>>, %arg3: memref<6x1xf32, #tpu.memory_space<vmem>>, %arg4: memref<16x150xf32, #tpu.memory_space<vmem>>, %arg5: memref<16x1xf32, #tpu.memory_space<vmem>>, %arg6: memref<639x144xf32, #tpu.memory_space<vmem>>, %arg7: memref<79x16xf32, #tpu.memory_space<vmem>>, %arg8: memref<256x120xf32, #tpu.memory_space<vmem>>, %arg9: memref<1x120xf32, #tpu.memory_space<vmem>>, %arg10: memref<120x84xf32, #tpu.memory_space<vmem>>, %arg11: memref<1x84xf32, #tpu.memory_space<vmem>>, %arg12: memref<84x10xf32, #tpu.memory_space<vmem>>, %arg13: memref<1x10xf32, #tpu.memory_space<vmem>>, %arg14: memref<1x1x10xf32, #tpu.memory_space<vmem>>, %arg15: memref<25x668xf32, #tpu.memory_space<vmem>>, %arg16: memref<150x92xf32, #tpu.memory_space<vmem>>, %arg17: memref<1x256xf32, #tpu.memory_space<vmem>>) attributes {dimension_semantics = [#tpu.dimension_semantics<parallel>], iteration_bounds = array<i64: 2>, scalar_prefetch = 0 : i64, scratch_operands = 3 : i64, tpu.core_type = #tpu.core_type<tc>, window_params = [{transform_indices = @transform_0, window_bounds = array<i64: 1, 1, 784>}, {pipeline_mode = #tpu.pipeline_mode<synchronous>, transform_indices = @transform_1, window_bounds = array<i64: 6, 25>}, {pipeline_mode = #tpu.pipeline_mode<synchronous>, transform_indices = @transform_2, window_bounds = array<i64: 6, 1>}, {pipeline_mode = #tpu.pipeline_mode<synchronous>, transform_indices = @transform_3, window_bounds = array<i64: 16, 150>}, {pipeline_mode = #tpu.pipeline_mode<synchronous>, transform_indices = @transform_4, window_bounds = array<i64: 16, 1>}, {pipeline_mode = #tpu.pipeline_mode<synchronous>, transform_indices = @transform_5, window_bounds = array<i64: 639, 144>}, {pipeline_mode = #tpu.pipeline_mode<synchronous>, transform_indices = @transform_6, window_bounds = array<i64: 79, 16>}, {pipeline_mode = #tpu.pipeline_mode<synchronous>, transform_indices = @transform_7, window_bounds = array<i64: 256, 120>}, {pipeline_mode = #tpu.pipeline_mode<synchronous>, transform_indices = @transform_8, window_bounds = array<i64: 1, 120>}, {pipeline_mode = #tpu.pipeline_mode<synchronous>, transform_indices = @transform_9, window_bounds = array<i64: 120, 84>}, {pipeline_mode = #tpu.pipeline_mode<synchronous>, transform_indices = @transform_10, window_bounds = array<i64: 1, 84>}, {pipeline_mode = #tpu.pipeline_mode<synchronous>, transform_indices = @transform_11, window_bounds = array<i64: 84, 10>}, {pipeline_mode = #tpu.pipeline_mode<synchronous>, transform_indices = @transform_12, window_bounds = array<i64: 1, 10>}, {transform_indices = @transform_13, window_bounds = array<i64: 1, 1, 10>}]} {
    %c0 = arith.constant 0 : index
    %c0_0 = arith.constant 0 : index
    %c0_1 = arith.constant 0 : index
    %0 = vector.load %arg1[%c0, %c0_0, %c0_1] : memref<1x1x784xf32, #tpu.memory_space<vmem>>, vector<1x1x784xf32>
    %1 = vector.shape_cast %0 : vector<1x1x784xf32> to vector<1x784xf32>
    %2 = vector.extract_strided_slice %1 {offsets = [0, 0], sizes = [1, 668], strides = [1, 1]} : vector<1x784xf32> to vector<1x668xf32>
    %c0_2 = arith.constant 0 : index
    %c0_3 = arith.constant 0 : index
    %3 = vector.load %arg15[%c0_2, %c0_3] : memref<25x668xf32, #tpu.memory_space<vmem>>, vector<1x668xf32>
    tpu.vector_store %arg15[%c0_2, %c0_3], %2 {strides = array<i32>} : memref<25x668xf32, #tpu.memory_space<vmem>>, vector<1x668xf32>,
    %4 = vector.extract_strided_slice %1 {offsets = [0, 1], sizes = [1, 668], strides = [1, 1]} : vector<1x784xf32> to vector<1x668xf32>
    %c1 = arith.constant 1 : index
    %c0_4 = arith.constant 0 : index
    %5 = vector.load %arg15[%c1, %c0_4] : memref<25x668xf32, #tpu.memory_space<vmem>>, vector<1x668xf32>
    tpu.vector_store %arg15[%c1, %c0_4], %4 {strides = array<i32>} : memref<25x668xf32, #tpu.memory_space<vmem>>, vector<1x668xf32>,
    %6 = vector.extract_strided_slice %1 {offsets = [0, 2], sizes = [1, 668], strides = [1, 1]} : vector<1x784xf32> to vector<1x668xf32>
    %c2 = arith.constant 2 : index
    %c0_5 = arith.constant 0 : index
    %7 = vector.load %arg15[%c2, %c0_5] : memref<25x668xf32, #tpu.memory_space<vmem>>, vector<1x668xf32>
    tpu.vector_store %arg15[%c2, %c0_5], %6 {strides = array<i32>} : memref<25x668xf32, #tpu.memory_space<vmem>>, vector<1x668xf32>,
    %8 = vector.extract_strided_slice %1 {offsets = [0, 3], sizes = [1, 668], strides = [1, 1]} : vector<1x784xf32> to vector<1x668xf32>
    %c3 = arith.constant 3 : index
    %c0_6 = arith.constant 0 : index
    %9 = vector.load %arg15[%c3, %c0_6] : memref<25x668xf32, #tpu.memory_space<vmem>>, vector<1x668xf32>
    tpu.vector_store %arg15[%c3, %c0_6], %8 {strides = array<i32>} : memref<25x668xf32, #tpu.memory_space<vmem>>, vector<1x668xf32>,
    %10 = vector.extract_strided_slice %1 {offsets = [0, 4], sizes = [1, 668], strides = [1, 1]} : vector<1x784xf32> to vector<1x668xf32>
    %c4 = arith.constant 4 : index
    %c0_7 = arith.constant 0 : index
    %11 = vector.load %arg15[%c4, %c0_7] : memref<25x668xf32, #tpu.memory_space<vmem>>, vector<1x668xf32>
    tpu.vector_store %arg15[%c4, %c0_7], %10 {strides = array<i32>} : memref<25x668xf32, #tpu.memory_space<vmem>>, vector<1x668xf32>,
    %12 = vector.extract_strided_slice %1 {offsets = [0, 28], sizes = [1, 668], strides = [1, 1]} : vector<1x784xf32> to vector<1x668xf32>
    %c5 = arith.constant 5 : index
    %c0_8 = arith.constant 0 : index
    %13 = vector.load %arg15[%c5, %c0_8] : memref<25x668xf32, #tpu.memory_space<vmem>>, vector<1x668xf32>
    tpu.vector_store %arg15[%c5, %c0_8], %12 {strides = array<i32>} : memref<25x668xf32, #tpu.memory_space<vmem>>, vector<1x668xf32>,
    %14 = vector.extract_strided_slice %1 {offsets = [0, 29], sizes = [1, 668], strides = [1, 1]} : vector<1x784xf32> to vector<1x668xf32>
    %c6 = arith.constant 6 : index
    %c0_9 = arith.constant 0 : index
    %15 = vector.load %arg15[%c6, %c0_9] : memref<25x668xf32, #tpu.memory_space<vmem>>, vector<1x668xf32>
    tpu.vector_store %arg15[%c6, %c0_9], %14 {strides = array<i32>} : memref<25x668xf32, #tpu.memory_space<vmem>>, vector<1x668xf32>,
    %16 = vector.extract_strided_slice %1 {offsets = [0, 30], sizes = [1, 668], strides = [1, 1]} : vector<1x784xf32> to vector<1x668xf32>
    %c7 = arith.constant 7 : index
    %c0_10 = arith.constant 0 : index
    %17 = vector.load %arg15[%c7, %c0_10] : memref<25x668xf32, #tpu.memory_space<vmem>>, vector<1x668xf32>
    tpu.vector_store %arg15[%c7, %c0_10], %16 {strides = array<i32>} : memref<25x668xf32, #tpu.memory_space<vmem>>, vector<1x668xf32>,
    %18 = vector.extract_strided_slice %1 {offsets = [0, 31], sizes = [1, 668], strides = [1, 1]} : vector<1x784xf32> to vector<1x668xf32>
    %c8 = arith.constant 8 : index
    %c0_11 = arith.constant 0 : index
    %19 = vector.load %arg15[%c8, %c0_11] : memref<25x668xf32, #tpu.memory_space<vmem>>, vector<1x668xf32>
    tpu.vector_store %arg15[%c8, %c0_11], %18 {strides = array<i32>} : memref<25x668xf32, #tpu.memory_space<vmem>>, vector<1x668xf32>,
    %20 = vector.extract_strided_slice %1 {offsets = [0, 32], sizes = [1, 668], strides = [1, 1]} : vector<1x784xf32> to vector<1x668xf32>
    %c9 = arith.constant 9 : index
    %c0_12 = arith.constant 0 : index
    %21 = vector.load %arg15[%c9, %c0_12] : memref<25x668xf32, #tpu.memory_space<vmem>>, vector<1x668xf32>
    tpu.vector_store %arg15[%c9, %c0_12], %20 {strides = array<i32>} : memref<25x668xf32, #tpu.memory_space<vmem>>, vector<1x668xf32>,
    %22 = vector.extract_strided_slice %1 {offsets = [0, 56], sizes = [1, 668], strides = [1, 1]} : vector<1x784xf32> to vector<1x668xf32>
    %c10 = arith.constant 10 : index
    %c0_13 = arith.constant 0 : index
    %23 = vector.load %arg15[%c10, %c0_13] : memref<25x668xf32, #tpu.memory_space<vmem>>, vector<1x668xf32>
    tpu.vector_store %arg15[%c10, %c0_13], %22 {strides = array<i32>} : memref<25x668xf32, #tpu.memory_space<vmem>>, vector<1x668xf32>,
    %24 = vector.extract_strided_slice %1 {offsets = [0, 57], sizes = [1, 668], strides = [1, 1]} : vector<1x784xf32> to vector<1x668xf32>
    %c11 = arith.constant 11 : index
    %c0_14 = arith.constant 0 : index
    %25 = vector.load %arg15[%c11, %c0_14] : memref<25x668xf32, #tpu.memory_space<vmem>>, vector<1x668xf32>
    tpu.vector_store %arg15[%c11, %c0_14], %24 {strides = array<i32>} : memref<25x668xf32, #tpu.memory_space<vmem>>, vector<1x668xf32>,
    %26 = vector.extract_strided_slice %1 {offsets = [0, 58], sizes = [1, 668], strides = [1, 1]} : vector<1x784xf32> to vector<1x668xf32>
    %c12 = arith.constant 12 : index
    %c0_15 = arith.constant 0 : index
    %27 = vector.load %arg15[%c12, %c0_15] : memref<25x668xf32, #tpu.memory_space<vmem>>, vector<1x668xf32>
    tpu.vector_store %arg15[%c12, %c0_15], %26 {strides = array<i32>} : memref<25x668xf32, #tpu.memory_space<vmem>>, vector<1x668xf32>,
    %28 = vector.extract_strided_slice %1 {offsets = [0, 59], sizes = [1, 668], strides = [1, 1]} : vector<1x784xf32> to vector<1x668xf32>
    %c13 = arith.constant 13 : index
    %c0_16 = arith.constant 0 : index
    %29 = vector.load %arg15[%c13, %c0_16] : memref<25x668xf32, #tpu.memory_space<vmem>>, vector<1x668xf32>
    tpu.vector_store %arg15[%c13, %c0_16], %28 {strides = array<i32>} : memref<25x668xf32, #tpu.memory_space<vmem>>, vector<1x668xf32>,
    %30 = vector.extract_strided_slice %1 {offsets = [0, 60], sizes = [1, 668], strides = [1, 1]} : vector<1x784xf32> to vector<1x668xf32>
    %c14 = arith.constant 14 : index
    %c0_17 = arith.constant 0 : index
    %31 = vector.load %arg15[%c14, %c0_17] : memref<25x668xf32, #tpu.memory_space<vmem>>, vector<1x668xf32>
    tpu.vector_store %arg15[%c14, %c0_17], %30 {strides = array<i32>} : memref<25x668xf32, #tpu.memory_space<vmem>>, vector<1x668xf32>,
    %32 = vector.extract_strided_slice %1 {offsets = [0, 84], sizes = [1, 668], strides = [1, 1]} : vector<1x784xf32> to vector<1x668xf32>
    %c15 = arith.constant 15 : index
    %c0_18 = arith.constant 0 : index
    %33 = vector.load %arg15[%c15, %c0_18] : memref<25x668xf32, #tpu.memory_space<vmem>>, vector<1x668xf32>
    tpu.vector_store %arg15[%c15, %c0_18], %32 {strides = array<i32>} : memref<25x668xf32, #tpu.memory_space<vmem>>, vector<1x668xf32>,
    %34 = vector.extract_strided_slice %1 {offsets = [0, 85], sizes = [1, 668], strides = [1, 1]} : vector<1x784xf32> to vector<1x668xf32>
    %c16 = arith.constant 16 : index
    %c0_19 = arith.constant 0 : index
    %35 = vector.load %arg15[%c16, %c0_19] : memref<25x668xf32, #tpu.memory_space<vmem>>, vector<1x668xf32>
    tpu.vector_store %arg15[%c16, %c0_19], %34 {strides = array<i32>} : memref<25x668xf32, #tpu.memory_space<vmem>>, vector<1x668xf32>,
    %36 = vector.extract_strided_slice %1 {offsets = [0, 86], sizes = [1, 668], strides = [1, 1]} : vector<1x784xf32> to vector<1x668xf32>
    %c17 = arith.constant 17 : index
    %c0_20 = arith.constant 0 : index
    %37 = vector.load %arg15[%c17, %c0_20] : memref<25x668xf32, #tpu.memory_space<vmem>>, vector<1x668xf32>
    tpu.vector_store %arg15[%c17, %c0_20], %36 {strides = array<i32>} : memref<25x668xf32, #tpu.memory_space<vmem>>, vector<1x668xf32>,
    %38 = vector.extract_strided_slice %1 {offsets = [0, 87], sizes = [1, 668], strides = [1, 1]} : vector<1x784xf32> to vector<1x668xf32>
    %c18 = arith.constant 18 : index
    %c0_21 = arith.constant 0 : index
    %39 = vector.load %arg15[%c18, %c0_21] : memref<25x668xf32, #tpu.memory_space<vmem>>, vector<1x668xf32>
    tpu.vector_store %arg15[%c18, %c0_21], %38 {strides = array<i32>} : memref<25x668xf32, #tpu.memory_space<vmem>>, vector<1x668xf32>,
    %40 = vector.extract_strided_slice %1 {offsets = [0, 88], sizes = [1, 668], strides = [1, 1]} : vector<1x784xf32> to vector<1x668xf32>
    %c19 = arith.constant 19 : index
    %c0_22 = arith.constant 0 : index
    %41 = vector.load %arg15[%c19, %c0_22] : memref<25x668xf32, #tpu.memory_space<vmem>>, vector<1x668xf32>
    tpu.vector_store %arg15[%c19, %c0_22], %40 {strides = array<i32>} : memref<25x668xf32, #tpu.memory_space<vmem>>, vector<1x668xf32>,
    %42 = vector.extract_strided_slice %1 {offsets = [0, 112], sizes = [1, 668], strides = [1, 1]} : vector<1x784xf32> to vector<1x668xf32>
    %c20 = arith.constant 20 : index
    %c0_23 = arith.constant 0 : index
    %43 = vector.load %arg15[%c20, %c0_23] : memref<25x668xf32, #tpu.memory_space<vmem>>, vector<1x668xf32>
    tpu.vector_store %arg15[%c20, %c0_23], %42 {strides = array<i32>} : memref<25x668xf32, #tpu.memory_space<vmem>>, vector<1x668xf32>,
    %44 = vector.extract_strided_slice %1 {offsets = [0, 113], sizes = [1, 668], strides = [1, 1]} : vector<1x784xf32> to vector<1x668xf32>
    %c21 = arith.constant 21 : index
    %c0_24 = arith.constant 0 : index
    %45 = vector.load %arg15[%c21, %c0_24] : memref<25x668xf32, #tpu.memory_space<vmem>>, vector<1x668xf32>
    tpu.vector_store %arg15[%c21, %c0_24], %44 {strides = array<i32>} : memref<25x668xf32, #tpu.memory_space<vmem>>, vector<1x668xf32>,
    %46 = vector.extract_strided_slice %1 {offsets = [0, 114], sizes = [1, 668], strides = [1, 1]} : vector<1x784xf32> to vector<1x668xf32>
    %c22 = arith.constant 22 : index
    %c0_25 = arith.constant 0 : index
    %47 = vector.load %arg15[%c22, %c0_25] : memref<25x668xf32, #tpu.memory_space<vmem>>, vector<1x668xf32>
    tpu.vector_store %arg15[%c22, %c0_25], %46 {strides = array<i32>} : memref<25x668xf32, #tpu.memory_space<vmem>>, vector<1x668xf32>,
    %48 = vector.extract_strided_slice %1 {offsets = [0, 115], sizes = [1, 668], strides = [1, 1]} : vector<1x784xf32> to vector<1x668xf32>
    %c23 = arith.constant 23 : index
    %c0_26 = arith.constant 0 : index
    %49 = vector.load %arg15[%c23, %c0_26] : memref<25x668xf32, #tpu.memory_space<vmem>>, vector<1x668xf32>
    tpu.vector_store %arg15[%c23, %c0_26], %48 {strides = array<i32>} : memref<25x668xf32, #tpu.memory_space<vmem>>, vector<1x668xf32>,
    %50 = vector.extract_strided_slice %1 {offsets = [0, 116], sizes = [1, 668], strides = [1, 1]} : vector<1x784xf32> to vector<1x668xf32>
    %c24 = arith.constant 24 : index
    %c0_27 = arith.constant 0 : index
    %51 = vector.load %arg15[%c24, %c0_27] : memref<25x668xf32, #tpu.memory_space<vmem>>, vector<1x668xf32>
    tpu.vector_store %arg15[%c24, %c0_27], %50 {strides = array<i32>} : memref<25x668xf32, #tpu.memory_space<vmem>>, vector<1x668xf32>,
    %c0_28 = arith.constant 0 : index
    %c0_29 = arith.constant 0 : index
    %52 = vector.load %arg2[%c0_28, %c0_29] : memref<6x25xf32, #tpu.memory_space<vmem>>, vector<6x25xf32>
    %c0_30 = arith.constant 0 : index
    %c0_31 = arith.constant 0 : index
    %53 = vector.load %arg15[%c0_30, %c0_31] : memref<25x668xf32, #tpu.memory_space<vmem>>, vector<25x668xf32>
    %cst = arith.constant dense<0.000000e+00> : vector<6x668xf32>
    %54 = tpu.matmul %52, %53, %cst {dimension_numbers = #tpu.dot_dimension_numbers<[1], [0], [0], [1], [0, 0, 1, 1], [], []>} : vector<6x25xf32>, vector<25x668xf32>, vector<6x668xf32> -> vector<6x668xf32>
    %c0_32 = arith.constant 0 : index
    %c0_33 = arith.constant 0 : index
    %55 = vector.load %arg3[%c0_32, %c0_33] : memref<6x1xf32, #tpu.memory_space<vmem>>, vector<6x1xf32>
    %56 = vector.broadcast %55 : vector<6x1xf32> to vector<6x668xf32>
    %57 = arith.addf %54, %56 : vector<6x668xf32>
    %cst_34 = arith.constant 0.000000e+00 : f32
    %58 = vector.broadcast %cst_34 : f32 to vector<6x668xf32>
    %59 = arith.maximumf %57, %58 : vector<6x668xf32>
    %c0_35 = arith.constant 0 : index
    %c0_36 = arith.constant 0 : index
    %60 = vector.load %arg6[%c0_35, %c0_36] : memref<639x144xf32, #tpu.memory_space<vmem>>, vector<639x144xf32>
    %61 = vector.extract_strided_slice %59 {offsets = [0, 0], sizes = [6, 639], strides = [1, 1]} : vector<6x668xf32> to vector<6x639xf32>
    %cst_37 = arith.constant dense<0.000000e+00> : vector<6x144xf32>
    %62 = tpu.matmul %61, %60, %cst_37 {dimension_numbers = #tpu.dot_dimension_numbers<[1], [0], [0], [1], [0, 0, 1, 1], [], []>} : vector<6x639xf32>, vector<639x144xf32>, vector<6x144xf32> -> vector<6x144xf32>
    %63 = vector.extract_strided_slice %59 {offsets = [0, 1], sizes = [6, 639], strides = [1, 1]} : vector<6x668xf32> to vector<6x639xf32>
    %cst_38 = arith.constant dense<0.000000e+00> : vector<6x144xf32>
    %64 = tpu.matmul %63, %60, %cst_38 {dimension_numbers = #tpu.dot_dimension_numbers<[1], [0], [0], [1], [0, 0, 1, 1], [], []>} : vector<6x639xf32>, vector<639x144xf32>, vector<6x144xf32> -> vector<6x144xf32>
    %65 = vector.extract_strided_slice %59 {offsets = [0, 28], sizes = [6, 639], strides = [1, 1]} : vector<6x668xf32> to vector<6x639xf32>
    %cst_39 = arith.constant dense<0.000000e+00> : vector<6x144xf32>
    %66 = tpu.matmul %65, %60, %cst_39 {dimension_numbers = #tpu.dot_dimension_numbers<[1], [0], [0], [1], [0, 0, 1, 1], [], []>} : vector<6x639xf32>, vector<639x144xf32>, vector<6x144xf32> -> vector<6x144xf32>
    %67 = vector.extract_strided_slice %59 {offsets = [0, 29], sizes = [6, 639], strides = [1, 1]} : vector<6x668xf32> to vector<6x639xf32>
    %cst_40 = arith.constant dense<0.000000e+00> : vector<6x144xf32>
    %68 = tpu.matmul %67, %60, %cst_40 {dimension_numbers = #tpu.dot_dimension_numbers<[1], [0], [0], [1], [0, 0, 1, 1], [], []>} : vector<6x639xf32>, vector<639x144xf32>, vector<6x144xf32> -> vector<6x144xf32>
    %69 = arith.maximumf %62, %64 : vector<6x144xf32>
    %70 = arith.maximumf %66, %68 : vector<6x144xf32>
    %71 = arith.maximumf %69, %70 : vector<6x144xf32>
    %72 = vector.extract_strided_slice %71 {offsets = [0, 0], sizes = [6, 92], strides = [1, 1]} : vector<6x144xf32> to vector<6x92xf32>
    %c0_41 = arith.constant 0 : index
    %c0_42 = arith.constant 0 : index
    %73 = vector.load %arg16[%c0_41, %c0_42] : memref<150x92xf32, #tpu.memory_space<vmem>>, vector<6x92xf32>
    tpu.vector_store %arg16[%c0_41, %c0_42], %72 {strides = array<i32>} : memref<150x92xf32, #tpu.memory_space<vmem>>, vector<6x92xf32>,
    %74 = vector.extract_strided_slice %71 {offsets = [0, 1], sizes = [6, 92], strides = [1, 1]} : vector<6x144xf32> to vector<6x92xf32>
    %c6_43 = arith.constant 6 : index
    %c0_44 = arith.constant 0 : index
    %75 = vector.load %arg16[%c6_43, %c0_44] : memref<150x92xf32, #tpu.memory_space<vmem>>, vector<6x92xf32>
    tpu.vector_store %arg16[%c6_43, %c0_44], %74 {strides = array<i32>} : memref<150x92xf32, #tpu.memory_space<vmem>>, vector<6x92xf32>,
    %76 = vector.extract_strided_slice %71 {offsets = [0, 2], sizes = [6, 92], strides = [1, 1]} : vector<6x144xf32> to vector<6x92xf32>
    %c12_45 = arith.constant 12 : index
    %c0_46 = arith.constant 0 : index
    %77 = vector.load %arg16[%c12_45, %c0_46] : memref<150x92xf32, #tpu.memory_space<vmem>>, vector<6x92xf32>
    tpu.vector_store %arg16[%c12_45, %c0_46], %76 {strides = array<i32>} : memref<150x92xf32, #tpu.memory_space<vmem>>, vector<6x92xf32>,
    %78 = vector.extract_strided_slice %71 {offsets = [0, 3], sizes = [6, 92], strides = [1, 1]} : vector<6x144xf32> to vector<6x92xf32>
    %c18_47 = arith.constant 18 : index
    %c0_48 = arith.constant 0 : index
    %79 = vector.load %arg16[%c18_47, %c0_48] : memref<150x92xf32, #tpu.memory_space<vmem>>, vector<6x92xf32>
    tpu.vector_store %arg16[%c18_47, %c0_48], %78 {strides = array<i32>} : memref<150x92xf32, #tpu.memory_space<vmem>>, vector<6x92xf32>,
    %80 = vector.extract_strided_slice %71 {offsets = [0, 4], sizes = [6, 92], strides = [1, 1]} : vector<6x144xf32> to vector<6x92xf32>
    %c24_49 = arith.constant 24 : index
    %c0_50 = arith.constant 0 : index
    %81 = vector.load %arg16[%c24_49, %c0_50] : memref<150x92xf32, #tpu.memory_space<vmem>>, vector<6x92xf32>
    tpu.vector_store %arg16[%c24_49, %c0_50], %80 {strides = array<i32>} : memref<150x92xf32, #tpu.memory_space<vmem>>, vector<6x92xf32>,
    %82 = vector.extract_strided_slice %71 {offsets = [0, 12], sizes = [6, 92], strides = [1, 1]} : vector<6x144xf32> to vector<6x92xf32>
    %c30 = arith.constant 30 : index
    %c0_51 = arith.constant 0 : index
    %83 = vector.load %arg16[%c30, %c0_51] : memref<150x92xf32, #tpu.memory_space<vmem>>, vector<6x92xf32>
    tpu.vector_store %arg16[%c30, %c0_51], %82 {strides = array<i32>} : memref<150x92xf32, #tpu.memory_space<vmem>>, vector<6x92xf32>,
    %84 = vector.extract_strided_slice %71 {offsets = [0, 13], sizes = [6, 92], strides = [1, 1]} : vector<6x144xf32> to vector<6x92xf32>
    %c36 = arith.constant 36 : index
    %c0_52 = arith.constant 0 : index
    %85 = vector.load %arg16[%c36, %c0_52] : memref<150x92xf32, #tpu.memory_space<vmem>>, vector<6x92xf32>
    tpu.vector_store %arg16[%c36, %c0_52], %84 {strides = array<i32>} : memref<150x92xf32, #tpu.memory_space<vmem>>, vector<6x92xf32>,
    %86 = vector.extract_strided_slice %71 {offsets = [0, 14], sizes = [6, 92], strides = [1, 1]} : vector<6x144xf32> to vector<6x92xf32>
    %c42 = arith.constant 42 : index
    %c0_53 = arith.constant 0 : index
    %87 = vector.load %arg16[%c42, %c0_53] : memref<150x92xf32, #tpu.memory_space<vmem>>, vector<6x92xf32>
    tpu.vector_store %arg16[%c42, %c0_53], %86 {strides = array<i32>} : memref<150x92xf32, #tpu.memory_space<vmem>>, vector<6x92xf32>,
    %88 = vector.extract_strided_slice %71 {offsets = [0, 15], sizes = [6, 92], strides = [1, 1]} : vector<6x144xf32> to vector<6x92xf32>
    %c48 = arith.constant 48 : index
    %c0_54 = arith.constant 0 : index
    %89 = vector.load %arg16[%c48, %c0_54] : memref<150x92xf32, #tpu.memory_space<vmem>>, vector<6x92xf32>
    tpu.vector_store %arg16[%c48, %c0_54], %88 {strides = array<i32>} : memref<150x92xf32, #tpu.memory_space<vmem>>, vector<6x92xf32>,
    %90 = vector.extract_strided_slice %71 {offsets = [0, 16], sizes = [6, 92], strides = [1, 1]} : vector<6x144xf32> to vector<6x92xf32>
    %c54 = arith.constant 54 : index
    %c0_55 = arith.constant 0 : index
    %91 = vector.load %arg16[%c54, %c0_55] : memref<150x92xf32, #tpu.memory_space<vmem>>, vector<6x92xf32>
    tpu.vector_store %arg16[%c54, %c0_55], %90 {strides = array<i32>} : memref<150x92xf32, #tpu.memory_space<vmem>>, vector<6x92xf32>,
    %92 = vector.extract_strided_slice %71 {offsets = [0, 24], sizes = [6, 92], strides = [1, 1]} : vector<6x144xf32> to vector<6x92xf32>
    %c60 = arith.constant 60 : index
    %c0_56 = arith.constant 0 : index
    %93 = vector.load %arg16[%c60, %c0_56] : memref<150x92xf32, #tpu.memory_space<vmem>>, vector<6x92xf32>
    tpu.vector_store %arg16[%c60, %c0_56], %92 {strides = array<i32>} : memref<150x92xf32, #tpu.memory_space<vmem>>, vector<6x92xf32>,
    %94 = vector.extract_strided_slice %71 {offsets = [0, 25], sizes = [6, 92], strides = [1, 1]} : vector<6x144xf32> to vector<6x92xf32>
    %c66 = arith.constant 66 : index
    %c0_57 = arith.constant 0 : index
    %95 = vector.load %arg16[%c66, %c0_57] : memref<150x92xf32, #tpu.memory_space<vmem>>, vector<6x92xf32>
    tpu.vector_store %arg16[%c66, %c0_57], %94 {strides = array<i32>} : memref<150x92xf32, #tpu.memory_space<vmem>>, vector<6x92xf32>,
    %96 = vector.extract_strided_slice %71 {offsets = [0, 26], sizes = [6, 92], strides = [1, 1]} : vector<6x144xf32> to vector<6x92xf32>
    %c72 = arith.constant 72 : index
    %c0_58 = arith.constant 0 : index
    %97 = vector.load %arg16[%c72, %c0_58] : memref<150x92xf32, #tpu.memory_space<vmem>>, vector<6x92xf32>
    tpu.vector_store %arg16[%c72, %c0_58], %96 {strides = array<i32>} : memref<150x92xf32, #tpu.memory_space<vmem>>, vector<6x92xf32>,
    %98 = vector.extract_strided_slice %71 {offsets = [0, 27], sizes = [6, 92], strides = [1, 1]} : vector<6x144xf32> to vector<6x92xf32>
    %c78 = arith.constant 78 : index
    %c0_59 = arith.constant 0 : index
    %99 = vector.load %arg16[%c78, %c0_59] : memref<150x92xf32, #tpu.memory_space<vmem>>, vector<6x92xf32>
    tpu.vector_store %arg16[%c78, %c0_59], %98 {strides = array<i32>} : memref<150x92xf32, #tpu.memory_space<vmem>>, vector<6x92xf32>,
    %100 = vector.extract_strided_slice %71 {offsets = [0, 28], sizes = [6, 92], strides = [1, 1]} : vector<6x144xf32> to vector<6x92xf32>
    %c84 = arith.constant 84 : index
    %c0_60 = arith.constant 0 : index
    %101 = vector.load %arg16[%c84, %c0_60] : memref<150x92xf32, #tpu.memory_space<vmem>>, vector<6x92xf32>
    tpu.vector_store %arg16[%c84, %c0_60], %100 {strides = array<i32>} : memref<150x92xf32, #tpu.memory_space<vmem>>, vector<6x92xf32>,
    %102 = vector.extract_strided_slice %71 {offsets = [0, 36], sizes = [6, 92], strides = [1, 1]} : vector<6x144xf32> to vector<6x92xf32>
    %c90 = arith.constant 90 : index
    %c0_61 = arith.constant 0 : index
    %103 = vector.load %arg16[%c90, %c0_61] : memref<150x92xf32, #tpu.memory_space<vmem>>, vector<6x92xf32>
    tpu.vector_store %arg16[%c90, %c0_61], %102 {strides = array<i32>} : memref<150x92xf32, #tpu.memory_space<vmem>>, vector<6x92xf32>,
    %104 = vector.extract_strided_slice %71 {offsets = [0, 37], sizes = [6, 92], strides = [1, 1]} : vector<6x144xf32> to vector<6x92xf32>
    %c96 = arith.constant 96 : index
    %c0_62 = arith.constant 0 : index
    %105 = vector.load %arg16[%c96, %c0_62] : memref<150x92xf32, #tpu.memory_space<vmem>>, vector<6x92xf32>
    tpu.vector_store %arg16[%c96, %c0_62], %104 {strides = array<i32>} : memref<150x92xf32, #tpu.memory_space<vmem>>, vector<6x92xf32>,
    %106 = vector.extract_strided_slice %71 {offsets = [0, 38], sizes = [6, 92], strides = [1, 1]} : vector<6x144xf32> to vector<6x92xf32>
    %c102 = arith.constant 102 : index
    %c0_63 = arith.constant 0 : index
    %107 = vector.load %arg16[%c102, %c0_63] : memref<150x92xf32, #tpu.memory_space<vmem>>, vector<6x92xf32>
    tpu.vector_store %arg16[%c102, %c0_63], %106 {strides = array<i32>} : memref<150x92xf32, #tpu.memory_space<vmem>>, vector<6x92xf32>,
    %108 = vector.extract_strided_slice %71 {offsets = [0, 39], sizes = [6, 92], strides = [1, 1]} : vector<6x144xf32> to vector<6x92xf32>
    %c108 = arith.constant 108 : index
    %c0_64 = arith.constant 0 : index
    %109 = vector.load %arg16[%c108, %c0_64] : memref<150x92xf32, #tpu.memory_space<vmem>>, vector<6x92xf32>
    tpu.vector_store %arg16[%c108, %c0_64], %108 {strides = array<i32>} : memref<150x92xf32, #tpu.memory_space<vmem>>, vector<6x92xf32>,
    %110 = vector.extract_strided_slice %71 {offsets = [0, 40], sizes = [6, 92], strides = [1, 1]} : vector<6x144xf32> to vector<6x92xf32>
    %c114 = arith.constant 114 : index
    %c0_65 = arith.constant 0 : index
    %111 = vector.load %arg16[%c114, %c0_65] : memref<150x92xf32, #tpu.memory_space<vmem>>, vector<6x92xf32>
    tpu.vector_store %arg16[%c114, %c0_65], %110 {strides = array<i32>} : memref<150x92xf32, #tpu.memory_space<vmem>>, vector<6x92xf32>,
    %112 = vector.extract_strided_slice %71 {offsets = [0, 48], sizes = [6, 92], strides = [1, 1]} : vector<6x144xf32> to vector<6x92xf32>
    %c120 = arith.constant 120 : index
    %c0_66 = arith.constant 0 : index
    %113 = vector.load %arg16[%c120, %c0_66] : memref<150x92xf32, #tpu.memory_space<vmem>>, vector<6x92xf32>
    tpu.vector_store %arg16[%c120, %c0_66], %112 {strides = array<i32>} : memref<150x92xf32, #tpu.memory_space<vmem>>, vector<6x92xf32>,
    %114 = vector.extract_strided_slice %71 {offsets = [0, 49], sizes = [6, 92], strides = [1, 1]} : vector<6x144xf32> to vector<6x92xf32>
    %c126 = arith.constant 126 : index
    %c0_67 = arith.constant 0 : index
    %115 = vector.load %arg16[%c126, %c0_67] : memref<150x92xf32, #tpu.memory_space<vmem>>, vector<6x92xf32>
    tpu.vector_store %arg16[%c126, %c0_67], %114 {strides = array<i32>} : memref<150x92xf32, #tpu.memory_space<vmem>>, vector<6x92xf32>,
    %116 = vector.extract_strided_slice %71 {offsets = [0, 50], sizes = [6, 92], strides = [1, 1]} : vector<6x144xf32> to vector<6x92xf32>
    %c132 = arith.constant 132 : index
    %c0_68 = arith.constant 0 : index
    %117 = vector.load %arg16[%c132, %c0_68] : memref<150x92xf32, #tpu.memory_space<vmem>>, vector<6x92xf32>
    tpu.vector_store %arg16[%c132, %c0_68], %116 {strides = array<i32>} : memref<150x92xf32, #tpu.memory_space<vmem>>, vector<6x92xf32>,
    %118 = vector.extract_strided_slice %71 {offsets = [0, 51], sizes = [6, 92], strides = [1, 1]} : vector<6x144xf32> to vector<6x92xf32>
    %c138 = arith.constant 138 : index
    %c0_69 = arith.constant 0 : index
    %119 = vector.load %arg16[%c138, %c0_69] : memref<150x92xf32, #tpu.memory_space<vmem>>, vector<6x92xf32>
    tpu.vector_store %arg16[%c138, %c0_69], %118 {strides = array<i32>} : memref<150x92xf32, #tpu.memory_space<vmem>>, vector<6x92xf32>,
    %120 = vector.extract_strided_slice %71 {offsets = [0, 52], sizes = [6, 92], strides = [1, 1]} : vector<6x144xf32> to vector<6x92xf32>
    %c144 = arith.constant 144 : index
    %c0_70 = arith.constant 0 : index
    %121 = vector.load %arg16[%c144, %c0_70] : memref<150x92xf32, #tpu.memory_space<vmem>>, vector<6x92xf32>
    tpu.vector_store %arg16[%c144, %c0_70], %120 {strides = array<i32>} : memref<150x92xf32, #tpu.memory_space<vmem>>, vector<6x92xf32>,
    %c0_71 = arith.constant 0 : index
    %c0_72 = arith.constant 0 : index
    %122 = vector.load %arg4[%c0_71, %c0_72] : memref<16x150xf32, #tpu.memory_space<vmem>>, vector<16x150xf32>
    %c0_73 = arith.constant 0 : index
    %c0_74 = arith.constant 0 : index
    %123 = vector.load %arg16[%c0_73, %c0_74] : memref<150x92xf32, #tpu.memory_space<vmem>>, vector<150x92xf32>
    %cst_75 = arith.constant dense<0.000000e+00> : vector<16x92xf32>
    %124 = tpu.matmul %122, %123, %cst_75 {dimension_numbers = #tpu.dot_dimension_numbers<[1], [0], [0], [1], [0, 0, 1, 1], [], []>} : vector<16x150xf32>, vector<150x92xf32>, vector<16x92xf32> -> vector<16x92xf32>
    %c0_76 = arith.constant 0 : index
    %c0_77 = arith.constant 0 : index
    %125 = vector.load %arg5[%c0_76, %c0_77] : memref<16x1xf32, #tpu.memory_space<vmem>>, vector<16x1xf32>
    %126 = vector.broadcast %125 : vector<16x1xf32> to vector<16x92xf32>
    %127 = arith.addf %124, %126 : vector<16x92xf32>
    %cst_78 = arith.constant 0.000000e+00 : f32
    %128 = vector.broadcast %cst_78 : f32 to vector<16x92xf32>
    %129 = arith.maximumf %127, %128 : vector<16x92xf32>
    %c0_79 = arith.constant 0 : index
    %c0_80 = arith.constant 0 : index
    %130 = vector.load %arg7[%c0_79, %c0_80] : memref<79x16xf32, #tpu.memory_space<vmem>>, vector<79x16xf32>
    %131 = vector.extract_strided_slice %129 {offsets = [0, 0], sizes = [16, 79], strides = [1, 1]} : vector<16x92xf32> to vector<16x79xf32>
    %cst_81 = arith.constant dense<0.000000e+00> : vector<16x16xf32>
    %132 = tpu.matmul %131, %130, %cst_81 {dimension_numbers = #tpu.dot_dimension_numbers<[1], [0], [0], [1], [0, 0, 1, 1], [], []>} : vector<16x79xf32>, vector<79x16xf32>, vector<16x16xf32> -> vector<16x16xf32>
    %133 = vector.extract_strided_slice %129 {offsets = [0, 1], sizes = [16, 79], strides = [1, 1]} : vector<16x92xf32> to vector<16x79xf32>
    %cst_82 = arith.constant dense<0.000000e+00> : vector<16x16xf32>
    %134 = tpu.matmul %133, %130, %cst_82 {dimension_numbers = #tpu.dot_dimension_numbers<[1], [0], [0], [1], [0, 0, 1, 1], [], []>} : vector<16x79xf32>, vector<79x16xf32>, vector<16x16xf32> -> vector<16x16xf32>
    %135 = vector.extract_strided_slice %129 {offsets = [0, 12], sizes = [16, 79], strides = [1, 1]} : vector<16x92xf32> to vector<16x79xf32>
    %cst_83 = arith.constant dense<0.000000e+00> : vector<16x16xf32>
    %136 = tpu.matmul %135, %130, %cst_83 {dimension_numbers = #tpu.dot_dimension_numbers<[1], [0], [0], [1], [0, 0, 1, 1], [], []>} : vector<16x79xf32>, vector<79x16xf32>, vector<16x16xf32> -> vector<16x16xf32>
    %137 = vector.extract_strided_slice %129 {offsets = [0, 13], sizes = [16, 79], strides = [1, 1]} : vector<16x92xf32> to vector<16x79xf32>
    %cst_84 = arith.constant dense<0.000000e+00> : vector<16x16xf32>
    %138 = tpu.matmul %137, %130, %cst_84 {dimension_numbers = #tpu.dot_dimension_numbers<[1], [0], [0], [1], [0, 0, 1, 1], [], []>} : vector<16x79xf32>, vector<79x16xf32>, vector<16x16xf32> -> vector<16x16xf32>
    %139 = arith.maximumf %132, %134 : vector<16x16xf32>
    %140 = arith.maximumf %136, %138 : vector<16x16xf32>
    %141 = arith.maximumf %139, %140 : vector<16x16xf32>
    %142 = vector.extract_strided_slice %141 {offsets = [0, 0], sizes = [1, 16], strides = [1, 1]} : vector<16x16xf32> to vector<1x16xf32>
    %c0_85 = arith.constant 0 : index
    %c0_86 = arith.constant 0 : index
    %143 = vector.load %arg17[%c0_85, %c0_86] : memref<1x256xf32, #tpu.memory_space<vmem>>, vector<1x16xf32>
    tpu.vector_store %arg17[%c0_85, %c0_86], %142 {strides = array<i32>} : memref<1x256xf32, #tpu.memory_space<vmem>>, vector<1x16xf32>,
    %144 = vector.extract_strided_slice %141 {offsets = [1, 0], sizes = [1, 16], strides = [1, 1]} : vector<16x16xf32> to vector<1x16xf32>
    %c0_87 = arith.constant 0 : index
    %c16_88 = arith.constant 16 : index
    %145 = vector.load %arg17[%c0_87, %c16_88] : memref<1x256xf32, #tpu.memory_space<vmem>>, vector<1x16xf32>
    tpu.vector_store %arg17[%c0_87, %c16_88], %144 {strides = array<i32>} : memref<1x256xf32, #tpu.memory_space<vmem>>, vector<1x16xf32>,
    %146 = vector.extract_strided_slice %141 {offsets = [2, 0], sizes = [1, 16], strides = [1, 1]} : vector<16x16xf32> to vector<1x16xf32>
    %c0_89 = arith.constant 0 : index
    %c32 = arith.constant 32 : index
    %147 = vector.load %arg17[%c0_89, %c32] : memref<1x256xf32, #tpu.memory_space<vmem>>, vector<1x16xf32>
    tpu.vector_store %arg17[%c0_89, %c32], %146 {strides = array<i32>} : memref<1x256xf32, #tpu.memory_space<vmem>>, vector<1x16xf32>,
    %148 = vector.extract_strided_slice %141 {offsets = [3, 0], sizes = [1, 16], strides = [1, 1]} : vector<16x16xf32> to vector<1x16xf32>
    %c0_90 = arith.constant 0 : index
    %c48_91 = arith.constant 48 : index
    %149 = vector.load %arg17[%c0_90, %c48_91] : memref<1x256xf32, #tpu.memory_space<vmem>>, vector<1x16xf32>
    tpu.vector_store %arg17[%c0_90, %c48_91], %148 {strides = array<i32>} : memref<1x256xf32, #tpu.memory_space<vmem>>, vector<1x16xf32>,
    %150 = vector.extract_strided_slice %141 {offsets = [4, 0], sizes = [1, 16], strides = [1, 1]} : vector<16x16xf32> to vector<1x16xf32>
    %c0_92 = arith.constant 0 : index
    %c64 = arith.constant 64 : index
    %151 = vector.load %arg17[%c0_92, %c64] : memref<1x256xf32, #tpu.memory_space<vmem>>, vector<1x16xf32>
    tpu.vector_store %arg17[%c0_92, %c64], %150 {strides = array<i32>} : memref<1x256xf32, #tpu.memory_space<vmem>>, vector<1x16xf32>,
    %152 = vector.extract_strided_slice %141 {offsets = [5, 0], sizes = [1, 16], strides = [1, 1]} : vector<16x16xf32> to vector<1x16xf32>
    %c0_93 = arith.constant 0 : index
    %c80 = arith.constant 80 : index
    %153 = vector.load %arg17[%c0_93, %c80] : memref<1x256xf32, #tpu.memory_space<vmem>>, vector<1x16xf32>
    tpu.vector_store %arg17[%c0_93, %c80], %152 {strides = array<i32>} : memref<1x256xf32, #tpu.memory_space<vmem>>, vector<1x16xf32>,
    %154 = vector.extract_strided_slice %141 {offsets = [6, 0], sizes = [1, 16], strides = [1, 1]} : vector<16x16xf32> to vector<1x16xf32>
    %c0_94 = arith.constant 0 : index
    %c96_95 = arith.constant 96 : index
    %155 = vector.load %arg17[%c0_94, %c96_95] : memref<1x256xf32, #tpu.memory_space<vmem>>, vector<1x16xf32>
    tpu.vector_store %arg17[%c0_94, %c96_95], %154 {strides = array<i32>} : memref<1x256xf32, #tpu.memory_space<vmem>>, vector<1x16xf32>,
    %156 = vector.extract_strided_slice %141 {offsets = [7, 0], sizes = [1, 16], strides = [1, 1]} : vector<16x16xf32> to vector<1x16xf32>
    %c0_96 = arith.constant 0 : index
    %c112 = arith.constant 112 : index
    %157 = vector.load %arg17[%c0_96, %c112] : memref<1x256xf32, #tpu.memory_space<vmem>>, vector<1x16xf32>
    tpu.vector_store %arg17[%c0_96, %c112], %156 {strides = array<i32>} : memref<1x256xf32, #tpu.memory_space<vmem>>, vector<1x16xf32>,
    %158 = vector.extract_strided_slice %141 {offsets = [8, 0], sizes = [1, 16], strides = [1, 1]} : vector<16x16xf32> to vector<1x16xf32>
    %c0_97 = arith.constant 0 : index
    %c128 = arith.constant 128 : index
    %159 = vector.load %arg17[%c0_97, %c128] : memref<1x256xf32, #tpu.memory_space<vmem>>, vector<1x16xf32>
    tpu.vector_store %arg17[%c0_97, %c128], %158 {strides = array<i32>} : memref<1x256xf32, #tpu.memory_space<vmem>>, vector<1x16xf32>,
    %160 = vector.extract_strided_slice %141 {offsets = [9, 0], sizes = [1, 16], strides = [1, 1]} : vector<16x16xf32> to vector<1x16xf32>
    %c0_98 = arith.constant 0 : index
    %c144_99 = arith.constant 144 : index
    %161 = vector.load %arg17[%c0_98, %c144_99] : memref<1x256xf32, #tpu.memory_space<vmem>>, vector<1x16xf32>
    tpu.vector_store %arg17[%c0_98, %c144_99], %160 {strides = array<i32>} : memref<1x256xf32, #tpu.memory_space<vmem>>, vector<1x16xf32>,
    %162 = vector.extract_strided_slice %141 {offsets = [10, 0], sizes = [1, 16], strides = [1, 1]} : vector<16x16xf32> to vector<1x16xf32>
    %c0_100 = arith.constant 0 : index
    %c160 = arith.constant 160 : index
    %163 = vector.load %arg17[%c0_100, %c160] : memref<1x256xf32, #tpu.memory_space<vmem>>, vector<1x16xf32>
    tpu.vector_store %arg17[%c0_100, %c160], %162 {strides = array<i32>} : memref<1x256xf32, #tpu.memory_space<vmem>>, vector<1x16xf32>,
    %164 = vector.extract_strided_slice %141 {offsets = [11, 0], sizes = [1, 16], strides = [1, 1]} : vector<16x16xf32> to vector<1x16xf32>
    %c0_101 = arith.constant 0 : index
    %c176 = arith.constant 176 : index
    %165 = vector.load %arg17[%c0_101, %c176] : memref<1x256xf32, #tpu.memory_space<vmem>>, vector<1x16xf32>
    tpu.vector_store %arg17[%c0_101, %c176], %164 {strides = array<i32>} : memref<1x256xf32, #tpu.memory_space<vmem>>, vector<1x16xf32>,
    %166 = vector.extract_strided_slice %141 {offsets = [12, 0], sizes = [1, 16], strides = [1, 1]} : vector<16x16xf32> to vector<1x16xf32>
    %c0_102 = arith.constant 0 : index
    %c192 = arith.constant 192 : index
    %167 = vector.load %arg17[%c0_102, %c192] : memref<1x256xf32, #tpu.memory_space<vmem>>, vector<1x16xf32>
    tpu.vector_store %arg17[%c0_102, %c192], %166 {strides = array<i32>} : memref<1x256xf32, #tpu.memory_space<vmem>>, vector<1x16xf32>,
    %168 = vector.extract_strided_slice %141 {offsets = [13, 0], sizes = [1, 16], strides = [1, 1]} : vector<16x16xf32> to vector<1x16xf32>
    %c0_103 = arith.constant 0 : index
    %c208 = arith.constant 208 : index
    %169 = vector.load %arg17[%c0_103, %c208] : memref<1x256xf32, #tpu.memory_space<vmem>>, vector<1x16xf32>
    tpu.vector_store %arg17[%c0_103, %c208], %168 {strides = array<i32>} : memref<1x256xf32, #tpu.memory_space<vmem>>, vector<1x16xf32>,
    %170 = vector.extract_strided_slice %141 {offsets = [14, 0], sizes = [1, 16], strides = [1, 1]} : vector<16x16xf32> to vector<1x16xf32>
    %c0_104 = arith.constant 0 : index
    %c224 = arith.constant 224 : index
    %171 = vector.load %arg17[%c0_104, %c224] : memref<1x256xf32, #tpu.memory_space<vmem>>, vector<1x16xf32>
    tpu.vector_store %arg17[%c0_104, %c224], %170 {strides = array<i32>} : memref<1x256xf32, #tpu.memory_space<vmem>>, vector<1x16xf32>,
    %172 = vector.extract_strided_slice %141 {offsets = [15, 0], sizes = [1, 16], strides = [1, 1]} : vector<16x16xf32> to vector<1x16xf32>
    %c0_105 = arith.constant 0 : index
    %c240 = arith.constant 240 : index
    %173 = vector.load %arg17[%c0_105, %c240] : memref<1x256xf32, #tpu.memory_space<vmem>>, vector<1x16xf32>
    tpu.vector_store %arg17[%c0_105, %c240], %172 {strides = array<i32>} : memref<1x256xf32, #tpu.memory_space<vmem>>, vector<1x16xf32>,
    %c0_106 = arith.constant 0 : index
    %c0_107 = arith.constant 0 : index
    %174 = vector.load %arg17[%c0_106, %c0_107] : memref<1x256xf32, #tpu.memory_space<vmem>>, vector<1x256xf32>
    %c0_108 = arith.constant 0 : index
    %c0_109 = arith.constant 0 : index
    %175 = vector.load %arg8[%c0_108, %c0_109] : memref<256x120xf32, #tpu.memory_space<vmem>>, vector<256x120xf32>
    %cst_110 = arith.constant dense<0.000000e+00> : vector<1x120xf32>
    %176 = tpu.matmul %174, %175, %cst_110 {dimension_numbers = #tpu.dot_dimension_numbers<[1], [0], [0], [1], [0, 0, 1, 1], [], []>} : vector<1x256xf32>, vector<256x120xf32>, vector<1x120xf32> -> vector<1x120xf32>
    %c0_111 = arith.constant 0 : index
    %c0_112 = arith.constant 0 : index
    %177 = vector.load %arg9[%c0_111, %c0_112] : memref<1x120xf32, #tpu.memory_space<vmem>>, vector<1x120xf32>
    %178 = arith.addf %176, %177 : vector<1x120xf32>
    %cst_113 = arith.constant 0.000000e+00 : f32
    %179 = vector.broadcast %cst_113 : f32 to vector<1x120xf32>
    %180 = arith.maximumf %178, %179 : vector<1x120xf32>
    %c0_114 = arith.constant 0 : index
    %c0_115 = arith.constant 0 : index
    %181 = vector.load %arg10[%c0_114, %c0_115] : memref<120x84xf32, #tpu.memory_space<vmem>>, vector<120x84xf32>
    %cst_116 = arith.constant dense<0.000000e+00> : vector<1x84xf32>
    %182 = tpu.matmul %180, %181, %cst_116 {dimension_numbers = #tpu.dot_dimension_numbers<[1], [0], [0], [1], [0, 0, 1, 1], [], []>} : vector<1x120xf32>, vector<120x84xf32>, vector<1x84xf32> -> vector<1x84xf32>
    %c0_117 = arith.constant 0 : index
    %c0_118 = arith.constant 0 : index
    %183 = vector.load %arg11[%c0_117, %c0_118] : memref<1x84xf32, #tpu.memory_space<vmem>>, vector<1x84xf32>
    %184 = arith.addf %182, %183 : vector<1x84xf32>
    %cst_119 = arith.constant 0.000000e+00 : f32
    %185 = vector.broadcast %cst_119 : f32 to vector<1x84xf32>
    %186 = arith.maximumf %184, %185 : vector<1x84xf32>
    %c0_120 = arith.constant 0 : index
    %c0_121 = arith.constant 0 : index
    %187 = vector.load %arg12[%c0_120, %c0_121] : memref<84x10xf32, #tpu.memory_space<vmem>>, vector<84x10xf32>
    %cst_122 = arith.constant dense<0.000000e+00> : vector<1x10xf32>
    %188 = tpu.matmul %186, %187, %cst_122 {dimension_numbers = #tpu.dot_dimension_numbers<[1], [0], [0], [1], [0, 0, 1, 1], [], []>} : vector<1x84xf32>, vector<84x10xf32>, vector<1x10xf32> -> vector<1x10xf32>
    %c0_123 = arith.constant 0 : index
    %c0_124 = arith.constant 0 : index
    %189 = vector.load %arg13[%c0_123, %c0_124] : memref<1x10xf32, #tpu.memory_space<vmem>>, vector<1x10xf32>
    %190 = arith.addf %188, %189 : vector<1x10xf32>
    %c0_125 = arith.constant 0 : index
    %c0_126 = arith.constant 0 : index
    %c0_127 = arith.constant 0 : index
    %191 = vector.load %arg14[%c0_125, %c0_126, %c0_127] : memref<1x1x10xf32, #tpu.memory_space<vmem>>, vector<1x1x10xf32>
    %192 = vector.shape_cast %191 : vector<1x1x10xf32> to vector<1x10xf32>
    %193 = vector.shape_cast %190 : vector<1x10xf32> to vector<1x1x10xf32>
    tpu.vector_store %arg14[%c0_125, %c0_126, %c0_127], %193 {strides = array<i32>} : memref<1x1x10xf32, #tpu.memory_space<vmem>>, vector<1x1x10xf32>,
    return
  }
  func.func @transform_0(%arg0: i32) -> (i32, i32, i32) {
    %c0_i32 = arith.constant 0 : i32
    %c0_i32_0 = arith.constant 0 : i32
    %c0_i32_1 = arith.constant 0 : i32
    return %arg0, %c0_i32, %c0_i32_0 : i32, i32, i32
  }
  func.func @transform_1(%arg0: i32) -> (i32, i32) {
    %c0_i32 = arith.constant 0 : i32
    %c0_i32_0 = arith.constant 0 : i32
    %c0_i32_1 = arith.constant 0 : i32
    return %c0_i32, %c0_i32_0 : i32, i32
  }
  func.func @transform_2(%arg0: i32) -> (i32, i32) {
    %c0_i32 = arith.constant 0 : i32
    %c0_i32_0 = arith.constant 0 : i32
    %c0_i32_1 = arith.constant 0 : i32
    return %c0_i32, %c0_i32_0 : i32, i32
  }
  func.func @transform_3(%arg0: i32) -> (i32, i32) {
    %c0_i32 = arith.constant 0 : i32
    %c0_i32_0 = arith.constant 0 : i32
    %c0_i32_1 = arith.constant 0 : i32
    return %c0_i32, %c0_i32_0 : i32, i32
  }
  func.func @transform_4(%arg0: i32) -> (i32, i32) {
    %c0_i32 = arith.constant 0 : i32
    %c0_i32_0 = arith.constant 0 : i32
    %c0_i32_1 = arith.constant 0 : i32
    return %c0_i32, %c0_i32_0 : i32, i32
  }
  func.func @transform_5(%arg0: i32) -> (i32, i32) {
    %c0_i32 = arith.constant 0 : i32
    %c0_i32_0 = arith.constant 0 : i32
    %c0_i32_1 = arith.constant 0 : i32
    return %c0_i32, %c0_i32_0 : i32, i32
  }
  func.func @transform_6(%arg0: i32) -> (i32, i32) {
    %c0_i32 = arith.constant 0 : i32
    %c0_i32_0 = arith.constant 0 : i32
    %c0_i32_1 = arith.constant 0 : i32
    return %c0_i32, %c0_i32_0 : i32, i32
  }
  func.func @transform_7(%arg0: i32) -> (i32, i32) {
    %c0_i32 = arith.constant 0 : i32
    %c0_i32_0 = arith.constant 0 : i32
    %c0_i32_1 = arith.constant 0 : i32
    return %c0_i32, %c0_i32_0 : i32, i32
  }
  func.func @transform_8(%arg0: i32) -> (i32, i32) {
    %c0_i32 = arith.constant 0 : i32
    %c0_i32_0 = arith.constant 0 : i32
    %c0_i32_1 = arith.constant 0 : i32
    return %c0_i32, %c0_i32_0 : i32, i32
  }
  func.func @transform_9(%arg0: i32) -> (i32, i32) {
    %c0_i32 = arith.constant 0 : i32
    %c0_i32_0 = arith.constant 0 : i32
    %c0_i32_1 = arith.constant 0 : i32
    return %c0_i32, %c0_i32_0 : i32, i32
  }
  func.func @transform_10(%arg0: i32) -> (i32, i32) {
    %c0_i32 = arith.constant 0 : i32
    %c0_i32_0 = arith.constant 0 : i32
    %c0_i32_1 = arith.constant 0 : i32
    return %c0_i32, %c0_i32_0 : i32, i32
  }
  func.func @transform_11(%arg0: i32) -> (i32, i32) {
    %c0_i32 = arith.constant 0 : i32
    %c0_i32_0 = arith.constant 0 : i32
    %c0_i32_1 = arith.constant 0 : i32
    return %c0_i32, %c0_i32_0 : i32, i32
  }
  func.func @transform_12(%arg0: i32) -> (i32, i32) {
    %c0_i32 = arith.constant 0 : i32
    %c0_i32_0 = arith.constant 0 : i32
    %c0_i32_1 = arith.constant 0 : i32
    return %c0_i32, %c0_i32_0 : i32, i32
  }
  func.func @transform_13(%arg0: i32) -> (i32, i32, i32) {
    %c0_i32 = arith.constant 0 : i32
    %c0_i32_0 = arith.constant 0 : i32
    %c0_i32_1 = arith.constant 0 : i32
    return %arg0, %c0_i32, %c0_i32_0 : i32, i32, i32
  }
}

</mosaic_0001>

<bundles_post_ra>
// kernel: lenet5_forward.1
= control target key start
LH: loop header
LB: loop body
LE: loop exit
PB: predicated region body
PF: predicated region fallthrough
CT: control target
= control target key end

     0   :  { %s6597_s0 = inlined_call_operand.vmem [shape: f32[2,1,784], index: 0, kind: input, shape index: {}]   ;;  %s6598_s1 = inlined_call_operand.vmem [shape: f32[6,25], index: 1, kind: input, shape index: {}]   ;;  %s6599_s2 = inlined_call_operand.vmem [shape: f32[6,1], index: 2, kind: input, shape index: {}]   ;;  %s6600_s3 = inlined_call_operand.vmem [shape: f32[16,150], index: 3, kind: input, shape index: {}]   ;;  %s6601_s4 = inlined_call_operand.vmem [shape: f32[16,1], index: 4, kind: input, shape index: {}]   ;;  %s6602_s5 = inlined_call_operand.vmem [shape: f32[639,144], index: 5, kind: input, shape index: {}]   ;;  %s6603_s6 = inlined_call_operand.vmem [shape: f32[79,16], index: 6, kind: input, shape index: {}]   ;;  %s6604_s7 = inlined_call_operand.vmem [shape: f32[256,120], index: 7, kind: input, shape index: {}]   ;;  %s6605_s8 = inlined_call_operand.vmem [shape: f32[1,120], index: 8, kind: input, shape index: {}]   ;;  %s6606_s9 = inlined_call_operand.vmem [shape: f32[120,84], index: 9, kind: input, shape index: {}]   ;;  %s6607_s10 = inlined_call_operand.vmem [shape: f32[1,84], index: 10, kind: input, shape index: {}]   ;;  %s6608_s11 = inlined_call_operand.vmem [shape: f32[84,10], index: 11, kind: input, shape index: {}]   ;;  %s6609_s12 = inlined_call_operand.vmem [shape: f32[1,10], index: 12, kind: input, shape index: {}]   ;;  %s6610_s13 = inlined_call_operand.hbm [shape: f32[2,1,10], index: 13, kind: output, shape index: {}]  }
   0x1   :  { %6823 = sst [smem:[#allocation141_spill]] %s6597_s0 }
   0x2   :  { %6824 = sst [smem:[#allocation142_spill]] %s6598_s1 }
   0x3   :  { %6825 = sst [smem:[#allocation143_spill]] %s6599_s2 }
   0x4   :  { %18 = vsyncpa [#allocation6], 0 }
   0x5   :  { %20 = vsyncpa [#allocation6 + $0x1], 0  ;;  %s3949_s25 = smov 0   ;;  %s3951_s26 = smov 0  }
   0x6   :  { %s3953_s27 = smov 0   ;;  %s3955_s28 = smov 0  }
   0x7 LB: > { %s3970_s29 = sadd.s32 4294967295, %s3826_s28   ;;  %s3187_s30 = sadd.s32 4294967294, %s3826_s28   ;;  %s3826_s28 = sphi %s3955_s28, %s7164_s28   ;;  %s3822_s27 = sphi %s3953_s27, %s7163_s27   ;;  %s3818_s26 = sphi %s3951_s26, %s7162_s26   ;;  %s3814_s25 = sphi %s3949_s25, %s7161_s25  }
   0x8   : > { %s3974_s14 = sadd.s32 1, %s3826_s28   ;;  %s311_s15 = sadd.s32 1, %s3822_s27 }
   0x9   : > { %s308_s16 = ssub.s32 %s3826_s28, %s3974_s14  ;;  %p321_p0 = scmp.ne.s32.totalorder %s3822_s27, %s3818_s26 }
   0xa   : > { %p309_p1 = scmp.eq.s32.totalorder %s308_s16, 0  ;;  %p322_p2 = scmp.eq.s32.totalorder %s3970_s29, 1 }
   0xb   : > { %p327_p3 = scmp.ne.s32.totalorder %s3818_s26, %s3814_s25  ;;  %p328_p4 = scmp.eq.s32.totalorder %s3187_s30, 1 }
   0xc   : > { %s3985_s17 = scalar_select %p309_p1, %s3822_s27, %s311_s15  }
   0xd   : > { %p3987_p5 = por %p322_p2, %p321_p0  ;;  %p3991_p6 = por %p328_p4, %p327_p3 }
   0xe   : > { %6826 = sst [smem:[#allocation8_spill]] %s3985_s17  ;;  %p3190_p7 = scmp.ge.s32.totalorder %s3826_s28, 1 }
   0xf   : > { %p389_p8 = scmp.lt.s32.totalorder %s3826_s28, 3 }
  0x11   : > { %p390_p9 = pnand %p3190_p7, %p389_p8 }
  0x13   : > { %393 = sbr.rel (%p390_p9) target bundleno = 2417 (0x971), region = 72 }
  0x18   : > { %p431_p10 = scmp.lt.s32.totalorder %s3970_s29, 1  ;;  %v6624_v0 = vlaneseq  ;;  %s6829_s0 = sld [smem:[#allocation141_spill]]  ;;  %v6626_v3 = vmov 0.0   ;;  %v4026_v5 = vld [vmem:[%s6602_s5 + $0xf8] sm:$0xff]  ;;  %v4031_v6 = vld [vmem:[%s6602_s5 + $0xf0] sm:$0xff]  ;;  %v3853_v7 = vmov 0  }
  0x19   : > { %s3828_s30 = smov 42   ;;  %s3829_s15 = smov 12   ;;  %777 = vmatprep.mubr.f32.mxu0 %v6626_v3  ;;  %3584 = vset.pattern.permute.xlu0 %v3853_v7  ;;  %v961_v8 = vld [vmem:[%s6602_s5 + $0xe8] sm:$0xff]  ;;  %v960_v9 = vld [vmem:[%s6602_s5 + $0xe0] sm:$0xff]  ;;  %v959_v10 = vld [vmem:[%s6602_s5 + $0xd8] sm:$0xff]  ;;  %vm590_vm1 = vcmask 343040  }
  0x1a   : > { %s432_s20 = scalar_select %p431_p10, %s3970_s29, 1  ;;  %vm4003_vm0 = vcmp.lt.s32.totalorder %v6624_v0, 668  ;;  %1102 = vmatprep.subr.mxu1 %v4026_v5  ;;  %v958_v11 = vld [vmem:[%s6602_s5 + $0xd0] sm:$0xff]  ;;  %3605 = vset.pattern.permute.xlu1 %v3853_v7  ;;  %v957_v12 = vld [vmem:[%s6602_s5 + $0xc8] sm:$0xff]  ;;  %v956_v13 = vld [vmem:[%s6602_s5 + $0xc0] sm:$0xff]  ;;  %vm653_vm2 = vcmask 97280  }
  0x1b   : > { %s3830_s16 = smov 41   ;;  %s3833_s22 = smov 40   ;;  %1103 = vmatpush1.msra.mxu1 %v4031_v6  ;;  %v955_v14 = vld [vmem:[%s6602_s5 + $0xb8] sm:$0xff]  ;;  %v954_v15 = vld [vmem:[%s6602_s5 + $0xb0] sm:$0xff]  ;;  %v953_v16 = vld [vmem:[%s6602_s5 + $0xa8] sm:$0xff]  ;;  %vm599_vm3 = vcmask 334848  }
  0x1c   : > { %s3494_s21 = smul.u32 7, %s432_s20  ;;  %s3831_s20 = smov 43   ;;  %1104 = vmatprep.subr.mxu1 %v961_v8  ;;  %v952_v17 = vld [vmem:[%s6602_s5 + $0xa0] sm:$0xff]  ;;  %v951_v18 = vld [vmem:[%s6602_s5 + $0x98] sm:$0xff]  ;;  %v950_v19 = vld [vmem:[%s6602_s5 + $0x90] sm:$0xff]  ;;  %vm581_vm4 = vcmask 351232  }
  0x1d   : > { %s3834_s23 = smov 14   ;;  %s6613_s17 = smov 96   ;;  %1105 = vmatpush1.msra.mxu1 %v960_v9  ;;  %v949_v20 = vld [vmem:[%s6602_s5 + $0x88] sm:$0xff]  ;;  %v948_v21 = vld [vmem:[%s6602_s5 + $0x80] sm:$0xff]  ;;  %v947_v22 = vld [vmem:[%s6602_s5 + $0x78] sm:$0xff]  ;;  %vm617_vm5 = vcmask 130048  }
  0x1e   : > { %s434_s24 = scalar_lea.vmem %s6829_s0, %s3494_s21  ;;  %s6611_s21 = smov 16   ;;  %1106 = vmatprep.subr.mxu1 %v959_v10  ;;  %v946_v23 = vld [vmem:[%s6602_s5 + $0x70] sm:$0xff]  ;;  %v945_v24 = vld [vmem:[%s6602_s5 + $0x68] sm:$0xff]  ;;  %v944_v25 = vld [vmem:[%s6602_s5 + $0x60] sm:$0xff]  ;;  %vm608_vm6 = vcmask 326656   ;;  %vm694_vm7 = vcmask 1040384  }
  0x1f   : > { %v435_v1 = vld [vmem:[%s434_s24] sm:$0x7f]  ;;  %s3835_s24 = smov 15   ;;  %s3838_s0 = smov 72   ;;  %1107 = vmatpush1.msra.mxu1 %v958_v11  ;;  %v943_v26 = vld [vmem:[%s6602_s5 + $0x58] sm:$0xff]  ;;  %v942_v27 = vld [vmem:[%s6602_s5 + $0x50] sm:$0xff] }
  0x20   : > { %587 = vrot.lane.b32.xlu1 %v435_v1, %s3828_s30  ;;  %650 = vrot.lane.b32.xlu0 %v435_v1, %s3829_s15  ;;  %440 = vst.msk [vmem:[#allocation2] ss:$8 sm:$0xf] %vm4003_vm0, %v435_v1  ;;  %441 = vst.msk [vmem:[#allocation2] ss:$8 sm:$0x30] %vm4003_vm0, %v435_v1 }
  0x21   : > { %s3836_s30 = smov 97   ;;  %s3837_s15 = smov 13   ;;  %1108 = vmatprep.subr.mxu1 %v957_v12  ;;  %v941_v28 = vld [vmem:[%s6602_s5 + $0x48] sm:$0xff]  ;;  %v940_v29 = vld [vmem:[%s6602_s5 + $0x40] sm:$0xff]  ;;  %v939_v30 = vld [vmem:[%s6602_s5 + $0x38] sm:$0xff]  ;;  %vm635_vm8 = vcmask 113664  }
  0x22   : > { %s6832_s2 = sld [smem:[#allocation143_spill]]  ;;  %1109 = vmatpush1.msra.mxu1 %v956_v13  ;;  %v938_v31 = vld [vmem:[%s6602_s5 + $0x30] sm:$0xff]  ;;  %v937_v32 = vld [vmem:[%s6602_s5 + $0x28] sm:$0xff]  ;;  %v936_v33 = vld [vmem:[%s6602_s5 + $0x20] sm:$0xff]  ;;  %vm626_vm9 = vcmask 121856   ;;  %vm509_vm10 = vcmask 793600  }
  0x23   : > { %1110 = vmatprep.subr.mxu1 %v955_v14  ;;  %v935_v34 = vld [vmem:[%s6602_s5 + $0x18] sm:$0xff]  ;;  %v934_v35 = vld [vmem:[%s6602_s5 + $0x10] sm:$0xff]  ;;  %v933_v36 = vld [vmem:[%s6602_s5 + $0x8] sm:$0xff]  ;;  %vm644_vm11 = vcmask 105472   ;;  %vm527_vm12 = vcmask 588800   ;;  %vm518_vm13 = vcmask 785408  }
  0x24   : > { %596 = vrot.lane.b32.xlu1 %v435_v1, %s3830_s16  ;;  %578 = vrot.lane.b32.xlu0 %v435_v1, %s3831_s20  ;;  %s3840_s16 = smov 70   ;;  %s3841_s20 = smov 71   ;;  %v932_v37 = vld [vmem:[%s6602_s5] sm:$0xff]  ;;  %v995_v38 = vld [vmem:[%s6602_s5 + $0x1f8] sm:$0xff]  ;;  %vm545_vm14 = vcmask 572416   ;;  %vm536_vm15 = vcmask 580608  }
  0x25   : > { %1111 = vmatpush1.msra.mxu1 %v954_v15  ;;  %v994_v39 = vld [vmem:[%s6602_s5 + $0x1f0] sm:$0xff]  ;;  %v993_v40 = vld [vmem:[%s6602_s5 + $0x1e8] sm:$0xff]  ;;  %v992_v41 = vld [vmem:[%s6602_s5 + $0x1e0] sm:$0xff]  ;;  %s6833_s1 = sld [smem:[#allocation142_spill]] }
  0x26   : > { %1112 = vmatprep.subr.mxu1 %v953_v16  ;;  %v991_v42 = vld [vmem:[%s6602_s5 + $0x1d8] sm:$0xff]  ;;  %v990_v43 = vld [vmem:[%s6602_s5 + $0x1d0] sm:$0xff]  ;;  %v989_v44 = vld [vmem:[%s6602_s5 + $0x1c8] sm:$0xff] }
  0x27   : > { %1113 = vmatpush1.msra.mxu1 %v952_v17  ;;  %v988_v45 = vld [vmem:[%s6602_s5 + $0x1c0] sm:$0xff]  ;;  %v987_v46 = vld [vmem:[%s6602_s5 + $0x1b8] sm:$0xff]  ;;  %v986_v47 = vld [vmem:[%s6602_s5 + $0x1b0] sm:$0xff] }
  0x28   : > { %614 = vrot.lane.b32.xlu1 %v435_v1, %s6611_s21  ;;  %605 = vrot.lane.b32.xlu0 %v435_v1, %s3833_s22  ;;  %s3842_s21 = smov 68   ;;  %s3843_s22 = smov 69   ;;  %v684_v4 = vld [vmem:[%s6832_s2] sm:$0x3f]  ;;  %v985_v48 = vld [vmem:[%s6602_s5 + $0x1a8] sm:$0xff] }
  0x29   : > { %1114 = vmatprep.subr.mxu1 %v951_v18  ;;  %v984_v49 = vld [vmem:[%s6602_s5 + $0x1a0] sm:$0xff]  ;;  %v983_v50 = vld [vmem:[%s6602_s5 + $0x198] sm:$0xff]  ;;  %v982_v51 = vld [vmem:[%s6602_s5 + $0x190] sm:$0xff]  ;;  %s3858_s2 = smov 103  }
  0x2a   : > { %1115 = vmatpush1.msra.mxu1 %v950_v19  ;;  %v981_v52 = vld [vmem:[%s6602_s5 + $0x188] sm:$0xff]  ;;  %v980_v53 = vld [vmem:[%s6602_s5 + $0x180] sm:$0xff]  ;;  %v979_v54 = vld [vmem:[%s6602_s5 + $0x178] sm:$0xff] }
  0x2b   : > { %1116 = vmatprep.subr.mxu1 %v949_v20  ;;  %v978_v55 = vld [vmem:[%s6602_s5 + $0x170] sm:$0xff]  ;;  %v977_v56 = vld [vmem:[%s6602_s5 + $0x168] sm:$0xff]  ;;  %v976_v57 = vld [vmem:[%s6602_s5 + $0x160] sm:$0xff] }
  0x2c   : > { %632 = vrot.lane.b32.xlu1 %v435_v1, %s3834_s23  ;;  %623 = vrot.lane.b32.xlu0 %v435_v1, %s3835_s24  ;;  %s6622_s23 = smov 127   ;;  %s3845_s24 = smov 44   ;;  %v975_v58 = vld [vmem:[%s6602_s5 + $0x158] sm:$0xff]  ;;  %v974_v59 = vld [vmem:[%s6602_s5 + $0x150] sm:$0xff] }
  0x2d   : > { %1117 = vmatpush1.msra.mxu1 %v948_v21  ;;  %v973_v60 = vld [vmem:[%s6602_s5 + $0x148] sm:$0xff]  ;;  %v972_v61 = vld [vmem:[%s6602_s5 + $0x140] sm:$0xff] }
  0x2e   : > { %1118 = vmatprep.subr.mxu1 %v947_v22  ;;  %v4674_v0 = vld [vmem:[%s6602_s5 + $0x100] sm:$0xff] }
  0x2f   : > { %1119 = vmatpush1.msra.mxu1 %v946_v23  ;;  %6892 = vst [vmem:[#allocation67_spill] sm:$0xff] %v4674_v0 }
  0x30   : > { %506 = vrot.lane.b32.xlu1 %v435_v1, %s3836_s30  ;;  %641 = vrot.lane.b32.xlu0 %v435_v1, %s3837_s15  ;;  %s6615_s30 = smov 125   ;;  %s6617_s15 = smov 100  }
  0x31   : > { %1120 = vmatprep.subr.mxu1 %v945_v24 }
  0x32   : > { %1121 = vmatpush1.msra.mxu1 %v944_v25 }
  0x33   : > { %1122 = vmatprep.subr.mxu1 %v943_v26 }
  0x34   : > { %524 = vrot.lane.b32.xlu1 %v435_v1, %s3838_s0  ;;  %515 = vrot.lane.b32.xlu0 %v435_v1, %s6613_s17  ;;  %s6616_s0 = smov 126   ;;  %s6931_s17 = smov 99  }
  0x35   : > { %1123 = vmatpush1.msra.mxu1 %v942_v27 }
  0x36   : > { %1124 = vmatprep.subr.mxu1 %v941_v28 }
  0x37   : > { %1125 = vmatpush1.msra.mxu1 %v940_v29 }
  0x38   : > { %542 = vrot.lane.b32.xlu1 %v435_v1, %s3840_s16  ;;  %533 = vrot.lane.b32.xlu0 %v435_v1, %s3841_s20  ;;  %s6619_s16 = smov 124   ;;  %s6620_s20 = smov 99  }
  0x39   : > { %1126 = vmatprep.subr.mxu1 %v939_v30 }
  0x3a   : > { %1127 = vmatpush1.msra.mxu1 %v938_v31 }
  0x3b   : > { %1128 = vmatprep.subr.mxu1 %v937_v32 }
  0x3c   : > { %560 = vrot.lane.b32.xlu1 %v435_v1, %s3842_s21  ;;  %551 = vrot.lane.b32.xlu0 %v435_v1, %s3843_s22  ;;  %s3851_s21 = smov 98   ;;  %s3856_s22 = smov 102  }
  0x3d   : > { %1129 = vmatpush1.msra.mxu1 %v936_v33 }
  0x3e   : > { %1130 = vmatprep.subr.mxu1 %v935_v34 }
  0x3f   : > { %1131 = vmatpush1.msra.mxu1 %v934_v35 }
  0x40   : > { %443 = vrot.lane.b32.xlu1 %v435_v1, %s6622_s23  ;;  %569 = vrot.lane.b32.xlu0 %v435_v1, %s3845_s24  ;;  %s6918_s24 = smov 100   ;;  %s3862_s23 = smov 91  }
  0x41   : > { %1132 = vmatprep.subr.mxu1 %v933_v36 }
  0x42   : > { %1133 = vmatpush1.msra.mxu1 %v932_v37 }
  0x43   : > { %1134 = vmatprep.subr.mxu1 %v995_v38 }
  0x44   : > { %461 = vrot.lane.b32.xlu1 %v435_v1, %s6615_s30  ;;  %452 = vrot.lane.b32.xlu0 %v435_v1, %s6616_s0  ;;  %s3860_s30 = smov 88   ;;  %s3861_s0 = smov 90  }
  0x45   : > { %1135 = vmatpush2.msra.mxu1 %v994_v39 }
  0x46   : > { %1136 = vmatprep.subr.mxu1 %v993_v40 }
  0x47   : > { %1137 = vmatpush2.msra.mxu1 %v992_v41 }
  0x48   : > { %479 = vrot.lane.b32.xlu1 %v435_v1, %s6617_s15  ;;  %470 = vrot.lane.b32.xlu0 %v435_v1, %s6619_s16  ;;  %s3854_s16 = smov 92   ;;  %s3863_s15 = smov 101  }
  0x49   : > { %1138 = vmatprep.subr.mxu1 %v991_v42 }
  0x4a   : > { %1139 = vmatpush2.msra.mxu1 %v990_v43 }
  0x4b   : > { %1140 = vmatprep.subr.mxu1 %v989_v44 }
  0x4c   : > { %497 = vrot.lane.b32.xlu1 %v435_v1, %s3851_s21  ;;  %488 = vrot.lane.b32.xlu0 %v435_v1, %s6620_s20  ;;  %v971_v1 = vld [vmem:[%s6602_s5 + $0x138] sm:$0xff]  ;;  %s6913_s20 = smov 127   ;;  %s6821_s21 = smov 80  }
  0x4d   : > { %1141 = vmatpush2.msra.mxu1 %v988_v45 }
  0x4e   : > { %1142 = vmatprep.subr.mxu1 %v987_v46 }
  0x4f   : > { %1143 = vmatpush2.msra.mxu1 %v986_v47 }
  0x50   : > { %687 = vperm.xlu0 %3584, %v684_v4   ;;  %1144 = vmatprep.subr.mxu1 %v985_v48 }
  0x51   : > { %1145 = vmatpush2.msra.mxu1 %v984_v49 }
  0x52   : > { %1146 = vmatprep.subr.mxu1 %v983_v50 }
  0x53   : > { %1147 = vmatpush2.msra.mxu1 %v982_v51 }
  0x54   : > { %1148 = vmatprep.subr.mxu1 %v981_v52 }
  0x55   : > { %1149 = vmatpush2.msra.mxu1 %v980_v53 }
  0x56   : > { %1150 = vmatprep.subr.mxu1 %v979_v54 }
  0x57   : > { %1151 = vmatpush2.msra.mxu1 %v978_v55 }
  0x58   : > { %1152 = vmatprep.subr.mxu1 %v977_v56 }
  0x59   : > { %1153 = vmatpush2.msra.mxu1 %v976_v57 }
  0x5a   : > { %1154 = vmatprep.subr.mxu1 %v975_v58 }
  0x5b   : > { %1155 = vmatpush2.msra.mxu1 %v974_v59 }
  0x5c   : > { %1156 = vmatprep.subr.mxu1 %v973_v60 }
  0x5d   : > { %1157 = vmatpush2.msra.mxu1 %v972_v61 }
  0x5e   : > { %1158 = vmatprep.subr.mxu1 %v971_v1 }
  0x92   : > { %v588_v62 = vpop.permute.xlu1 %587  ;;  %v651_v63 = vpop.permute.xlu0 %650 }
  0x93   : > { %v589_v4 = vrot.slane %v588_v62, 1  ;;  %v652_v7 = vrot.slane %v651_v63, 1 }
  0x95   : > { %v591_v8 = vsel %vm590_vm1, %v588_v62, %v589_v4  ;;  %v654_v9 = vsel %vm653_vm2, %v651_v63, %v652_v7  ;;  %vm563_vm1 = vcmask 556032   ;;  %vm554_vm2 = vcmask 564224  }
  0x96   : > { %594 = vst.msk [vmem:[#allocation2 + $0x61] ss:$8 sm:$0xf] %vm4003_vm0, %v591_v8  ;;  %595 = vst.msk [vmem:[#allocation2 + $0x61] ss:$8 sm:$0x30] %vm4003_vm0, %v591_v8  ;;  %v597_v10 = vpop.permute.xlu1 %596  ;;  %v579_v11 = vpop.permute.xlu0 %578 }
  0x97   : > { %657 = vst.msk [vmem:[#allocation2 + $0x90] ss:$8 sm:$0xf] %vm4003_vm0, %v654_v9  ;;  %658 = vst.msk [vmem:[#allocation2 + $0x90] ss:$8 sm:$0x30] %vm4003_vm0, %v654_v9 }
  0x98   : > { %v598_v12 = vrot.slane %v597_v10, 1  ;;  %v580_v13 = vrot.slane %v579_v11, 1 }
  0x9a   : > { %v600_v14 = vsel %vm599_vm3, %v597_v10, %v598_v12  ;;  %v582_v15 = vsel %vm581_vm4, %v579_v11, %v580_v13  ;;  %v615_v16 = vpop.permute.xlu1 %614  ;;  %v606_v17 = vpop.permute.xlu0 %605  ;;  %vm446_vm3 = vcmask 1039360   ;;  %vm572_vm4 = vcmask 359424  }
  0x9b   : > { %603 = vst.msk [vmem:[#allocation2 + $0x62] ss:$8 sm:$0xf] %vm4003_vm0, %v600_v14  ;;  %604 = vst.msk [vmem:[#allocation2 + $0x62] ss:$8 sm:$0x30] %vm4003_vm0, %v600_v14 }
  0x9c   : > { %585 = vst.msk [vmem:[#allocation2 + $0x60] ss:$8 sm:$0xf] %vm4003_vm0, %v582_v15  ;;  %586 = vst.msk [vmem:[#allocation2 + $0x60] ss:$8 sm:$0x30] %vm4003_vm0, %v582_v15 }
  0x9d   : > { %v616_v18 = vrot.slane %v615_v16, 1  ;;  %v607_v19 = vrot.slane %v606_v17, 1 }
  0x9e   : > { %v679_v22 = vld [vmem:[#allocation2 + $0x98] sm:$0x1]  ;;  %v678_v23 = vld [vmem:[#allocation2 + $0x90] sm:$0x1]  ;;  %v633_v24 = vpop.permute.xlu1 %632  ;;  %v624_v25 = vpop.permute.xlu0 %623 }
  0x9f   : > { %v618_v20 = vsel %vm617_vm5, %v615_v16, %v616_v18  ;;  %v609_v21 = vsel %vm608_vm6, %v606_v17, %v607_v19  ;;  %3191 = vmatprep.subr.msk.mxu0 %vm694_vm7, %v679_v22  ;;  %v634_v26 = vrot.slane %v633_v24, 1  ;;  %v625_v27 = vrot.slane %v624_v25, 1 }
  0xa0   : > { %621 = vst.msk [vmem:[#allocation2 + $0x64] ss:$8 sm:$0xf] %vm4003_vm0, %v618_v20  ;;  %622 = vst.msk [vmem:[#allocation2 + $0x64] ss:$8 sm:$0x30] %vm4003_vm0, %v618_v20  ;;  %3192 = vmatpush1.msk.msra.mxu0 %vm694_vm7, %v678_v23 }
  0xa1   : > { %612 = vst.msk [vmem:[#allocation2 + $0x63] ss:$8 sm:$0xf] %vm4003_vm0, %v609_v21  ;;  %613 = vst.msk [vmem:[#allocation2 + $0x63] ss:$8 sm:$0x30] %vm4003_vm0, %v609_v21  ;;  %v636_v28 = vsel %vm635_vm8, %v633_v24, %v634_v26  ;;  %v627_v29 = vsel %vm626_vm9, %v624_v25, %v625_v27 }
  0xa2   : > { %639 = vst.msk [vmem:[#allocation2 + $0x66] ss:$8 sm:$0xf] %vm4003_vm0, %v636_v28  ;;  %640 = vst.msk [vmem:[#allocation2 + $0x66] ss:$8 sm:$0x30] %vm4003_vm0, %v636_v28  ;;  %v507_v30 = vpop.permute.xlu1 %506  ;;  %v642_v31 = vpop.permute.xlu0 %641 }
  0xa3   : > { %630 = vst.msk [vmem:[#allocation2 + $0x65] ss:$8 sm:$0xf] %vm4003_vm0, %v627_v29  ;;  %631 = vst.msk [vmem:[#allocation2 + $0x65] ss:$8 sm:$0x30] %vm4003_vm0, %v627_v29 }
  0xa4   : > { %v508_v32 = vrot.slane %v507_v30, 1  ;;  %v643_v33 = vrot.slane %v642_v31, 1  ;;  %vm464_vm5 = vcmask 1022976   ;;  %vm455_vm6 = vcmask 1031168   ;;  %v659_v25 = vld [vmem:[%s6833_s1] sm:$0x3f] }
  0xa5   : > { %vm482_vm8 = vcmask 818176   ;;  %vm473_vm9 = vcmask 1014784   ;;  %v681_v26 = vld [vmem:[#allocation2 + $0xa8] sm:$0x1]  ;;  %v680_v27 = vld [vmem:[#allocation2 + $0xa0] sm:$0x1] }
  0xa6   : > { %v510_v34 = vsel %vm509_vm10, %v507_v30, %v508_v32  ;;  %v645_v35 = vsel %vm644_vm11, %v642_v31, %v643_v33  ;;  %v525_v36 = vpop.permute.xlu1 %524  ;;  %v516_v37 = vpop.permute.xlu0 %515  ;;  %vm500_vm10 = vcmask 801792   ;;  %vm491_vm11 = vcmask 809984   ;;  %v683_v33 = vld [vmem:[#allocation2 + $0xb8] sm:$0x1]  ;;  %s3857_s1 = smov 79  }
  0xa7   : > { %513 = vst.msk [vmem:[#allocation2 + $0x30] ss:$8 sm:$0xf] %vm4003_vm0, %v510_v34  ;;  %514 = vst.msk [vmem:[#allocation2 + $0x30] ss:$8 sm:$0x30] %vm4003_vm0, %v510_v34 }
  0xa8   : > { %648 = vst.msk [vmem:[#allocation2 + $0x67] ss:$8 sm:$0xf] %vm4003_vm0, %v645_v35  ;;  %649 = vst.msk [vmem:[#allocation2 + $0x67] ss:$8 sm:$0x30] %vm4003_vm0, %v645_v35 }
  0xa9   : > { %v526_v38 = vrot.slane %v525_v36, 1  ;;  %v517_v39 = vrot.slane %v516_v37, 1  ;;  %v682_v34 = vld [vmem:[#allocation2 + $0xb0] sm:$0x1] }
  0xaa   : > { %v543_v42 = vpop.permute.xlu1 %542  ;;  %v534_v43 = vpop.permute.xlu0 %533 }
  0xab   : > { %v528_v40 = vsel %vm527_vm12, %v525_v36, %v526_v38  ;;  %v519_v41 = vsel %vm518_vm13, %v516_v37, %v517_v39  ;;  %v544_v44 = vrot.slane %v543_v42, 1  ;;  %v535_v45 = vrot.slane %v534_v43, 1 }
  0xac   : > { %531 = vst.msk [vmem:[#allocation2 + $0x32] ss:$8 sm:$0xf] %vm4003_vm0, %v528_v40  ;;  %532 = vst.msk [vmem:[#allocation2 + $0x32] ss:$8 sm:$0x30] %vm4003_vm0, %v528_v40 }
  0xad   : > { %522 = vst.msk [vmem:[#allocation2 + $0x31] ss:$8 sm:$0xf] %vm4003_vm0, %v519_v41  ;;  %523 = vst.msk [vmem:[#allocation2 + $0x31] ss:$8 sm:$0x30] %vm4003_vm0, %v519_v41  ;;  %v546_v46 = vsel %vm545_vm14, %v543_v42, %v544_v44  ;;  %v537_v47 = vsel %vm536_vm15, %v534_v43, %v535_v45 }
  0xae   : > { %549 = vst.msk [vmem:[#allocation2 + $0x34] ss:$8 sm:$0xf] %vm4003_vm0, %v546_v46  ;;  %550 = vst.msk [vmem:[#allocation2 + $0x34] ss:$8 sm:$0x30] %vm4003_vm0, %v546_v46  ;;  %v561_v50 = vpop.permute.xlu1 %560  ;;  %v552_v51 = vpop.permute.xlu0 %551 }
  0xaf   : > { %v673_v48 = vld [vmem:[#allocation2 + $0x68] sm:$0xff]  ;;  %v672_v49 = vld [vmem:[#allocation2 + $0x60] sm:$0xff]  ;;  %540 = vst.msk [vmem:[#allocation2 + $0x33] ss:$8 sm:$0xf] %vm4003_vm0, %v537_v47  ;;  %v562_v52 = vrot.slane %v561_v50, 1 }
  0xb0   : > { %541 = vst.msk [vmem:[#allocation2 + $0x33] ss:$8 sm:$0x30] %vm4003_vm0, %v537_v47  ;;  %739 = vmatprep.subr.mxu0 %v673_v48  ;;  %v553_v53 = vrot.slane %v552_v51, 1  ;;  %vm690_vm12 = vcmask 203776   ;;  %v675_v28 = vld [vmem:[#allocation2 + $0x78] sm:$0xff] }
  0xb1   : > { %740 = vmatpush1.msra.mxu0 %v672_v49  ;;  %v564_v54 = vsel %vm563_vm1, %v561_v50, %v562_v52  ;;  %v674_v2 = vld [vmem:[#allocation2 + $0x70] sm:$0xff]  ;;  %v677_v35 = vld [vmem:[#allocation2 + $0x88] sm:$0xff]  ;;  %v676_v36 = vld [vmem:[#allocation2 + $0x80] sm:$0xff]  ;;  %vm2202_vm13 = vcmask 179200   ;;  %vm2131_vm14 = vcmask 654336   ;;  %vm2139_vm15 = vcmask 646144  }
  0xb2   : > { %v555_v55 = vsel %vm554_vm2, %v552_v51, %v553_v53  ;;  %567 = vst.msk [vmem:[#allocation2 + $0x36] ss:$8 sm:$0xf] %vm4003_vm0, %v564_v54  ;;  %568 = vst.msk [vmem:[#allocation2 + $0x36] ss:$8 sm:$0x30] %vm4003_vm0, %v564_v54  ;;  %v444_v56 = vpop.permute.xlu1 %443  ;;  %v570_v57 = vpop.permute.xlu0 %569 }
  0xb3   : > { %558 = vst.msk [vmem:[#allocation2 + $0x35] ss:$8 sm:$0xf] %vm4003_vm0, %v555_v55  ;;  %559 = vst.msk [vmem:[#allocation2 + $0x35] ss:$8 sm:$0x30] %vm4003_vm0, %v555_v55 }
  0xb4   : > { %v445_v58 = vrot.slane %v444_v56, 1  ;;  %v571_v59 = vrot.slane %v570_v57, 1  ;;  %v4315_v40 = vld [vmem:[%s6602_s5 + $0x2f8] sm:$0xff]  ;;  %v4320_v42 = vld [vmem:[%s6602_s5 + $0x2f0] sm:$0xff]  ;;  %v4325_v43 = vld [vmem:[%s6602_s5 + $0x2e8] sm:$0xff]  ;;  %vm2115_vm1 = vcmask 728064  }
  0xb5   : > { %6834 = vst [vmem:[#allocation9_spill] sm:$0xff] %v4325_v43  ;;  %v4332_v44 = vld [vmem:[%s6602_s5 + $0x2e0] sm:$0xff]  ;;  %v4338_v45 = vld [vmem:[%s6602_s5 + $0x2d8] sm:$0xff]  ;;  %v4344_v46 = vld [vmem:[%s6602_s5 + $0x2d0] sm:$0xff]  ;;  %vm2123_vm2 = vcmask 719872  }
  0xb6   : > { %v447_v60 = vsel %vm446_vm3, %v444_v56, %v445_v58  ;;  %v573_v61 = vsel %vm572_vm4, %v570_v57, %v571_v59  ;;  %v462_v62 = vpop.permute.xlu1 %461  ;;  %v453_v63 = vpop.permute.xlu0 %452  ;;  %6835 = vst [vmem:[#allocation10_spill] sm:$0xff] %v4332_v44  ;;  %6836 = vst [vmem:[#allocation11_spill] sm:$0xff] %v4338_v45  ;;  %v4350_v47 = vld [vmem:[%s6602_s5 + $0x2c8] sm:$0xff]  ;;  %v4356_v48 = vld [vmem:[%s6602_s5 + $0x2c0] sm:$0xff]  ;;  %vm2099_vm4 = vcmask 744448  }
  0xb7   : > { %450 = vst.msk [vmem:[#allocation2 + $0x1] ss:$8 sm:$0xf] %vm4003_vm0, %v447_v60  ;;  %451 = vst.msk [vmem:[#allocation2 + $0x1] ss:$8 sm:$0x30] %vm4003_vm0, %v447_v60 }
  0xb8   : > { %576 = vst.msk [vmem:[#allocation2 + $0x37] ss:$8 sm:$0xf] %vm4003_vm0, %v573_v61  ;;  %577 = vst.msk [vmem:[#allocation2 + $0x37] ss:$8 sm:$0x30] %vm4003_vm0, %v573_v61 }
  0xb9   : > { %v463_v1 = vrot.slane %v462_v62, 1  ;;  %v454_v4 = vrot.slane %v453_v63, 1  ;;  %6837 = vst [vmem:[#allocation12_spill] sm:$0xff] %v4344_v46  ;;  %6838 = vst [vmem:[#allocation13_spill] sm:$0xff] %v4350_v47  ;;  %v4362_v49 = vld [vmem:[%s6602_s5 + $0x2b8] sm:$0xff]  ;;  %v4368_v50 = vld [vmem:[%s6602_s5 + $0x2b0] sm:$0xff] }
  0xba   : > { %v480_v9 = vpop.permute.xlu1 %479  ;;  %v471_v10 = vpop.permute.xlu0 %470  ;;  %6839 = vst [vmem:[#allocation14_spill] sm:$0xff] %v4356_v48  ;;  %6840 = vst [vmem:[#allocation15_spill] sm:$0xff] %v4362_v49  ;;  %v4374_v51 = vld [vmem:[%s6602_s5 + $0x2a8] sm:$0xff]  ;;  %v4380_v52 = vld [vmem:[%s6602_s5 + $0x2a0] sm:$0xff] }
  0xbb   : > { %v465_v7 = vsel %vm464_vm5, %v462_v62, %v463_v1  ;;  %v456_v8 = vsel %vm455_vm6, %v453_v63, %v454_v4  ;;  %v481_v11 = vrot.slane %v480_v9, 1  ;;  %v472_v12 = vrot.slane %v471_v10, 1  ;;  %6841 = vst [vmem:[#allocation16_spill] sm:$0xff] %v4368_v50  ;;  %6842 = vst [vmem:[#allocation17_spill] sm:$0xff] %v4374_v51  ;;  %v4386_v53 = vld [vmem:[%s6602_s5 + $0x298] sm:$0xff]  ;;  %v4392_v54 = vld [vmem:[%s6602_s5 + $0x290] sm:$0xff] }
  0xbc   : > { %468 = vst.msk [vmem:[#allocation2 + $0x3] ss:$8 sm:$0xf] %vm4003_vm0, %v465_v7  ;;  %469 = vst.msk [vmem:[#allocation2 + $0x3] ss:$8 sm:$0x30] %vm4003_vm0, %v465_v7 }
  0xbd   : > { %459 = vst.msk [vmem:[#allocation2 + $0x2] ss:$8 sm:$0xf] %vm4003_vm0, %v456_v8  ;;  %460 = vst.msk [vmem:[#allocation2 + $0x2] ss:$8 sm:$0x30] %vm4003_vm0, %v456_v8  ;;  %v483_v13 = vsel %vm482_vm8, %v480_v9, %v481_v11  ;;  %v474_v14 = vsel %vm473_vm9, %v471_v10, %v472_v12 }
  0xbe   : > { %486 = vst.msk [vmem:[#allocation2 + $0x5] ss:$8 sm:$0xf] %vm4003_vm0, %v483_v13  ;;  %487 = vst.msk [vmem:[#allocation2 + $0x5] ss:$8 sm:$0x30] %vm4003_vm0, %v483_v13  ;;  %v498_v17 = vpop.permute.xlu1 %497  ;;  %v489_v18 = vpop.permute.xlu0 %488 }
  0xbf   : > { %v667_v15 = vld [vmem:[#allocation2 + $0x38] sm:$0xff]  ;;  %v666_v16 = vld [vmem:[#allocation2 + $0x30] sm:$0xff]  ;;  %477 = vst.msk [vmem:[#allocation2 + $0x4] ss:$8 sm:$0xf] %vm4003_vm0, %v474_v14  ;;  %v499_v19 = vrot.slane %v498_v17, 1 }
  0xc0   : > { %478 = vst.msk [vmem:[#allocation2 + $0x4] ss:$8 sm:$0x30] %vm4003_vm0, %v474_v14  ;;  %741 = vmatprep.subr.mxu0 %v667_v15  ;;  %v490_v20 = vrot.slane %v489_v18, 1  ;;  %v669_v29 = vld [vmem:[#allocation2 + $0x48] sm:$0xff]  ;;  %v668_v30 = vld [vmem:[#allocation2 + $0x40] sm:$0xff] }
  0xc1   : > { %742 = vmatpush1.msra.mxu0 %v666_v16  ;;  %v501_v21 = vsel %vm500_vm10, %v498_v17, %v499_v19  ;;  %v671_v37 = vld [vmem:[#allocation2 + $0x58] sm:$0xff]  ;;  %v670_v38 = vld [vmem:[#allocation2 + $0x50] sm:$0xff]  ;;  %6843 = vst [vmem:[#allocation18_spill] sm:$0xff] %v4380_v52  ;;  %6844 = vst [vmem:[#allocation19_spill] sm:$0xff] %v4386_v53  ;;  %vm2163_vm5 = vcmask 621568   ;;  %vm2147_vm6 = vcmask 637952  }
  0xc2   : > { %v492_v22 = vsel %vm491_vm11, %v489_v18, %v490_v20  ;;  %504 = vst.msk [vmem:[#allocation2 + $0x7] ss:$8 sm:$0xf] %vm4003_vm0, %v501_v21  ;;  %505 = vst.msk [vmem:[#allocation2 + $0x7] ss:$8 sm:$0x30] %vm4003_vm0, %v501_v21 }
  0xc3   : > { %495 = vst.msk [vmem:[#allocation2 + $0x6] ss:$8 sm:$0xf] %vm4003_vm0, %v492_v22  ;;  %496 = vst.msk [vmem:[#allocation2 + $0x6] ss:$8 sm:$0x30] %vm4003_vm0, %v492_v22 }
  0xc4   : > { %6845 = vst [vmem:[#allocation20_spill] sm:$0xff] %v4392_v54  ;;  %v4398_v55 = vld [vmem:[%s6602_s5 + $0x288] sm:$0xff]  ;;  %v4404_v56 = vld [vmem:[%s6602_s5 + $0x280] sm:$0xff]  ;;  %v4410_v57 = vld [vmem:[%s6602_s5 + $0x278] sm:$0xff]  ;;  %vm1095_vm0 = vcmask 1046528   ;;  %vm2209_vm9 = vcmask 1045504  }
  0xc5   : > { %6846 = vst [vmem:[#allocation21_spill] sm:$0xff] %v4398_v55  ;;  %6847 = vst [vmem:[#allocation22_spill] sm:$0xff] %v4404_v56  ;;  %v4416_v58 = vld [vmem:[%s6602_s5 + $0x270] sm:$0xff]  ;;  %v4422_v59 = vld [vmem:[%s6602_s5 + $0x268] sm:$0xff] }
  0xc6   : > { %6848 = vst [vmem:[#allocation23_spill] sm:$0xff] %v4410_v57  ;;  %6849 = vst [vmem:[#allocation24_spill] sm:$0xff] %v4416_v58  ;;  %v4428_v60 = vld [vmem:[%s6602_s5 + $0x260] sm:$0xff]  ;;  %v4434_v61 = vld [vmem:[%s6602_s5 + $0x258] sm:$0xff] }
  0xc7   : > { %6850 = vst [vmem:[#allocation25_spill] sm:$0xff] %v4422_v59  ;;  %6851 = vst [vmem:[#allocation26_spill] sm:$0xff] %v4428_v60  ;;  %v4440_v62 = vld [vmem:[%s6602_s5 + $0x250] sm:$0xff]  ;;  %v4446_v63 = vld [vmem:[%s6602_s5 + $0x248] sm:$0xff] }
  0xc8   : > { %6852 = vst [vmem:[#allocation27_spill] sm:$0xff] %v4434_v61  ;;  %6853 = vst [vmem:[#allocation28_spill] sm:$0xff] %v4440_v62  ;;  %v4452_v1 = vld [vmem:[%s6602_s5 + $0x240] sm:$0xff]  ;;  %v4458_v4 = vld [vmem:[%s6602_s5 + $0x238] sm:$0xff] }
  0xc9   : > { %6854 = vst [vmem:[#allocation29_spill] sm:$0xff] %v4446_v63  ;;  %6855 = vst [vmem:[#allocation30_spill] sm:$0xff] %v4452_v1  ;;  %v4464_v7 = vld [vmem:[%s6602_s5 + $0x230] sm:$0xff]  ;;  %v4470_v8 = vld [vmem:[%s6602_s5 + $0x228] sm:$0xff] }
  0xca   : > { %v661_v23 = vld [vmem:[#allocation2 + $0x8] sm:$0xff]  ;;  %v660_v24 = vld [vmem:[#allocation2] sm:$0xff]  ;;  %v663_v31 = vld [vmem:[#allocation2 + $0x18] sm:$0xff]  ;;  %6856 = vst [vmem:[#allocation31_spill] sm:$0xff] %v4458_v4 }
  0xcb   : > { %743 = vmatprep.subr.mxu0 %v661_v23  ;;  %v662_v32 = vld [vmem:[#allocation2 + $0x10] sm:$0xff]  ;;  %v665_v39 = vld [vmem:[#allocation2 + $0x28] sm:$0xff]  ;;  %v664_v41 = vld [vmem:[#allocation2 + $0x20] sm:$0xff]  ;;  %6857 = vst [vmem:[#allocation32_spill] sm:$0xff] %v4464_v7 }
  0xcc   : > { %744 = vmatpush1.msra.mxu0 %v660_v24  ;;  %6858 = vst [vmem:[#allocation33_spill] sm:$0xff] %v4470_v8  ;;  %v4476_v9 = vld [vmem:[%s6602_s5 + $0x220] sm:$0xff]  ;;  %v4482_v10 = vld [vmem:[%s6602_s5 + $0x218] sm:$0xff]  ;;  %v4488_v11 = vld [vmem:[%s6602_s5 + $0x210] sm:$0xff] }
  0xcd   : > { %3193 = vmatmul.mubr.msk.f32.vlgmr.msra.gmra.mxu0 %vm690_vm12, %v659_v25  ;;  %3194 = vmatprep.subr.msk.mxu0 %vm694_vm7, %v681_v26  ;;  %6859 = vst [vmem:[#allocation34_spill] sm:$0xff] %v4476_v9  ;;  %6860 = vst [vmem:[#allocation35_spill] sm:$0xff] %v4482_v10  ;;  %v4494_v12 = vld [vmem:[%s6602_s5 + $0x208] sm:$0xff]  ;;  %v4500_v13 = vld [vmem:[%s6602_s5 + $0x200] sm:$0xff] }
  0xce   : > { %3195 = vmatpush1.msk.msra.mxu0 %vm694_vm7, %v680_v27  ;;  %848 = vmatprep.mubr.f32.mxu0 %v6626_v3  ;;  %6861 = vst [vmem:[#allocation36_spill] sm:$0xff] %v4488_v11  ;;  %6862 = vst [vmem:[#allocation37_spill] sm:$0xff] %v4494_v12  ;;  %v4506_v14 = vld [vmem:[%s6602_s5 + $0x3f8] sm:$0xff]  ;;  %v4512_v15 = vld [vmem:[%s6602_s5 + $0x3f0] sm:$0xff] }
  0xcf   : > { %810 = vmatprep.subr.mxu0 %v675_v28  ;;  %6863 = vst [vmem:[#allocation38_spill] sm:$0xff] %v4500_v13  ;;  %6864 = vst [vmem:[#allocation39_spill] sm:$0xff] %v4506_v14  ;;  %v4518_v16 = vld [vmem:[%s6602_s5 + $0x3e8] sm:$0xff]  ;;  %v4524_v17 = vld [vmem:[%s6602_s5 + $0x3e0] sm:$0xff] }
  0xd0   : > { %811 = vmatpush1.msra.mxu0 %v674_v2  ;;  %6865 = vst [vmem:[#allocation40_spill] sm:$0xff] %v4512_v15  ;;  %6866 = vst [vmem:[#allocation41_spill] sm:$0xff] %v4518_v16  ;;  %v4530_v18 = vld [vmem:[%s6602_s5 + $0x3d8] sm:$0xff]  ;;  %v4536_v19 = vld [vmem:[%s6602_s5 + $0x3d0] sm:$0xff] }
  0xd1   : > { %812 = vmatprep.subr.mxu0 %v669_v29  ;;  %6867 = vst [vmem:[#allocation42_spill] sm:$0xff] %v4524_v17  ;;  %6868 = vst [vmem:[#allocation43_spill] sm:$0xff] %v4530_v18  ;;  %v4542_v20 = vld [vmem:[%s6602_s5 + $0x3c8] sm:$0xff]  ;;  %v4548_v21 = vld [vmem:[%s6602_s5 + $0x3c0] sm:$0xff] }
  0xd2   : > { %813 = vmatpush1.msra.mxu0 %v668_v30  ;;  %6869 = vst [vmem:[#allocation44_spill] sm:$0xff] %v4536_v19  ;;  %6870 = vst [vmem:[#allocation45_spill] sm:$0xff] %v4542_v20  ;;  %v4554_v22 = vld [vmem:[%s6602_s5 + $0x3b8] sm:$0xff]  ;;  %v4560_v23 = vld [vmem:[%s6602_s5 + $0x3b0] sm:$0xff] }
  0xd3   : > { %814 = vmatprep.subr.mxu0 %v663_v31  ;;  %6871 = vst [vmem:[#allocation46_spill] sm:$0xff] %v4548_v21  ;;  %6872 = vst [vmem:[#allocation47_spill] sm:$0xff] %v4554_v22  ;;  %v4566_v24 = vld [vmem:[%s6602_s5 + $0x3a8] sm:$0xff]  ;;  %v4578_v26 = vld [vmem:[%s6602_s5 + $0x398] sm:$0xff] }
  0xd4   : > { %815 = vmatpush1.msra.mxu0 %v662_v32  ;;  %6873 = vst [vmem:[#allocation48_spill] sm:$0xff] %v4560_v23  ;;  %6874 = vst [vmem:[#allocation49_spill] sm:$0xff] %v4566_v24  ;;  %v4584_v27 = vld [vmem:[%s6602_s5 + $0x390] sm:$0xff]  ;;  %v4590_v28 = vld [vmem:[%s6602_s5 + $0x388] sm:$0xff] }
  0xd5   : > { %3196 = vmatmul.mubr.msk.f32.vlgmr.msra.gmra.mxu0 %vm690_vm12, %v659_v25  ;;  %3197 = vmatprep.subr.msk.mxu0 %vm694_vm7, %v683_v33  ;;  %6876 = vst [vmem:[#allocation51_spill] sm:$0xff] %v4578_v26  ;;  %6877 = vst [vmem:[#allocation52_spill] sm:$0xff] %v4584_v27  ;;  %v4596_v2 = vld [vmem:[%s6602_s5 + $0x380] sm:$0xff]  ;;  %v4604_v29 = vld [vmem:[%s6602_s5 + $0x130] sm:$0xff] }
  0xd6   : > { %3198 = vmatpush1.msk.msra.mxu0 %vm694_vm7, %v682_v34  ;;  %919 = vmatprep.mubr.f32.mxu0 %v6626_v3  ;;  %6878 = vst [vmem:[#allocation53_spill] sm:$0xff] %v4590_v28  ;;  %6879 = vst [vmem:[#allocation54_spill] sm:$0xff] %v4596_v2  ;;  %v4609_v30 = vld [vmem:[%s6602_s5 + $0x378] sm:$0xff]  ;;  %v4614_v31 = vld [vmem:[%s6602_s5 + $0x128] sm:$0xff]  ;;  %vm2031_vm7 = vcmask 750592  }
  0xd7   : > { %881 = vmatprep.subr.mxu0 %v677_v35  ;;  %6880 = vst [vmem:[#allocation55_spill] sm:$0xff] %v4604_v29  ;;  %6881 = vst [vmem:[#allocation56_spill] sm:$0xff] %v4609_v30  ;;  %1159 = vmatpush2.msra.mxu1 %v4604_v29  ;;  %v4621_v32 = vld [vmem:[%s6602_s5 + $0x370] sm:$0xff]  ;;  %v4628_v33 = vld [vmem:[%s6602_s5 + $0x120] sm:$0xff] }
  0xd8   : > { %882 = vmatpush1.msra.mxu0 %v676_v36  ;;  %6882 = vst [vmem:[#allocation57_spill] sm:$0xff] %v4614_v31  ;;  %6883 = vst [vmem:[#allocation58_spill] sm:$0xff] %v4621_v32  ;;  %1160 = vmatprep.subr.mxu1 %v4614_v31  ;;  %v4633_v34 = vld [vmem:[%s6602_s5 + $0x368] sm:$0xff]  ;;  %v4640_v35 = vld [vmem:[%s6602_s5 + $0x118] sm:$0xff] }
  0xd9   : > { %883 = vmatprep.subr.mxu0 %v671_v37  ;;  %6884 = vst [vmem:[#allocation59_spill] sm:$0xff] %v4628_v33  ;;  %6885 = vst [vmem:[#allocation60_spill] sm:$0xff] %v4633_v34  ;;  %1161 = vmatpush2.msra.mxu1 %v4628_v33  ;;  %v4645_v36 = vld [vmem:[%s6602_s5 + $0x360] sm:$0xff]  ;;  %v4652_v37 = vld [vmem:[%s6602_s5 + $0x110] sm:$0xff] }
  0xda   : > { %884 = vmatpush1.msra.mxu0 %v670_v38  ;;  %6886 = vst [vmem:[#allocation61_spill] sm:$0xff] %v4640_v35  ;;  %6887 = vst [vmem:[#allocation62_spill] sm:$0xff] %v4645_v36  ;;  %1162 = vmatprep.subr.mxu1 %v4640_v35  ;;  %v4657_v38 = vld [vmem:[%s6602_s5 + $0x358] sm:$0xff]  ;;  %v4681_v3 = vld [vmem:[%s6602_s5 + $0x348] sm:$0xff] }
  0xdb   : > { %885 = vmatprep.subr.mxu0 %v665_v39  ;;  %6888 = vst [vmem:[#allocation63_spill] sm:$0xff] %v4652_v37  ;;  %6889 = vst [vmem:[#allocation64_spill] sm:$0xff] %v4657_v38  ;;  %1163 = vmatpush2.msra.mxu1 %v4652_v37  ;;  %v4664_v39 = vld [vmem:[%s6602_s5 + $0x108] sm:$0xff] }
  0xdc   : > { %886 = vmatpush1.msra.mxu0 %v664_v41  ;;  %6890 = vst [vmem:[#allocation65_spill] sm:$0xff] %v4664_v39  ;;  %v4669_v41 = vld [vmem:[%s6602_s5 + $0x350] sm:$0xff]  ;;  %1164 = vmatprep.subr.mxu1 %v4664_v39  ;;  %6893 = vst [vmem:[#allocation68_spill] sm:$0xff] %v4681_v3 }
  0xdd   : > { %3199 = vmatmul.mubr.msk.f32.vlgmr.msra.gmra.mxu0 %vm690_vm12, %v659_v25  ;;  %1173 = vmatprep.subr.mxu0 %v4315_v40  ;;  %v4572_v25 = vld [vmem:[%s6602_s5 + $0x3a0] sm:$0xff]  ;;  %6891 = vst [vmem:[#allocation66_spill] sm:$0xff] %v4669_v41 }
  0xde   : > { %1174 = vmatpush1.msra.mxu0 %v4320_v42  ;;  %6875 = vst [vmem:[#allocation50_spill] sm:$0xff] %v4572_v25  ;;  %1165 = vmatpush2.msra.mxu1 %v4674_v0 }
  0xdf   : > { %1175 = vmatprep.subr.mxu0 %v4325_v43 }
  0xe0   : > { %1176 = vmatpush1.msra.mxu0 %v4332_v44 }
  0xe1   : > { %1177 = vmatprep.subr.mxu0 %v4338_v45 }
  0xe2   : > { %1178 = vmatpush1.msra.mxu0 %v4344_v46 }
  0xe3   : > { %1179 = vmatprep.subr.mxu0 %v4350_v47 }
  0xe4   : > { %1180 = vmatpush1.msra.mxu0 %v4356_v48 }
  0xe5   : > { %1181 = vmatprep.subr.mxu0 %v4362_v49 }
  0xe6   : > { %1182 = vmatpush1.msra.mxu0 %v4368_v50 }
  0xe7   : > { %1183 = vmatprep.subr.mxu0 %v4374_v51 }
  0xe8   : > { %1184 = vmatpush1.msra.mxu0 %v4380_v52 }
  0xe9   : > { %1185 = vmatprep.subr.mxu0 %v4386_v53 }
  0xea   : > { %1186 = vmatpush1.msra.mxu0 %v4392_v54 }
  0xeb   : > { %1187 = vmatprep.subr.mxu0 %v4398_v55 }
  0xec   : > { %1188 = vmatpush1.msra.mxu0 %v4404_v56 }
  0xed   : > { %1189 = vmatprep.subr.mxu0 %v4410_v57 }
  0xee   : > { %1190 = vmatpush1.msra.mxu0 %v4416_v58 }
  0xef   : > { %1191 = vmatprep.subr.mxu0 %v4422_v59 }
  0xf0   : > { %1192 = vmatpush1.msra.mxu0 %v4428_v60 }
  0xf1   : > { %1193 = vmatprep.subr.mxu0 %v4434_v61 }
  0xf2   : > { %1194 = vmatpush1.msra.mxu0 %v4440_v62 }
  0xf3   : > { %1195 = vmatprep.subr.mxu0 %v4446_v63 }
  0xf4   : > { %1196 = vmatpush1.msra.mxu0 %v4452_v1 }
  0xf5   : > { %1197 = vmatprep.subr.mxu0 %v4458_v4 }
  0xf6   : > { %1198 = vmatpush1.msra.mxu0 %v4464_v7 }
  0xf7   : > { %1199 = vmatprep.subr.mxu0 %v4470_v8 }
  0xf8   : > { %1200 = vmatpush1.msra.mxu0 %v4476_v9 }
  0xf9   : > { %1201 = vmatprep.subr.mxu0 %v4482_v10 }
  0xfa   : > { %1202 = vmatpush1.msra.mxu0 %v4488_v11 }
  0xfb   : > { %1203 = vmatprep.subr.mxu0 %v4494_v12 }
  0xfc   : > { %1204 = vmatpush1.msra.mxu0 %v4500_v13 }
  0xfd   : > { %1205 = vmatprep.subr.mxu0 %v4506_v14 }
  0xfe   : > { %1206 = vmatpush2.msra.mxu0 %v4512_v15 }
  0xff   : > { %1207 = vmatprep.subr.mxu0 %v4518_v16 }
 0x100   : > { %1208 = vmatpush2.msra.mxu0 %v4524_v17 }
 0x101   : > { %1209 = vmatprep.subr.mxu0 %v4530_v18 }
 0x102   : > { %1210 = vmatpush2.msra.mxu0 %v4536_v19 }
 0x103   : > { %1211 = vmatprep.subr.mxu0 %v4542_v20 }
 0x104   : > { %1212 = vmatpush2.msra.mxu0 %v4548_v21 }
 0x105   : > { %1213 = vmatprep.subr.mxu0 %v4554_v22 }
 0x106   : > { %1214 = vmatpush2.msra.mxu0 %v4560_v23 }
 0x107   : > { %1215 = vmatprep.subr.mxu0 %v4566_v24 }
 0x108   : > { %1216 = vmatpush2.msra.mxu0 %v4572_v25 }
 0x109   : > { %1217 = vmatprep.subr.mxu0 %v4578_v26 }
 0x10a   : > { %1218 = vmatpush2.msra.mxu0 %v4584_v27 }
 0x10b   : > { %1219 = vmatprep.subr.mxu0 %v4590_v28 }
 0x10c   : > { %1220 = vmatpush2.msra.mxu0 %v4596_v2 }
 0x10d   : > { %1221 = vmatprep.subr.mxu0 %v4609_v30  ;;  %v4782_v30 = vld [vmem:[%s6602_s5 + $0x4d0] sm:$0xff] }
 0x10e   : > { %1222 = vmatpush2.msra.mxu0 %v4621_v32  ;;  %6909 = vst [vmem:[#allocation83_spill] sm:$0xff] %v4782_v30 }
 0x10f   : > { %1223 = vmatprep.subr.mxu0 %v4633_v34 }
 0x110   : > { %1224 = vmatpush2.msra.mxu0 %v4645_v36  ;;  %v4693_v36 = vld [vmem:[%s6602_s5 + $0x4f8] sm:$0x7f] }
 0x111   : > { %1225 = vmatprep.subr.mxu0 %v4657_v38  ;;  %v4688_v38 = vld [vmem:[%s6602_s5 + $0x340] sm:$0xff]  ;;  %6895 = vst [vmem:[#allocation70_spill] sm:$0xff] %v4693_v36  ;;  %3200 = vmatprep.subr.msk.mxu1 %vm1095_vm0, %v4693_v36 }
 0x112   : > { %1226 = vmatpush2.msra.mxu0 %v4669_v41  ;;  %6894 = vst [vmem:[#allocation69_spill] sm:$0xff] %v4688_v38  ;;  %v4707_v41 = vld [vmem:[%s6602_s5 + $0x330] sm:$0xff]  ;;  %v4719_v36 = vld [vmem:[%s6602_s5 + $0x320] sm:$0xff] }
 0x113   : > { %1227 = vmatprep.subr.mxu0 %v4681_v3  ;;  %v4701_v3 = vld [vmem:[%s6602_s5 + $0x338] sm:$0xff]  ;;  %6897 = vst [vmem:[#allocation72_spill] sm:$0xff] %v4707_v41  ;;  %6899 = vst [vmem:[#allocation74_spill] sm:$0xff] %v4719_v36 }
 0x114   : > { %1228 = vmatpush2.msra.mxu0 %v4688_v38  ;;  %6896 = vst [vmem:[#allocation71_spill] sm:$0xff] %v4701_v3  ;;  %v4713_v38 = vld [vmem:[%s6602_s5 + $0x328] sm:$0xff] }
 0x115   : > { %1229 = vmatprep.subr.mxu0 %v4701_v3  ;;  %6898 = vst [vmem:[#allocation73_spill] sm:$0xff] %v4713_v38  ;;  %v4725_v3 = vld [vmem:[%s6602_s5 + $0x318] sm:$0xff] }
 0x116   : > { %1230 = vmatpush2.msra.mxu0 %v4707_v41  ;;  %6900 = vst [vmem:[#allocation75_spill] sm:$0xff] %v4725_v3  ;;  %v4731_v41 = vld [vmem:[%s6602_s5 + $0x310] sm:$0xff] }
 0x117   : > { %1231 = vmatprep.subr.mxu0 %v4713_v38  ;;  %6901 = vst [vmem:[#allocation76_spill] sm:$0xff] %v4731_v41  ;;  %v4737_v38 = vld [vmem:[%s6602_s5 + $0x308] sm:$0xff] }
 0x118   : > { %1232 = vmatpush2.msra.mxu0 %v4719_v36  ;;  %6902 = vst [vmem:[#allocation77_spill] sm:$0xff] %v4737_v38  ;;  %v4743_v36 = vld [vmem:[%s6602_s5 + $0x300] sm:$0xff] }
 0x119   : > { %1233 = vmatprep.subr.mxu0 %v4725_v3  ;;  %6903 = vst [vmem:[#allocation78_spill] sm:$0xff] %v4743_v36  ;;  %v4747_v3 = vpop.permute.xlu0 %687 }
 0x11a   : > { %1234 = vmatpush2.msra.mxu0 %v4731_v41 }
 0x11b   : > { %1235 = vmatprep.subr.mxu0 %v4737_v38  ;;  %v4756_v38 = vld [vmem:[%s6602_s5 + $0x4f0] sm:$0x7f] }
 0x11c   : > { %1236 = vmatpush2.msra.mxu0 %v4743_v36  ;;  %6904 = vst [vmem:[#allocation79_spill] sm:$0xff] %v4756_v38 }
 0x11d   : > { %1339 = vmatprep.subr.mxu0 %v4026_v5  ;;  %v4761_v5 = vld [vmem:[%s6602_s5 + $0x4e8] sm:$0xff] }
 0x11e   : > { %6905 = vst [vmem:[#allocation80_spill] sm:$0xff] %v4761_v5 }
 0x18d   : > { %v779_v0 = vpop.f32.mrf.mxu0 }
 0x18e   : > { %v780_v39 = vadd.f32 %v779_v0, %v4747_v3  ;;  %v4767_v0 = vld [vmem:[%s6602_s5 + $0x4e0] sm:$0xff] }
 0x18f   : > { %v781_v41 = vpop.f32.mrf.mxu0  ;;  %6906 = vst [vmem:[#allocation81_spill] sm:$0xff] %v4767_v0 }
 0x190   : > { %v782_v34 = vadd.f32 %v781_v41, %v4747_v3  ;;  %v4751_v32 = vmax.f32 %v780_v39, 0.0  ;;  %v4775_v39 = vld [vmem:[%s6602_s5 + $0x4d8] sm:$0xff]  ;;  %v6908_v41 = vmov 0.0  }
 0x191   : > { %6907 = vst [vmem:[#allocation82_spill] sm:$0xff] %v4775_v39 }
 0x192   : > { %v927_v37 = vmax.f32 %v782_v34, 0.0 }
 0x194   : > { %1166 = vmatprep.mubr.f32.mxu1 %v927_v37 }
 0x195   : > { %v850_v36 = vpop.f32.mrf.mxu0  ;;  %1167 = vmatmul.mubr.f32.vlgmr.msra.gmra.mxu1 %v4751_v32 }
 0x196   : > { %v851_v34 = vadd.f32 %v850_v36, %v4747_v3  ;;  %3201 = vmatpush1.msk.msra.mxu1 %vm1095_vm0, %v4756_v38  ;;  %1308 = vmatprep.mubr.f32.mxu1 %v6908_v41  ;;  %v4789_v38 = vld [vmem:[%s6602_s5 + $0x4c8] sm:$0xff] }
 0x197   : > { %1246 = vmatprep.subr.mxu1 %v4761_v5  ;;  %v852_v35 = vpop.f32.mrf.mxu0  ;;  %6910 = vst [vmem:[#allocation84_spill] sm:$0xff] %v4789_v38  ;;  %v4795_v5 = vld [vmem:[%s6602_s5 + $0x4c0] sm:$0xff] }
 0x198   : > { %v928_v33 = vmax.f32 %v851_v34, 0.0  ;;  %v853_v36 = vadd.f32 %v852_v35, %v4747_v3  ;;  %1247 = vmatpush1.msra.mxu1 %v4767_v0  ;;  %6911 = vst [vmem:[#allocation85_spill] sm:$0xff] %v4795_v5  ;;  %v4804_v35 = vld [vmem:[%s6602_s5 + $0x4b8] sm:$0xff]  ;;  %v4916_v0 = vld [vmem:[%s6602_s5 + $0xd0] sm:$0xff] }
 0x199   : > { %1248 = vmatprep.subr.mxu1 %v4775_v39  ;;  %6912 = vst [vmem:[#allocation86_spill] sm:$0xff] %v4804_v35  ;;  %v4832_v39 = vld [vmem:[%s6602_s5 + $0x498] sm:$0xff]  ;;  %6930 = vst [vmem:[#allocation102_spill] sm:$0xff] %v4916_v0 }
 0x19a   : > { %v4797_v41 = vmax.f32 %v853_v36, 0.0  ;;  %1249 = vmatpush1.msra.mxu1 %v4782_v30  ;;  %v3585_v34 = vpack.i.bf16 %v928_v33, %v927_v37  ;;  %v4812_v36 = vld [vmem:[%s6602_s5 + $0x4b0] sm:$0xff]  ;;  %v4826_v30 = vld [vmem:[%s6602_s5 + $0x4a0] sm:$0xff]  ;;  %6917 = vst [vmem:[#allocation90_spill] sm:$0xff] %v4832_v39 }
 0x19b   : > { %1250 = vmatprep.subr.mxu1 %v4789_v38  ;;  %6914 = vst [vmem:[#allocation87_spill] sm:$0xff] %v4812_v36  ;;  %v4819_v38 = vld [vmem:[%s6602_s5 + $0x4a8] sm:$0xff]  ;;  %6916 = vst [vmem:[#allocation89_spill] sm:$0xff] %v4826_v30 }
 0x19c   : > { %1251 = vmatpush1.msra.mxu1 %v4795_v5  ;;  %1325 = vrot.lane.b32.xlu0 %v4797_v41, %s6913_s20  ;;  %6915 = vst [vmem:[#allocation88_spill] sm:$0xff] %v4819_v38 }
 0x19d   : > { %1237 = vmatprep.mubr.f32.mxu0 %v4797_v41  ;;  %3586 = vrot.lane.b32.xlu1 %v3585_v34, %s6913_s20  ;;  %v921_v37 = vpop.f32.mrf.mxu0 }
 0x19e   : > { %1252 = vmatprep.subr.mxu1 %v4804_v35  ;;  %v922_v5 = vadd.f32 %v921_v37, %v4747_v3  ;;  %1238 = vmatmul.mubr.f32.vlgmr.msra.gmra.mxu0 %v928_v33  ;;  %v4840_v33 = vld [vmem:[%s6602_s5 + $0x490] sm:$0xff]  ;;  %v4848_v37 = vld [vmem:[%s6602_s5 + $0x488] sm:$0xff]  ;;  %v4901_v35 = vld [vmem:[%s6602_s5 + $0xd8] sm:$0xff] }
 0x19f   : > { %1253 = vmatpush1.msra.mxu1 %v4812_v36  ;;  %1340 = vmatpush1.msra.mxu0 %v4031_v6  ;;  %6919 = vst [vmem:[#allocation91_spill] sm:$0xff] %v4840_v33  ;;  %6920 = vst [vmem:[#allocation92_spill] sm:$0xff] %v4848_v37  ;;  %v923_v36 = vpop.f32.mrf.mxu0 }
 0x1a0   : > { %1254 = vmatprep.subr.mxu1 %v4819_v38  ;;  %3591 = vrot.lane.b32.xlu0 %v3585_v34, %s6918_s24  ;;  %v4850_v6 = vmax.f32 %v922_v5, 0.0  ;;  %v4856_v38 = vld [vmem:[%s6602_s5 + $0x480] sm:$0xff]  ;;  %v4868_v5 = vld [vmem:[%s6602_s5 + $0x478] sm:$0xff]  ;;  %6928 = vst [vmem:[#allocation100_spill] sm:$0xff] %v4901_v35 }
 0x1a1   : > { %1255 = vmatpush1.msra.mxu1 %v4826_v30  ;;  %1319 = vrot.lane.b32.xlu1 %v4751_v32, %s6913_s20  ;;  %6921 = vst [vmem:[#allocation93_spill] sm:$0xff] %v4856_v38  ;;  %v4861_v30 = vld [vmem:[%s6602_s5 + $0xe8] sm:$0xff]  ;;  %6923 = vst [vmem:[#allocation95_spill] sm:$0xff] %v4868_v5 }
 0x1a2   : > { %1256 = vmatprep.subr.mxu1 %v4832_v39  ;;  %6922 = vst [vmem:[#allocation94_spill] sm:$0xff] %v4861_v30  ;;  %1341 = vmatprep.subr.mxu0 %v4861_v30  ;;  %v4873_v39 = vld [vmem:[%s6602_s5 + $0xe0] sm:$0xff]  ;;  %v3595_v30 = vpack.i.bf16 %v4797_v41, %v4751_v32 }
 0x1a3   : > { %1257 = vmatpush1.msra.mxu1 %v4840_v33  ;;  %6924 = vst [vmem:[#allocation96_spill] sm:$0xff] %v4873_v39  ;;  %1342 = vmatpush1.msra.mxu0 %v4873_v39  ;;  %v4882_v33 = vld [vmem:[%s6602_s5 + $0x470] sm:$0xff]  ;;  %v4890_v39 = vld [vmem:[%s6602_s5 + $0x468] sm:$0xff] }
 0x1a4   : > { %1258 = vmatprep.subr.mxu1 %v4848_v37  ;;  %1561 = vrot.lane.b32.xlu0 %v4850_v6, %s6918_s24  ;;  %6925 = vst [vmem:[#allocation97_spill] sm:$0xff] %v4882_v33  ;;  %6926 = vst [vmem:[#allocation98_spill] sm:$0xff] %v4890_v39  ;;  %v4896_v37 = vld [vmem:[%s6602_s5 + $0x460] sm:$0xff] }
 0x1a5   : > { %1259 = vmatpush1.msra.mxu1 %v4856_v38  ;;  %1327 = vrot.lane.b32.xlu1 %v4850_v6, %s6913_s20  ;;  %6927 = vst [vmem:[#allocation99_spill] sm:$0xff] %v4896_v37  ;;  %v924_v38 = vadd.f32 %v923_v36, %v4747_v3  ;;  %v4924_v3 = vld [vmem:[%s6602_s5 + $0x450] sm:$0xff]  ;;  %v4931_v36 = vld [vmem:[%s6602_s5 + $0x448] sm:$0xff] }
 0x1a6   : > { %1260 = vmatprep.subr.mxu1 %v4868_v5  ;;  %1343 = vmatprep.subr.mxu0 %v4901_v35  ;;  %v4911_v5 = vld [vmem:[%s6602_s5 + $0x458] sm:$0xff]  ;;  %6932 = vst [vmem:[#allocation103_spill] sm:$0xff] %v4924_v3  ;;  %6933 = vst [vmem:[#allocation104_spill] sm:$0xff] %v4931_v36 }
 0x1a7   : > { %1261 = vmatpush1.msra.mxu1 %v4882_v33  ;;  %6929 = vst [vmem:[#allocation101_spill] sm:$0xff] %v4911_v5  ;;  %1344 = vmatpush1.msra.mxu0 %v4916_v0  ;;  %v5009_v33 = vld [vmem:[%s6602_s5 + $0x408] sm:$0xff] }
 0x1a8   : > { %1262 = vmatprep.subr.mxu1 %v4890_v39  ;;  %3601 = vrot.lane.b32.xlu0 %v3585_v34, %s6931_s17  ;;  %v4937_v34 = vld [vmem:[%s6602_s5 + $0x440] sm:$0xff]  ;;  %v4942_v39 = vld [vmem:[%s6602_s5 + $0xc8] sm:$0xff]  ;;  %6943 = vst [vmem:[#allocation114_spill] sm:$0xff] %v5009_v33 }
 0x1a9   : > { %1263 = vmatpush1.msra.mxu1 %v4896_v37  ;;  %3596 = vrot.lane.b32.xlu1 %v3595_v30, %s6918_s24  ;;  %6934 = vst [vmem:[#allocation105_spill] sm:$0xff] %v4937_v34  ;;  %6935 = vst [vmem:[#allocation106_spill] sm:$0xff] %v4942_v39  ;;  %v931_v30 = vmax.f32 %v924_v38, 0.0  ;;  %v4949_v37 = vld [vmem:[%s6602_s5 + $0x438] sm:$0xff]  ;;  %v4963_v38 = vld [vmem:[%s6602_s5 + $0x430] sm:$0xff] }
 0x1aa   : > { %1264 = vmatprep.subr.mxu1 %v4911_v5  ;;  %1345 = vmatprep.subr.mxu0 %v4942_v39  ;;  %6936 = vst [vmem:[#allocation107_spill] sm:$0xff] %v4949_v37  ;;  %v4954_v5 = vld [vmem:[%s6602_s5 + $0xc0] sm:$0xff]  ;;  %6938 = vst [vmem:[#allocation109_spill] sm:$0xff] %v4963_v38 }
 0x1ab   : > { %1265 = vmatpush1.msra.mxu1 %v4924_v3  ;;  %6937 = vst [vmem:[#allocation108_spill] sm:$0xff] %v4954_v5  ;;  %1346 = vmatpush1.msra.mxu0 %v4954_v5  ;;  %v4970_v3 = vld [vmem:[%s6602_s5 + $0x428] sm:$0xff] }
 0x1ac   : > { %1266 = vmatprep.subr.mxu1 %v4931_v36  ;;  %1795 = vrot.lane.b32.xlu0 %v4797_v41, %s6931_s17  ;;  %6939 = vst [vmem:[#allocation110_spill] sm:$0xff] %v4970_v3  ;;  %v4976_v41 = vld [vmem:[%s6602_s5 + $0x420] sm:$0xff]  ;;  %v4981_v36 = vld [vmem:[%s6602_s5 + $0xb8] sm:$0xff] }
 0x1ad   : > { %1267 = vmatpush1.msra.mxu1 %v4937_v34  ;;  %1563 = vrot.lane.b32.xlu1 %v931_v30, %s6918_s24  ;;  %6940 = vst [vmem:[#allocation111_spill] sm:$0xff] %v4981_v36  ;;  %v4988_v34 = vld [vmem:[%s6602_s5 + $0x418] sm:$0xff] }
 0x1ae   : > { %1268 = vmatprep.subr.mxu1 %v4949_v37  ;;  %1347 = vmatprep.subr.mxu0 %v4981_v36  ;;  %6941 = vst [vmem:[#allocation112_spill] sm:$0xff] %v4988_v34  ;;  %v4993_v37 = vld [vmem:[%s6602_s5 + $0xb0] sm:$0xff] }
 0x1af   : > { %1269 = vmatpush1.msra.mxu1 %v4963_v38  ;;  %6942 = vst [vmem:[#allocation113_spill] sm:$0xff] %v4993_v37  ;;  %1348 = vmatpush1.msra.mxu0 %v4993_v37  ;;  %v5001_v38 = vld [vmem:[%s6602_s5 + $0x410] sm:$0xff] }
 0x1b0   : > { %1270 = vmatprep.subr.mxu1 %v4970_v3  ;;  %1799 = vrot.lane.b32.xlu0 %v931_v30, %s6931_s17  ;;  %v5015_v30 = vld [vmem:[%s6602_s5 + $0x400] sm:$0xff]  ;;  %v5020_v3 = vld [vmem:[%s6602_s5 + $0xa8] sm:$0xff] }
 0x1b1   : > { %1271 = vmatpush1.msra.mxu1 %v4976_v41  ;;  %1789 = vrot.lane.b32.xlu1 %v4751_v32, %s6931_s17  ;;  %6944 = vst [vmem:[#allocation115_spill] sm:$0xff] %v5015_v30  ;;  %6945 = vst [vmem:[#allocation116_spill] sm:$0xff] %v5020_v3  ;;  %v5027_v32 = vld [vmem:[%s6602_s5 + $0xa0] sm:$0xff] }
 0x1b2   : > { %1272 = vmatprep.subr.mxu1 %v4988_v34  ;;  %1349 = vmatprep.subr.mxu0 %v5020_v3  ;;  %6946 = vst [vmem:[#allocation117_spill] sm:$0xff] %v5027_v32  ;;  %v5034_v34 = vld [vmem:[%s6602_s5 + $0x98] sm:$0xff] }
 0x1b3   : > { %1273 = vmatpush1.msra.mxu1 %v5001_v38  ;;  %1350 = vmatpush1.msra.mxu0 %v5027_v32  ;;  %6947 = vst [vmem:[#allocation118_spill] sm:$0xff] %v5034_v34 }
 0x1b4   : > { %1274 = vmatprep.subr.mxu1 %v5009_v33  ;;  %1351 = vmatprep.subr.mxu0 %v5034_v34  ;;  %v5047_v33 = vld [vmem:[%s6602_s5 + $0x90] sm:$0xff] }
 0x1b5   : > { %1275 = vmatpush1.msra.mxu1 %v5015_v30  ;;  %1797 = vrot.lane.b32.xlu1 %v4850_v6, %s6931_s17  ;;  %6948 = vst [vmem:[#allocation119_spill] sm:$0xff] %v5047_v33  ;;  %v5054_v30 = vld [vmem:[%s6602_s5 + $0x88] sm:$0xff]  ;;  %s3859_s17 = smov 89  }
 0x1b6   : > { %3202 = vmatmul.mubr.msk.f32.vlgmr.msra.gmra.mxu1 %vm446_vm3, %v4850_v6  ;;  %1410 = vmatprep.subr.mxu1 %v4315_v40  ;;  %6949 = vst [vmem:[#allocation120_spill] sm:$0xff] %v5054_v30  ;;  %v5061_v6 = vld [vmem:[%s6602_s5 + $0x80] sm:$0xff] }
 0x1b7   : > { %1411 = vmatpush1.msra.mxu1 %v4320_v42  ;;  %1352 = vmatpush1.msra.mxu0 %v5047_v33  ;;  %6950 = vst [vmem:[#allocation121_spill] sm:$0xff] %v5061_v6 }
 0x1b8   : > { %1412 = vmatprep.subr.mxu1 %v4325_v43  ;;  %1353 = vmatprep.subr.mxu0 %v5054_v30  ;;  %v5068_v43 = vld [vmem:[%s6602_s5 + $0x78] sm:$0xff] }
 0x1b9   : > { %1413 = vmatpush1.msra.mxu1 %v4332_v44  ;;  %1354 = vmatpush1.msra.mxu0 %v5061_v6  ;;  %v5075_v44 = vld [vmem:[%s6602_s5 + $0x70] sm:$0xff] }
 0x1ba   : > { %1414 = vmatprep.subr.mxu1 %v4338_v45  ;;  %1355 = vmatprep.subr.mxu0 %v5068_v43  ;;  %6951 = vst [vmem:[#allocation122_spill] sm:$0xff] %v5075_v44  ;;  %v5082_v45 = vld [vmem:[%s6602_s5 + $0x68] sm:$0xff] }
 0x1bb   : > { %1415 = vmatpush1.msra.mxu1 %v4344_v46  ;;  %1356 = vmatpush1.msra.mxu0 %v5075_v44  ;;  %v5089_v46 = vld [vmem:[%s6602_s5 + $0x60] sm:$0xff] }
 0x1bc   : > { %1416 = vmatprep.subr.mxu1 %v4350_v47  ;;  %1357 = vmatprep.subr.mxu0 %v5082_v45  ;;  %6952 = vst [vmem:[#allocation123_spill] sm:$0xff] %v5089_v46  ;;  %v5096_v47 = vld [vmem:[%s6602_s5 + $0x58] sm:$0xff] }
 0x1bd   : > { %1417 = vmatpush1.msra.mxu1 %v4356_v48  ;;  %1358 = vmatpush1.msra.mxu0 %v5089_v46  ;;  %6953 = vst [vmem:[#allocation124_spill] sm:$0xff] %v5096_v47  ;;  %v5103_v48 = vld [vmem:[%s6602_s5 + $0x50] sm:$0xff] }
 0x1be   : > { %1418 = vmatprep.subr.mxu1 %v4362_v49  ;;  %1359 = vmatprep.subr.mxu0 %v5096_v47  ;;  %v5110_v49 = vld [vmem:[%s6602_s5 + $0x48] sm:$0xff] }
 0x1bf   : > { %1419 = vmatpush1.msra.mxu1 %v4368_v50  ;;  %1360 = vmatpush1.msra.mxu0 %v5103_v48  ;;  %6954 = vst [vmem:[#allocation125_spill] sm:$0xff] %v5110_v49  ;;  %v5117_v50 = vld [vmem:[%s6602_s5 + $0x40] sm:$0xff] }
 0x1c0   : > { %1420 = vmatprep.subr.mxu1 %v4374_v51  ;;  %1361 = vmatprep.subr.mxu0 %v5110_v49  ;;  %v5124_v51 = vld [vmem:[%s6602_s5 + $0x38] sm:$0xff] }
 0x1c1   : > { %1421 = vmatpush1.msra.mxu1 %v4380_v52  ;;  %1362 = vmatpush1.msra.mxu0 %v5117_v50  ;;  %v5131_v52 = vld [vmem:[%s6602_s5 + $0x30] sm:$0xff] }
 0x1c2   : > { %1422 = vmatprep.subr.mxu1 %v4386_v53  ;;  %1363 = vmatprep.subr.mxu0 %v5124_v51  ;;  %6955 = vst [vmem:[#allocation126_spill] sm:$0xff] %v5131_v52  ;;  %v5138_v53 = vld [vmem:[%s6602_s5 + $0x28] sm:$0xff] }
 0x1c3   : > { %1423 = vmatpush1.msra.mxu1 %v4392_v54  ;;  %1364 = vmatpush1.msra.mxu0 %v5131_v52  ;;  %6956 = vst [vmem:[#allocation127_spill] sm:$0xff] %v5138_v53  ;;  %v5145_v54 = vld [vmem:[%s6602_s5 + $0x20] sm:$0xff] }
 0x1c4   : > { %1424 = vmatprep.subr.mxu1 %v4398_v55  ;;  %1365 = vmatprep.subr.mxu0 %v5138_v53  ;;  %6957 = vst [vmem:[#allocation128_spill] sm:$0xff] %v5145_v54  ;;  %v5152_v55 = vld [vmem:[%s6602_s5 + $0x18] sm:$0xff] }
 0x1c5   : > { %1425 = vmatpush1.msra.mxu1 %v4404_v56  ;;  %1366 = vmatpush1.msra.mxu0 %v5145_v54  ;;  %v5159_v56 = vld [vmem:[%s6602_s5 + $0x10] sm:$0xff] }
 0x1c6   : > { %1426 = vmatprep.subr.mxu1 %v4410_v57  ;;  %1367 = vmatprep.subr.mxu0 %v5152_v55  ;;  %v5166_v57 = vld [vmem:[%s6602_s5 + $0x8] sm:$0xff] }
 0x1c7   : > { %1427 = vmatpush1.msra.mxu1 %v4416_v58  ;;  %1368 = vmatpush1.msra.mxu0 %v5159_v56  ;;  %v5173_v58 = vld [vmem:[%s6602_s5] sm:$0xff] }
 0x1c8   : > { %1428 = vmatprep.subr.mxu1 %v4422_v59  ;;  %1369 = vmatprep.subr.mxu0 %v5166_v57  ;;  %v5180_v59 = vld [vmem:[%s6602_s5 + $0x1f8] sm:$0xff] }
 0x1c9   : > { %1429 = vmatpush1.msra.mxu1 %v4428_v60  ;;  %1370 = vmatpush1.msra.mxu0 %v5173_v58  ;;  %v5187_v60 = vld [vmem:[%s6602_s5 + $0x1f0] sm:$0xff] }
 0x1ca   : > { %1430 = vmatprep.subr.mxu1 %v4434_v61  ;;  %1371 = vmatprep.subr.mxu0 %v5180_v59  ;;  %v5194_v61 = vld [vmem:[%s6602_s5 + $0x1e8] sm:$0xff] }
 0x1cb   : > { %1431 = vmatpush1.msra.mxu1 %v4440_v62  ;;  %1372 = vmatpush2.msra.mxu0 %v5187_v60  ;;  %v5201_v62 = vld [vmem:[%s6602_s5 + $0x1e0] sm:$0xff] }
 0x1cc   : > { %1432 = vmatprep.subr.mxu1 %v4446_v63  ;;  %1373 = vmatprep.subr.mxu0 %v5194_v61  ;;  %v5208_v63 = vld [vmem:[%s6602_s5 + $0x1d8] sm:$0xff] }
 0x1cd   : > { %1433 = vmatpush1.msra.mxu1 %v4452_v1  ;;  %1374 = vmatpush2.msra.mxu0 %v5201_v62  ;;  %v5215_v1 = vld [vmem:[%s6602_s5 + $0x1d0] sm:$0xff] }
 0x1ce   : > { %1434 = vmatprep.subr.mxu1 %v4458_v4  ;;  %1375 = vmatprep.subr.mxu0 %v5208_v63  ;;  %v5222_v4 = vld [vmem:[%s6602_s5 + $0x1c8] sm:$0xff] }
 0x1cf   : > { %1435 = vmatpush1.msra.mxu1 %v4464_v7  ;;  %1376 = vmatpush2.msra.mxu0 %v5215_v1  ;;  %v5229_v7 = vld [vmem:[%s6602_s5 + $0x1c0] sm:$0xff] }
 0x1d0   : > { %1436 = vmatprep.subr.mxu1 %v4470_v8  ;;  %1377 = vmatprep.subr.mxu0 %v5222_v4  ;;  %v5236_v8 = vld [vmem:[%s6602_s5 + $0x1b8] sm:$0xff] }
 0x1d1   : > { %1437 = vmatpush1.msra.mxu1 %v4476_v9  ;;  %1378 = vmatpush2.msra.mxu0 %v5229_v7  ;;  %v5243_v9 = vld [vmem:[%s6602_s5 + $0x1b0] sm:$0xff] }
 0x1d2   : > { %1438 = vmatprep.subr.mxu1 %v4482_v10  ;;  %1379 = vmatprep.subr.mxu0 %v5236_v8  ;;  %v5250_v10 = vld [vmem:[%s6602_s5 + $0x1a8] sm:$0xff] }
 0x1d3   : > { %1439 = vmatpush1.msra.mxu1 %v4488_v11  ;;  %1380 = vmatpush2.msra.mxu0 %v5243_v9  ;;  %v5257_v11 = vld [vmem:[%s6602_s5 + $0x1a0] sm:$0xff] }
 0x1d4   : > { %1440 = vmatprep.subr.mxu1 %v4494_v12  ;;  %1381 = vmatprep.subr.mxu0 %v5250_v10  ;;  %v5264_v12 = vld [vmem:[%s6602_s5 + $0x198] sm:$0xff] }
 0x1d5   : > { %1441 = vmatpush1.msra.mxu1 %v4500_v13  ;;  %1382 = vmatpush2.msra.mxu0 %v5257_v11  ;;  %v5271_v13 = vld [vmem:[%s6602_s5 + $0x190] sm:$0xff] }
 0x1d6   : > { %1442 = vmatprep.subr.mxu1 %v4506_v14  ;;  %1383 = vmatprep.subr.mxu0 %v5264_v12  ;;  %v5278_v14 = vld [vmem:[%s6602_s5 + $0x188] sm:$0xff] }
 0x1d7   : > { %1443 = vmatpush2.msra.mxu1 %v4512_v15  ;;  %1384 = vmatpush2.msra.mxu0 %v5271_v13  ;;  %v5285_v15 = vld [vmem:[%s6602_s5 + $0x180] sm:$0xff] }
 0x1d8   : > { %1444 = vmatprep.subr.mxu1 %v4518_v16  ;;  %1385 = vmatprep.subr.mxu0 %v5278_v14  ;;  %6958 = vst [vmem:[#allocation129_spill] sm:$0xff] %v5285_v15  ;;  %v5292_v16 = vld [vmem:[%s6602_s5 + $0x178] sm:$0xff] }
 0x1d9   : > { %1445 = vmatpush2.msra.mxu1 %v4524_v17  ;;  %1386 = vmatpush2.msra.mxu0 %v5285_v15  ;;  %6959 = vst [vmem:[#allocation130_spill] sm:$0xff] %v5292_v16  ;;  %v5299_v17 = vld [vmem:[%s6602_s5 + $0x170] sm:$0xff] }
 0x1da   : > { %1446 = vmatprep.subr.mxu1 %v4530_v18  ;;  %1387 = vmatprep.subr.mxu0 %v5292_v16  ;;  %6960 = vst [vmem:[#allocation131_spill] sm:$0xff] %v5299_v17  ;;  %v5306_v18 = vld [vmem:[%s6602_s5 + $0x168] sm:$0xff] }
 0x1db   : > { %1447 = vmatpush2.msra.mxu1 %v4536_v19  ;;  %1388 = vmatpush2.msra.mxu0 %v5299_v17  ;;  %6961 = vst [vmem:[#allocation132_spill] sm:$0xff] %v5306_v18  ;;  %v5313_v19 = vld [vmem:[%s6602_s5 + $0x160] sm:$0xff] }
 0x1dc   : > { %1448 = vmatprep.subr.mxu1 %v4542_v20  ;;  %1389 = vmatprep.subr.mxu0 %v5306_v18  ;;  %6962 = vst [vmem:[#allocation133_spill] sm:$0xff] %v5313_v19  ;;  %v5320_v20 = vld [vmem:[%s6602_s5 + $0x158] sm:$0xff] }
 0x1dd   : > { %1449 = vmatpush2.msra.mxu1 %v4548_v21  ;;  %1390 = vmatpush2.msra.mxu0 %v5313_v19  ;;  %6963 = vst [vmem:[#allocation134_spill] sm:$0xff] %v5320_v20  ;;  %v5327_v21 = vld [vmem:[%s6602_s5 + $0x150] sm:$0xff] }
 0x1de   : > { %1450 = vmatprep.subr.mxu1 %v4554_v22  ;;  %1391 = vmatprep.subr.mxu0 %v5320_v20  ;;  %6964 = vst [vmem:[#allocation135_spill] sm:$0xff] %v5327_v21  ;;  %v5334_v22 = vld [vmem:[%s6602_s5 + $0x148] sm:$0xff]  ;;  %v6993_v20 = vld [vmem:[#allocation80_spill] sm:$0xff] }
 0x1df   : > { %1451 = vmatpush2.msra.mxu1 %v4560_v23  ;;  %1392 = vmatpush2.msra.mxu0 %v5327_v21  ;;  %6965 = vst [vmem:[#allocation136_spill] sm:$0xff] %v5334_v22  ;;  %v5341_v23 = vld [vmem:[%s6602_s5 + $0x140] sm:$0xff]  ;;  %v6972_v21 = vld [vmem:[#allocation63_spill] sm:$0xff] }
 0x1e0   : > { %1452 = vmatprep.subr.mxu1 %v4566_v24  ;;  %1393 = vmatprep.subr.mxu0 %v5334_v22  ;;  %6966 = vst [vmem:[#allocation137_spill] sm:$0xff] %v5341_v23  ;;  %v5348_v24 = vld [vmem:[%s6602_s5 + $0x138] sm:$0xff]  ;;  %v6971_v22 = vld [vmem:[#allocation58_spill] sm:$0xff] }
 0x1e1   : > { %1453 = vmatpush2.msra.mxu1 %v4572_v25  ;;  %1394 = vmatpush2.msra.mxu0 %v5341_v23  ;;  %6967 = vst [vmem:[#allocation138_spill] sm:$0xff] %v5348_v24  ;;  %v6968_v25 = vld [vmem:[#allocation59_spill] sm:$0xff]  ;;  %v6970_v23 = vld [vmem:[#allocation61_spill] sm:$0xff] }
 0x1e2   : > { %1454 = vmatprep.subr.mxu1 %v4578_v26  ;;  %1395 = vmatprep.subr.mxu0 %v5348_v24  ;;  %v6969_v26 = vld [vmem:[#allocation56_spill] sm:$0xff] }
 0x1e3   : > { %1455 = vmatpush2.msra.mxu1 %v4584_v27  ;;  %1396 = vmatpush2.msra.mxu0 %v4604_v29  ;;  %v6973_v24 = vld [vmem:[#allocation60_spill] sm:$0xff]  ;;  %v6974_v27 = vld [vmem:[#allocation65_spill] sm:$0xff]  ;;  %v6975_v29 = vld [vmem:[#allocation62_spill] sm:$0xff] }
 0x1e4   : > { %1456 = vmatprep.subr.mxu1 %v4590_v28  ;;  %1397 = vmatprep.subr.mxu0 %v4614_v31  ;;  %v6976_v28 = vld [vmem:[#allocation67_spill] sm:$0xff]  ;;  %v6977_v31 = vld [vmem:[#allocation64_spill] sm:$0xff] }
 0x1e5   : > { %1457 = vmatpush2.msra.mxu1 %v4596_v2  ;;  %1398 = vmatpush2.msra.mxu0 %v6968_v25  ;;  %v6978_v2 = vld [vmem:[#allocation70_spill] sm:$0xff]  ;;  %v6988_v25 = vld [vmem:[#allocation77_spill] sm:$0xff] }
 0x1e6   : > { %1458 = vmatprep.subr.mxu1 %v6969_v26  ;;  %1399 = vmatprep.subr.mxu0 %v6970_v23  ;;  %v6979_v26 = vld [vmem:[#allocation66_spill] sm:$0xff]  ;;  %v6980_v23 = vld [vmem:[#allocation68_spill] sm:$0xff] }
 0x1e7   : > { %1459 = vmatpush2.msra.mxu1 %v6971_v22  ;;  %1400 = vmatpush2.msra.mxu0 %v6972_v21  ;;  %v6981_v22 = vld [vmem:[#allocation69_spill] sm:$0xff]  ;;  %v6982_v21 = vld [vmem:[#allocation71_spill] sm:$0xff] }
 0x1e8   : > { %1460 = vmatprep.subr.mxu1 %v6973_v24  ;;  %1401 = vmatprep.subr.mxu0 %v6974_v27  ;;  %v6983_v24 = vld [vmem:[#allocation72_spill] sm:$0xff]  ;;  %v6984_v27 = vld [vmem:[#allocation73_spill] sm:$0xff] }
 0x1e9   : > { %1461 = vmatpush2.msra.mxu1 %v6975_v29  ;;  %1402 = vmatpush2.msra.mxu0 %v6976_v28  ;;  %v6985_v29 = vld [vmem:[#allocation74_spill] sm:$0xff]  ;;  %v6986_v28 = vld [vmem:[#allocation75_spill] sm:$0xff] }
 0x1ea   : > { %1462 = vmatprep.subr.mxu1 %v6977_v31  ;;  %3203 = vmatprep.subr.msk.mxu0 %vm1095_vm0, %v6978_v2  ;;  %v6987_v31 = vld [vmem:[#allocation76_spill] sm:$0xff]  ;;  %v6989_v2 = vld [vmem:[#allocation78_spill] sm:$0xff] }
 0x1eb   : > { %1463 = vmatpush2.msra.mxu1 %v6979_v26  ;;  %v6992_v26 = vmov 0.0  }
 0x1ec   : > { %1464 = vmatprep.subr.mxu1 %v6980_v23 }
 0x1ed   : > { %1465 = vmatpush2.msra.mxu1 %v6981_v22  ;;  %v5382_v22 = vld [vmem:[%s6602_s5 + $0xf8] sm:$0xff] }
 0x1ee   : > { %1466 = vmatprep.subr.mxu1 %v6982_v21  ;;  %6990 = vst [vmem:[#allocation139_spill] sm:$0xff] %v5382_v22 }
 0x1ef   : > { %1467 = vmatpush2.msra.mxu1 %v6983_v24 }
 0x1f0   : > { %1468 = vmatprep.subr.mxu1 %v6984_v27 }
 0x1f1   : > { %1469 = vmatpush2.msra.mxu1 %v6985_v29 }
 0x1f2   : > { %1470 = vmatprep.subr.mxu1 %v6986_v28 }
 0x1f3   : > { %1471 = vmatpush2.msra.mxu1 %v6987_v31 }
 0x1f4   : > { %1472 = vmatprep.subr.mxu1 %v6988_v25 }
 0x1f5   : > { %1473 = vmatpush2.msra.mxu1 %v6989_v2  ;;  %v6991_v2 = vld [vmem:[#allocation79_spill] sm:$0xff] }
 0x1f6   : > { %1576 = vmatprep.subr.mxu1 %v5382_v22 }
 0x20e   : > { %v1326_v24 = vpop.permute.xlu0 %1325 }
 0x20f   : > { %v3587_v21 = vpop.permute.xlu1 %3586 }
 0x210   : > { %v3589_v27 = vunpack.i.h.bf16 %v3587_v21  ;;  %v3588_v23 = vunpack.i.l.bf16 %v3587_v21 }
 0x212   : > { %v1330_v29 = vsel %vm446_vm3, %v3588_v23, %v3589_v27  ;;  %v5387_v25 = vpop.permute.xlu0 %3591 }
 0x213   : > { %1403 = vmatprep.mubr.f32.mxu0 %v1330_v29  ;;  %v1320_v28 = vpop.permute.xlu1 %1319  ;;  %v3594_v21 = vunpack.i.h.bf16 %v5387_v25  ;;  %v6994_v29 = vld [vmem:[#allocation81_spill] sm:$0xff] }
 0x214   : > { %v1329_v31 = vsel %vm446_vm3, %v1320_v28, %v3588_v23  ;;  %v6995_v28 = vld [vmem:[#allocation82_spill] sm:$0xff] }
 0x215   : > { %1404 = vmatmul.mubr.f32.vlgmr.msra.gmra.mxu0 %v1329_v31  ;;  %v1331_v31 = vsel %vm446_vm3, %v3589_v27, %v1326_v24 }
 0x216   : > { %3204 = vmatpush1.msk.msra.mxu0 %vm1095_vm0, %v6991_v2  ;;  %1545 = vmatprep.mubr.f32.mxu0 %v6992_v26  ;;  %v6996_v2 = vld [vmem:[#allocation83_spill] sm:$0xff]  ;;  %v6997_v26 = vld [vmem:[#allocation84_spill] sm:$0xff] }
 0x217   : > { %1483 = vmatprep.subr.mxu0 %v6993_v20  ;;  %v5393_v22 = vpop.permute.xlu1 %1327  ;;  %v5407_v20 = vld [vmem:[%s6602_s5 + $0xf0] sm:$0xff] }
 0x218   : > { %1484 = vmatpush1.msra.mxu0 %v6994_v29  ;;  %v1332_v23 = vsel %vm446_vm3, %v1326_v24, %v5393_v22  ;;  %6998 = vst [vmem:[#allocation140_spill] sm:$0xff] %v5407_v20  ;;  %v6999_v29 = vld [vmem:[#allocation85_spill] sm:$0xff]  ;;  %v7001_v24 = vunpack.i.l.bf16 %v5387_v25 }
 0x219   : > { %1485 = vmatprep.subr.mxu0 %v6995_v28  ;;  %1474 = vmatprep.mubr.f32.mxu1 %v1332_v23  ;;  %v7000_v28 = vld [vmem:[#allocation94_spill] sm:$0xff] }
 0x21a   : > { %1486 = vmatpush1.msra.mxu0 %v6996_v2  ;;  %1475 = vmatmul.mubr.f32.vlgmr.msra.gmra.mxu1 %v1331_v31  ;;  %v1566_v27 = vsel %vm482_vm8, %v7001_v24, %v3594_v21  ;;  %v7002_v31 = vld [vmem:[#allocation86_spill] sm:$0xff]  ;;  %v7004_v2 = vld [vmem:[#allocation87_spill] sm:$0xff] }
 0x21b   : > { %1487 = vmatprep.subr.mxu0 %v6997_v26  ;;  %1577 = vmatpush1.msra.mxu1 %v5407_v20  ;;  %v5410_v19 = vpop.permute.xlu1 %3596  ;;  %v7003_v26 = vld [vmem:[#allocation96_spill] sm:$0xff]  ;;  %v7007_v24 = vld [vmem:[#allocation90_spill] sm:$0xff] }
 0x21c   : > { %1488 = vmatpush1.msra.mxu0 %v6999_v29  ;;  %v3599_v23 = vunpack.i.h.bf16 %v5410_v19  ;;  %1578 = vmatprep.subr.mxu1 %v7000_v28  ;;  %v7005_v29 = vld [vmem:[#allocation88_spill] sm:$0xff]  ;;  %v7006_v28 = vld [vmem:[#allocation89_spill] sm:$0xff] }
 0x21d   : > { %1640 = vmatprep.mubr.f32.mxu1 %v1566_v27  ;;  %1489 = vmatprep.subr.mxu0 %v7002_v31  ;;  %v7008_v27 = vld [vmem:[#allocation91_spill] sm:$0xff] }
 0x21e   : > { %1579 = vmatpush1.msra.mxu1 %v7003_v26  ;;  %1490 = vmatpush1.msra.mxu0 %v7004_v2  ;;  %v5422_v20 = vsel %vm482_vm8, %v3594_v21, %v3599_v23  ;;  %v7009_v21 = vld [vmem:[#allocation92_spill] sm:$0xff] }
 0x21f   : > { %1580 = vmatprep.subr.mxu1 %v4901_v35  ;;  %1491 = vmatprep.subr.mxu0 %v7005_v29  ;;  %v7010_v35 = vld [vmem:[#allocation93_spill] sm:$0xff] }
 0x220   : > { %1581 = vmatpush1.msra.mxu1 %v4916_v0  ;;  %1492 = vmatpush1.msra.mxu0 %v7006_v28  ;;  %v7011_v0 = vld [vmem:[#allocation95_spill] sm:$0xff] }
 0x221   : > { %1582 = vmatprep.subr.mxu1 %v4942_v39  ;;  %1493 = vmatprep.subr.mxu0 %v7007_v24  ;;  %v7012_v39 = vld [vmem:[#allocation97_spill] sm:$0xff] }
 0x222   : > { %1583 = vmatpush1.msra.mxu1 %v4954_v5  ;;  %1494 = vmatpush1.msra.mxu0 %v7008_v27  ;;  %v7013_v5 = vld [vmem:[#allocation98_spill] sm:$0xff] }
 0x223   : > { %1584 = vmatprep.subr.mxu1 %v4981_v36  ;;  %1495 = vmatprep.subr.mxu0 %v7009_v21  ;;  %v7014_v36 = vld [vmem:[#allocation99_spill] sm:$0xff] }
 0x224   : > { %1585 = vmatpush1.msra.mxu1 %v4993_v37  ;;  %1496 = vmatpush1.msra.mxu0 %v7010_v35  ;;  %v7015_v37 = vld [vmem:[#allocation101_spill] sm:$0xff] }
 0x225   : > { %1586 = vmatprep.subr.mxu1 %v5020_v3  ;;  %1497 = vmatprep.subr.mxu0 %v7011_v0  ;;  %v7016_v3 = vld [vmem:[#allocation103_spill] sm:$0xff] }
 0x226   : > { %1587 = vmatpush1.msra.mxu1 %v5027_v32  ;;  %1498 = vmatpush1.msra.mxu0 %v7012_v39  ;;  %v7017_v32 = vld [vmem:[#allocation104_spill] sm:$0xff] }
 0x227   : > { %1588 = vmatprep.subr.mxu1 %v5034_v34  ;;  %1499 = vmatprep.subr.mxu0 %v7013_v5  ;;  %v7018_v34 = vld [vmem:[#allocation105_spill] sm:$0xff] }
 0x228   : > { %1589 = vmatpush1.msra.mxu1 %v5047_v33  ;;  %1500 = vmatpush1.msra.mxu0 %v7014_v36  ;;  %v7019_v33 = vld [vmem:[#allocation107_spill] sm:$0xff] }
 0x229   : > { %1590 = vmatprep.subr.mxu1 %v5054_v30  ;;  %1501 = vmatprep.subr.mxu0 %v7015_v37  ;;  %v7020_v30 = vld [vmem:[#allocation109_spill] sm:$0xff] }
 0x22a   : > { %1591 = vmatpush1.msra.mxu1 %v5061_v6  ;;  %1502 = vmatpush1.msra.mxu0 %v7016_v3  ;;  %v7021_v6 = vld [vmem:[#allocation110_spill] sm:$0xff] }
 0x22b   : > { %1592 = vmatprep.subr.mxu1 %v5068_v43  ;;  %1503 = vmatprep.subr.mxu0 %v7017_v32 }
 0x22c   : > { %1593 = vmatpush1.msra.mxu1 %v5075_v44  ;;  %1504 = vmatpush1.msra.mxu0 %v7018_v34  ;;  %v7022_v44 = vld [vmem:[#allocation112_spill] sm:$0xff] }
 0x22d   : > { %1594 = vmatprep.subr.mxu1 %v5082_v45  ;;  %1505 = vmatprep.subr.mxu0 %v7019_v33 }
 0x22e   : > { %1595 = vmatpush1.msra.mxu1 %v5089_v46  ;;  %1506 = vmatpush1.msra.mxu0 %v7020_v30  ;;  %v7023_v46 = vld [vmem:[#allocation114_spill] sm:$0xff] }
 0x22f   : > { %1596 = vmatprep.subr.mxu1 %v5096_v47  ;;  %1507 = vmatprep.subr.mxu0 %v7021_v6  ;;  %v7024_v47 = vld [vmem:[#allocation115_spill] sm:$0xff] }
 0x230   : > { %1597 = vmatpush1.msra.mxu1 %v5103_v48  ;;  %1508 = vmatpush1.msra.mxu0 %v4976_v41 }
 0x231   : > { %1598 = vmatprep.subr.mxu1 %v5110_v49  ;;  %1509 = vmatprep.subr.mxu0 %v7022_v44  ;;  %v5471_v49 = vpop.permute.xlu0 %1561 }
 0x232   : > { %1599 = vmatpush1.msra.mxu1 %v5117_v50  ;;  %1510 = vmatpush1.msra.mxu0 %v5001_v38 }
 0x233   : > { %1600 = vmatprep.subr.mxu1 %v5124_v51  ;;  %1511 = vmatprep.subr.mxu0 %v7023_v46 }
 0x234   : > { %1601 = vmatpush1.msra.mxu1 %v5131_v52  ;;  %1512 = vmatpush1.msra.mxu0 %v7024_v47  ;;  %v1568_v52 = vsel %vm482_vm8, %v3599_v23, %v5471_v49  ;;  %v7032_v23 = vld [vmem:[#allocation16_spill] sm:$0xff] }
 0x235   : > { %1602 = vmatprep.subr.mxu1 %v5138_v53  ;;  %3205 = vmatmul.mubr.msk.f32.vlgmr.msra.gmra.mxu0 %vm446_vm3, %v5393_v22  ;;  %v7025_v53 = vld [vmem:[#allocation9_spill] sm:$0xff]  ;;  %v7026_v22 = vld [vmem:[#allocation10_spill] sm:$0xff] }
 0x236   : > { %1603 = vmatpush1.msra.mxu1 %v5145_v54  ;;  %1647 = vmatprep.subr.mxu0 %v4315_v40  ;;  %v7027_v54 = vld [vmem:[#allocation11_spill] sm:$0xff]  ;;  %v7028_v40 = vld [vmem:[#allocation12_spill] sm:$0xff] }
 0x237   : > { %1604 = vmatprep.subr.mxu1 %v5152_v55  ;;  %1648 = vmatpush1.msra.mxu0 %v4320_v42  ;;  %v7029_v42 = vld [vmem:[#allocation13_spill] sm:$0xff] }
 0x238   : > { %1711 = vmatprep.mubr.f32.mxu0 %v1568_v52  ;;  %1605 = vmatpush1.msra.mxu1 %v5159_v56  ;;  %v7030_v52 = vld [vmem:[#allocation14_spill] sm:$0xff] }
 0x239   : > { %1649 = vmatprep.subr.mxu0 %v7025_v53  ;;  %1606 = vmatprep.subr.mxu1 %v5166_v57  ;;  %v7031_v53 = vld [vmem:[#allocation15_spill] sm:$0xff] }
 0x23a   : > { %1650 = vmatpush1.msra.mxu0 %v7026_v22  ;;  %1607 = vmatpush1.msra.mxu1 %v5173_v58  ;;  %v7034_v22 = vld [vmem:[#allocation18_spill] sm:$0xff] }
 0x23b   : > { %1651 = vmatprep.subr.mxu0 %v7027_v54  ;;  %1608 = vmatprep.subr.mxu1 %v5180_v59  ;;  %v7033_v54 = vld [vmem:[#allocation17_spill] sm:$0xff] }
 0x23c   : > { %1652 = vmatpush1.msra.mxu0 %v7028_v40  ;;  %1609 = vmatpush2.msra.mxu1 %v5187_v60  ;;  %v7035_v40 = vld [vmem:[#allocation19_spill] sm:$0xff] }
 0x23d   : > { %1653 = vmatprep.subr.mxu0 %v7029_v42  ;;  %1610 = vmatprep.subr.mxu1 %v5194_v61  ;;  %v7036_v42 = vld [vmem:[#allocation20_spill] sm:$0xff] }
 0x23e   : > { %1654 = vmatpush1.msra.mxu0 %v7030_v52  ;;  %1611 = vmatpush2.msra.mxu1 %v5201_v62  ;;  %v7037_v52 = vld [vmem:[#allocation21_spill] sm:$0xff] }
 0x23f   : > { %1655 = vmatprep.subr.mxu0 %v7031_v53  ;;  %1612 = vmatprep.subr.mxu1 %v5208_v63  ;;  %v7038_v53 = vld [vmem:[#allocation22_spill] sm:$0xff] }
 0x240   : > { %1656 = vmatpush1.msra.mxu0 %v7032_v23  ;;  %1613 = vmatpush2.msra.mxu1 %v5215_v1  ;;  %v7039_v23 = vld [vmem:[#allocation23_spill] sm:$0xff] }
 0x241   : > { %1657 = vmatprep.subr.mxu0 %v7033_v54  ;;  %1614 = vmatprep.subr.mxu1 %v5222_v4  ;;  %v7040_v54 = vld [vmem:[#allocation24_spill] sm:$0xff] }
 0x242   : > { %1658 = vmatpush1.msra.mxu0 %v7034_v22  ;;  %1615 = vmatpush2.msra.mxu1 %v5229_v7  ;;  %v7041_v22 = vld [vmem:[#allocation25_spill] sm:$0xff] }
 0x243   : > { %1659 = vmatprep.subr.mxu0 %v7035_v40  ;;  %1616 = vmatprep.subr.mxu1 %v5236_v8  ;;  %v7042_v40 = vld [vmem:[#allocation26_spill] sm:$0xff] }
 0x244   : > { %1660 = vmatpush1.msra.mxu0 %v7036_v42  ;;  %1617 = vmatpush2.msra.mxu1 %v5243_v9  ;;  %v7043_v42 = vld [vmem:[#allocation27_spill] sm:$0xff] }
 0x245   : > { %1661 = vmatprep.subr.mxu0 %v7037_v52  ;;  %1618 = vmatprep.subr.mxu1 %v5250_v10  ;;  %v7044_v52 = vld [vmem:[#allocation28_spill] sm:$0xff] }
 0x246   : > { %1662 = vmatpush1.msra.mxu0 %v7038_v53  ;;  %1619 = vmatpush2.msra.mxu1 %v5257_v11  ;;  %v7045_v53 = vld [vmem:[#allocation29_spill] sm:$0xff] }
 0x247   : > { %1663 = vmatprep.subr.mxu0 %v7039_v23  ;;  %1620 = vmatprep.subr.mxu1 %v5264_v12  ;;  %v7046_v23 = vld [vmem:[#allocation30_spill] sm:$0xff] }
 0x248   : > { %1664 = vmatpush1.msra.mxu0 %v7040_v54  ;;  %1621 = vmatpush2.msra.mxu1 %v5271_v13  ;;  %v7047_v54 = vld [vmem:[#allocation133_spill] sm:$0xff] }
 0x249   : > { %1665 = vmatprep.subr.mxu0 %v7041_v22  ;;  %1622 = vmatprep.subr.mxu1 %v5278_v14  ;;  %v7048_v22 = vld [vmem:[#allocation31_spill] sm:$0xff] }
 0x24a   : > { %1666 = vmatpush1.msra.mxu0 %v7042_v40  ;;  %1623 = vmatpush2.msra.mxu1 %v5285_v15  ;;  %v7049_v40 = vld [vmem:[#allocation134_spill] sm:$0xff]  ;;  %v7050_v15 = vld [vmem:[#allocation32_spill] sm:$0xff] }
 0x24b   : > { %1667 = vmatprep.subr.mxu0 %v7043_v42  ;;  %1624 = vmatprep.subr.mxu1 %v5292_v16  ;;  %v7051_v42 = vld [vmem:[#allocation135_spill] sm:$0xff]  ;;  %v7052_v16 = vld [vmem:[#allocation33_spill] sm:$0xff] }
 0x24c   : > { %1668 = vmatpush1.msra.mxu0 %v7044_v52  ;;  %1625 = vmatpush2.msra.mxu1 %v5299_v17  ;;  %v7053_v52 = vld [vmem:[#allocation136_spill] sm:$0xff]  ;;  %v7054_v17 = vld [vmem:[#allocation34_spill] sm:$0xff] }
 0x24d   : > { %1669 = vmatprep.subr.mxu0 %v7045_v53  ;;  %1626 = vmatprep.subr.mxu1 %v5306_v18  ;;  %v7055_v53 = vld [vmem:[#allocation137_spill] sm:$0xff]  ;;  %v7056_v18 = vld [vmem:[#allocation35_spill] sm:$0xff] }
 0x24e   : > { %1670 = vmatpush1.msra.mxu0 %v7046_v23  ;;  %1627 = vmatpush2.msra.mxu1 %v7047_v54  ;;  %v7057_v23 = vld [vmem:[#allocation138_spill] sm:$0xff]  ;;  %v7058_v54 = vld [vmem:[#allocation36_spill] sm:$0xff] }
 0x24f   : > { %1671 = vmatprep.subr.mxu0 %v7048_v22  ;;  %1628 = vmatprep.subr.mxu1 %v7049_v40  ;;  %v7059_v22 = vld [vmem:[#allocation55_spill] sm:$0xff]  ;;  %v7060_v40 = vld [vmem:[#allocation37_spill] sm:$0xff] }
 0x250   : > { %1672 = vmatpush1.msra.mxu0 %v7050_v15  ;;  %1629 = vmatpush2.msra.mxu1 %v7051_v42  ;;  %v7061_v15 = vld [vmem:[#allocation57_spill] sm:$0xff]  ;;  %v7062_v42 = vld [vmem:[#allocation38_spill] sm:$0xff] }
 0x251   : > { %1673 = vmatprep.subr.mxu0 %v7052_v16  ;;  %1630 = vmatprep.subr.mxu1 %v7053_v52  ;;  %v3598_v16 = vunpack.i.l.bf16 %v5410_v19  ;;  %v7063_v52 = vld [vmem:[#allocation59_spill] sm:$0xff]  ;;  %v7072_v19 = vunpack.i.l.bf16 %v5387_v25 }
 0x252   : > { %1674 = vmatpush1.msra.mxu0 %v7054_v17  ;;  %1631 = vmatpush2.msra.mxu1 %v7055_v53  ;;  %v7064_v17 = vld [vmem:[#allocation39_spill] sm:$0xff]  ;;  %v7065_v53 = vld [vmem:[#allocation61_spill] sm:$0xff] }
 0x253   : > { %1675 = vmatprep.subr.mxu0 %v7056_v18  ;;  %1632 = vmatprep.subr.mxu1 %v7057_v23  ;;  %v7066_v18 = vld [vmem:[#allocation40_spill] sm:$0xff]  ;;  %v7067_v23 = vld [vmem:[#allocation63_spill] sm:$0xff] }
 0x254   : > { %1676 = vmatpush1.msra.mxu0 %v7058_v54  ;;  %1633 = vmatpush2.msra.mxu1 %v7059_v22  ;;  %v7068_v54 = vld [vmem:[#allocation41_spill] sm:$0xff]  ;;  %v7080_v25 = vld [vmem:[#allocation47_spill] sm:$0xff] }
 0x255   : > { %1677 = vmatprep.subr.mxu0 %v7060_v40  ;;  %1634 = vmatprep.subr.mxu1 %v7061_v15  ;;  %v7069_v22 = vld [vmem:[#allocation65_spill] sm:$0xff]  ;;  %v7070_v40 = vld [vmem:[#allocation42_spill] sm:$0xff]  ;;  %v7071_v15 = vld [vmem:[#allocation67_spill] sm:$0xff] }
 0x256   : > { %1678 = vmatpush1.msra.mxu0 %v7062_v42  ;;  %1635 = vmatpush2.msra.mxu1 %v7063_v52  ;;  %v1565_v42 = vsel %vm482_vm8, %v3598_v16, %v7072_v19  ;;  %v7073_v52 = vld [vmem:[#allocation43_spill] sm:$0xff]  ;;  %v7081_v16 = vld [vmem:[#allocation81_spill] sm:$0xff] }
 0x257   : > { %1679 = vmatprep.subr.mxu0 %v7064_v17  ;;  %1636 = vmatprep.subr.mxu1 %v7065_v53  ;;  %v7074_v53 = vld [vmem:[#allocation44_spill] sm:$0xff]  ;;  %v7075_v17 = vld [vmem:[#allocation70_spill] sm:$0xff]  ;;  %v7084_v19 = vld [vmem:[#allocation49_spill] sm:$0xff] }
 0x258   : > { %1680 = vmatpush2.msra.mxu0 %v7066_v18  ;;  %1637 = vmatpush2.msra.mxu1 %v7067_v23  ;;  %v7076_v23 = vld [vmem:[#allocation45_spill] sm:$0xff]  ;;  %v7077_v18 = vld [vmem:[#allocation79_spill] sm:$0xff] }
 0x259   : > { %1681 = vmatprep.subr.mxu0 %v7068_v54  ;;  %1638 = vmatprep.subr.mxu1 %v7069_v22  ;;  %v7078_v54 = vld [vmem:[#allocation46_spill] sm:$0xff]  ;;  %v7079_v22 = vld [vmem:[#allocation80_spill] sm:$0xff] }
 0x25a   : > { %1682 = vmatpush2.msra.mxu0 %v7070_v40  ;;  %1639 = vmatpush2.msra.mxu1 %v7071_v15  ;;  %v7082_v40 = vld [vmem:[#allocation48_spill] sm:$0xff]  ;;  %v7083_v15 = vld [vmem:[#allocation82_spill] sm:$0xff] }
 0x25b   : > { %1683 = vmatprep.subr.mxu0 %v7073_v52  ;;  %1641 = vmatmul.mubr.f32.vlgmr.msra.gmra.mxu1 %v1565_v42  ;;  %v7085_v42 = vld [vmem:[#allocation83_spill] sm:$0xff]  ;;  %v7086_v52 = vld [vmem:[#allocation50_spill] sm:$0xff] }
 0x25c   : > { %1684 = vmatpush2.msra.mxu0 %v7074_v53  ;;  %3206 = vmatprep.subr.msk.mxu1 %vm1095_vm0, %v7075_v17  ;;  %v7087_v53 = vld [vmem:[#allocation84_spill] sm:$0xff]  ;;  %v7088_v17 = vld [vmem:[#allocation51_spill] sm:$0xff] }
 0x25d   : > { %1685 = vmatprep.subr.mxu0 %v7076_v23  ;;  %3207 = vmatpush1.msk.msra.mxu1 %vm1095_vm0, %v7077_v18  ;;  %v7089_v23 = vld [vmem:[#allocation85_spill] sm:$0xff]  ;;  %v7090_v18 = vld [vmem:[#allocation52_spill] sm:$0xff] }
 0x25e   : > { %1686 = vmatpush2.msra.mxu0 %v7078_v54  ;;  %1720 = vmatprep.subr.mxu1 %v7079_v22  ;;  %v7091_v54 = vld [vmem:[#allocation53_spill] sm:$0xff]  ;;  %v7092_v22 = vld [vmem:[#allocation54_spill] sm:$0xff] }
 0x25f   : > { %1687 = vmatprep.subr.mxu0 %v7080_v25  ;;  %1721 = vmatpush1.msra.mxu1 %v7081_v16  ;;  %v7093_v25 = vld [vmem:[#allocation56_spill] sm:$0xff]  ;;  %v7094_v16 = vld [vmem:[#allocation58_spill] sm:$0xff] }
 0x260   : > { %1688 = vmatpush2.msra.mxu0 %v7082_v40  ;;  %1722 = vmatprep.subr.mxu1 %v7083_v15  ;;  %v7095_v40 = vld [vmem:[#allocation60_spill] sm:$0xff] }
 0x261   : > { %1689 = vmatprep.subr.mxu0 %v7084_v19  ;;  %1723 = vmatpush1.msra.mxu1 %v7085_v42  ;;  %v7102_v15 = vld [vmem:[#allocation72_spill] sm:$0xff] }
 0x262   : > { %1690 = vmatpush2.msra.mxu0 %v7086_v52  ;;  %1724 = vmatprep.subr.mxu1 %v7087_v53  ;;  %v7106_v42 = vld [vmem:[#allocation76_spill] sm:$0xff]  ;;  %v7108_v52 = vld [vmem:[#allocation78_spill] sm:$0xff] }
 0x263   : > { %1691 = vmatprep.subr.mxu0 %v7088_v17  ;;  %1725 = vmatpush1.msra.mxu1 %v7089_v23  ;;  %v7114_v53 = vld [vmem:[#allocation102_spill] sm:$0xff]  ;;  %v7116_v17 = vld [vmem:[#allocation108_spill] sm:$0xff] }
 0x264   : > { %1692 = vmatpush2.msra.mxu0 %v7090_v18  ;;  %1726 = vmatprep.subr.mxu1 %v7002_v31  ;;  %v7096_v31 = vld [vmem:[#allocation62_spill] sm:$0xff]  ;;  %v7117_v18 = vld [vmem:[#allocation111_spill] sm:$0xff] }
 0x265   : > { %1693 = vmatprep.subr.mxu0 %v7091_v54  ;;  %1727 = vmatpush1.msra.mxu1 %v7004_v2  ;;  %v7097_v2 = vld [vmem:[#allocation64_spill] sm:$0xff]  ;;  %v3665_v23 = vld [vmem:[%s6602_s5 + $0x2e8] sm:$0xff]  ;;  %v3666_v54 = vld [vmem:[%s6602_s5 + $0x2e0] sm:$0xff] }
 0x266   : > { %1694 = vmatpush2.msra.mxu0 %v7092_v22  ;;  %1728 = vmatprep.subr.mxu1 %v7005_v29  ;;  %v7098_v29 = vld [vmem:[#allocation66_spill] sm:$0xff]  ;;  %v7118_v22 = vld [vmem:[#allocation113_spill] sm:$0xff] }
 0x267   : > { %1695 = vmatprep.subr.mxu0 %v7093_v25  ;;  %1729 = vmatpush1.msra.mxu1 %v7006_v28  ;;  %v7099_v28 = vld [vmem:[#allocation68_spill] sm:$0xff] }
 0x268   : > { %1696 = vmatpush2.msra.mxu0 %v7094_v16  ;;  %1730 = vmatprep.subr.mxu1 %v7007_v24  ;;  %v7100_v24 = vld [vmem:[#allocation69_spill] sm:$0xff]  ;;  %v7119_v16 = vld [vmem:[#allocation116_spill] sm:$0xff] }
 0x269   : > { %1697 = vmatprep.subr.mxu0 %v7095_v40  ;;  %1731 = vmatpush1.msra.mxu1 %v7008_v27  ;;  %v7101_v27 = vld [vmem:[#allocation71_spill] sm:$0xff]  ;;  %v3667_v25 = vld [vmem:[%s6602_s5 + $0x2d8] sm:$0xff] }
 0x26a   : > { %1698 = vmatpush2.msra.mxu0 %v7096_v31  ;;  %1732 = vmatprep.subr.mxu1 %v7009_v21  ;;  %v1564_v21 = vpop.permute.xlu1 %1563  ;;  %v3668_v40 = vld [vmem:[%s6602_s5 + $0x2d0] sm:$0xff]  ;;  %v7120_v31 = vld [vmem:[#allocation117_spill] sm:$0xff] }
 0x26b   : > { %1699 = vmatprep.subr.mxu0 %v7097_v2  ;;  %1733 = vmatpush1.msra.mxu1 %v7010_v35  ;;  %v5597_v35 = vpop.permute.xlu0 %3601  ;;  %v3669_v2 = vld [vmem:[%s6602_s5 + $0x2c8] sm:$0xff] }
 0x26c   : > { %1700 = vmatpush2.msra.mxu0 %v7098_v29  ;;  %1734 = vmatprep.subr.mxu1 %v7011_v0  ;;  %v7103_v0 = vld [vmem:[#allocation73_spill] sm:$0xff]  ;;  %v3603_v19 = vunpack.i.l.bf16 %v5597_v35  ;;  %v7121_v29 = vld [vmem:[#allocation118_spill] sm:$0xff] }
 0x26d   : > { %1701 = vmatprep.subr.mxu0 %v7099_v28  ;;  %1735 = vmatpush1.msra.mxu1 %v7012_v39  ;;  %v7104_v39 = vld [vmem:[#allocation74_spill] sm:$0xff] }
 0x26e   : > { %1702 = vmatpush2.msra.mxu0 %v7100_v24  ;;  %1736 = vmatprep.subr.mxu1 %v7013_v5  ;;  %v7105_v5 = vld [vmem:[#allocation75_spill] sm:$0xff]  ;;  %v3670_v28 = vld [vmem:[%s6602_s5 + $0x2c0] sm:$0xff] }
 0x26f   : > { %1703 = vmatprep.subr.mxu0 %v7101_v27  ;;  %1737 = vmatpush1.msra.mxu1 %v7014_v36  ;;  %v3604_v36 = vunpack.i.h.bf16 %v5597_v35  ;;  %v7122_v24 = vld [vmem:[#allocation119_spill] sm:$0xff]  ;;  %v3671_v27 = vld [vmem:[%s6602_s5 + $0x2b8] sm:$0xff] }
 0x270   : > { %1704 = vmatpush2.msra.mxu0 %v7102_v15  ;;  %1738 = vmatprep.subr.mxu1 %v7015_v37  ;;  %v7107_v37 = vld [vmem:[#allocation77_spill] sm:$0xff]  ;;  %v3672_v15 = vld [vmem:[%s6602_s5 + $0x2b0] sm:$0xff]  ;;  %v3740_v35 = vld [vmem:[%s6602_s5 + $0x4c8] sm:$0xff] }
 0x271   : > { %1705 = vmatprep.subr.mxu0 %v7103_v0  ;;  %1739 = vmatpush1.msra.mxu1 %v7016_v3  ;;  %v5611_v3 = vpop.permute.xlu1 %1789  ;;  %v7124_v0 = vld [vmem:[#allocation121_spill] sm:$0xff] }
 0x272   : > { %1706 = vmatpush2.msra.mxu0 %v7104_v39  ;;  %1740 = vmatprep.subr.mxu1 %v7017_v32  ;;  %v7111_v32 = vld [vmem:[#allocation94_spill] sm:$0xff] }
 0x273   : > { %1707 = vmatprep.subr.mxu0 %v7105_v5  ;;  %1741 = vmatpush1.msra.mxu1 %v7018_v34  ;;  %v7109_v34 = vld [vmem:[#allocation139_spill] sm:$0xff]  ;;  %v3674_v5 = vld [vmem:[%s6602_s5 + $0x2a0] sm:$0xff] }
 0x274   : > { %1708 = vmatpush2.msra.mxu0 %v7106_v42  ;;  %1742 = vmatprep.subr.mxu1 %v7019_v33  ;;  %v1802_v33 = vsel %vm491_vm11, %v3603_v19, %v3604_v36  ;;  %v3673_v39 = vld [vmem:[%s6602_s5 + $0x2a8] sm:$0xff] }
 0x275   : > { %1709 = vmatprep.subr.mxu0 %v7107_v37  ;;  %1743 = vmatpush1.msra.mxu1 %v7020_v30  ;;  %v7110_v30 = vld [vmem:[#allocation140_spill] sm:$0xff]  ;;  %v7125_v42 = vld [vmem:[#allocation122_spill] sm:$0xff] }
 0x276   : > { %1710 = vmatpush2.msra.mxu0 %v7108_v52  ;;  %1744 = vmatprep.subr.mxu1 %v7021_v6  ;;  %v7113_v6 = vld [vmem:[#allocation100_spill] sm:$0xff] }
 0x277   : > { %1712 = vmatmul.mubr.f32.vlgmr.msra.gmra.mxu0 %v5422_v20  ;;  %1745 = vmatpush1.msra.mxu1 %v4976_v41  ;;  %v5631_v20 = vpop.permute.xlu1 %1797  ;;  %v7112_v41 = vmov 0.0   ;;  %v3675_v37 = vld [vmem:[%s6602_s5 + $0x298] sm:$0xff]  ;;  %v3676_v52 = vld [vmem:[%s6602_s5 + $0x290] sm:$0xff] }
 0x278   : > { %1812 = vmatprep.subr.mxu0 %v7109_v34  ;;  %1746 = vmatprep.subr.mxu1 %v7022_v44  ;;  %v1569_v44 = vsel %vm482_vm8, %v5471_v49, %v1564_v21  ;;  %v7115_v49 = vld [vmem:[#allocation106_spill] sm:$0xff]  ;;  %v7123_v21 = vld [vmem:[#allocation120_spill] sm:$0xff]  ;;  %vm2155_vm8 = vcmask 629760  }
 0x279   : > { %1813 = vmatpush1.msra.mxu0 %v7110_v30  ;;  %1876 = vmatprep.mubr.f32.mxu0 %v1802_v33  ;;  %v3677_v34 = vld [vmem:[%s6602_s5 + $0x288] sm:$0xff]  ;;  %v7127_v33 = vld [vmem:[#allocation124_spill] sm:$0xff]  ;;  %v3678_v30 = vld [vmem:[%s6602_s5 + $0x280] sm:$0xff] }
 0x27a   : > { %1747 = vmatpush1.msra.mxu1 %v5001_v38  ;;  %1814 = vmatprep.subr.mxu0 %v7111_v32  ;;  %v5637_v38 = vpop.permute.xlu0 %1795  ;;  %v7128_v32 = vld [vmem:[#allocation125_spill] sm:$0xff] }
 0x27b   : > { %1748 = vmatprep.subr.mxu1 %v7023_v46  ;;  %1815 = vmatpush1.msra.mxu0 %v7003_v26  ;;  %v3663_v46 = vld [vmem:[%s6602_s5 + $0x2f8] sm:$0xff]  ;;  %v1804_v26 = vsel %vm491_vm11, %v5637_v38, %v5631_v20 }
 0x27c   : > { %1749 = vmatpush1.msra.mxu1 %v7024_v47  ;;  %1782 = vmatprep.mubr.f32.mxu1 %v7112_v41  ;;  %v3664_v47 = vld [vmem:[%s6602_s5 + $0x2f0] sm:$0xff] }
 0x27d   : > { %1816 = vmatprep.subr.mxu0 %v7113_v6  ;;  %3208 = vmatmul.mubr.msk.f32.vlgmr.msra.gmra.mxu1 %vm446_vm3, %v1569_v44  ;;  %v3680_v44 = vld [vmem:[%s6602_s5 + $0x270] sm:$0xff]  ;;  %v3681_v6 = vld [vmem:[%s6602_s5 + $0x268] sm:$0xff] }
 0x27e   : > { %1817 = vmatpush1.msra.mxu0 %v7114_v53  ;;  %1883 = vmatprep.subr.mxu1 %v3663_v46  ;;  %v7129_v53 = vld [vmem:[#allocation126_spill] sm:$0xff]  ;;  %v3683_v46 = vld [vmem:[%s6602_s5 + $0x258] sm:$0xff] }
 0x27f   : > { %1818 = vmatprep.subr.mxu0 %v7115_v49  ;;  %1884 = vmatpush1.msra.mxu1 %v3664_v47  ;;  %v3684_v49 = vld [vmem:[%s6602_s5 + $0x250] sm:$0xff]  ;;  %v3685_v47 = vld [vmem:[%s6602_s5 + $0x248] sm:$0xff] }
 0x280   : > { %1947 = vmatprep.mubr.f32.mxu1 %v1804_v26  ;;  %1819 = vmatpush1.msra.mxu0 %v7116_v17  ;;  %v3686_v26 = vld [vmem:[%s6602_s5 + $0x240] sm:$0xff]  ;;  %v3687_v17 = vld [vmem:[%s6602_s5 + $0x238] sm:$0xff] }
 0x281   : > { %1885 = vmatprep.subr.mxu1 %v3665_v23  ;;  %1820 = vmatprep.subr.mxu0 %v7117_v18  ;;  %v3688_v23 = vld [vmem:[%s6602_s5 + $0x230] sm:$0xff]  ;;  %v3705_v18 = vld [vmem:[%s6602_s5 + $0x3a8] sm:$0xff] }
 0x282   : > { %1886 = vmatpush1.msra.mxu1 %v3666_v54  ;;  %1821 = vmatpush1.msra.mxu0 %v7118_v22  ;;  %v3706_v54 = vld [vmem:[%s6602_s5 + $0x3a0] sm:$0xff]  ;;  %v3707_v22 = vld [vmem:[%s6602_s5 + $0x398] sm:$0xff] }
 0x283   : > { %1887 = vmatprep.subr.mxu1 %v3667_v25  ;;  %1822 = vmatprep.subr.mxu0 %v7119_v16  ;;  %v7135_v25 = vld [vmem:[#allocation132_spill] sm:$0xff] }
 0x284   : > { %1888 = vmatpush1.msra.mxu1 %v3668_v40  ;;  %1823 = vmatpush1.msra.mxu0 %v7120_v31  ;;  %v3708_v16 = vld [vmem:[%s6602_s5 + $0x390] sm:$0xff]  ;;  %v7136_v40 = vld [vmem:[#allocation133_spill] sm:$0xff]  ;;  %v3709_v31 = vld [vmem:[%s6602_s5 + $0x388] sm:$0xff] }
 0x285   : > { %1889 = vmatprep.subr.mxu1 %v3669_v2  ;;  %1824 = vmatprep.subr.mxu0 %v7121_v29  ;;  %v7137_v2 = vld [vmem:[#allocation134_spill] sm:$0xff] }
 0x286   : > { %1890 = vmatpush1.msra.mxu1 %v3670_v28  ;;  %1825 = vmatpush1.msra.mxu0 %v7122_v24  ;;  %v3710_v29 = vld [vmem:[%s6602_s5 + $0x380] sm:$0xff]  ;;  %v7138_v28 = vld [vmem:[#allocation135_spill] sm:$0xff]  ;;  %v3711_v24 = vld [vmem:[%s6602_s5 + $0x378] sm:$0xff] }
 0x287   : > { %1891 = vmatprep.subr.mxu1 %v3671_v27  ;;  %1826 = vmatprep.subr.mxu0 %v7123_v21  ;;  %v7139_v27 = vld [vmem:[#allocation136_spill] sm:$0xff] }
 0x288   : > { %1892 = vmatpush1.msra.mxu1 %v3672_v15  ;;  %1827 = vmatpush1.msra.mxu0 %v7124_v0  ;;  %v3712_v21 = vld [vmem:[%s6602_s5 + $0x370] sm:$0xff]  ;;  %v7140_v15 = vld [vmem:[#allocation137_spill] sm:$0xff]  ;;  %v3713_v0 = vld [vmem:[%s6602_s5 + $0x368] sm:$0xff] }
 0x289   : > { %1893 = vmatprep.subr.mxu1 %v3673_v39  ;;  %1828 = vmatprep.subr.mxu0 %v5068_v43  ;;  %v7126_v43 = vld [vmem:[#allocation123_spill] sm:$0xff]  ;;  %v7141_v39 = vld [vmem:[#allocation138_spill] sm:$0xff] }
 0x28a   : > { %1894 = vmatpush1.msra.mxu1 %v3674_v5  ;;  %1829 = vmatpush1.msra.mxu0 %v7125_v42  ;;  %v3714_v5 = vld [vmem:[%s6602_s5 + $0x360] sm:$0xff]  ;;  %v3715_v42 = vld [vmem:[%s6602_s5 + $0x130] sm:$0xff] }
 0x28b   : > { %1895 = vmatprep.subr.mxu1 %v3675_v37  ;;  %1830 = vmatprep.subr.mxu0 %v5082_v45  ;;  %v3679_v45 = vld [vmem:[%s6602_s5 + $0x278] sm:$0xff] }
 0x28c   : > { %1896 = vmatpush1.msra.mxu1 %v3676_v52  ;;  %1831 = vmatpush1.msra.mxu0 %v7126_v43  ;;  %v3716_v37 = vld [vmem:[%s6602_s5 + $0x358] sm:$0xff]  ;;  %v3717_v52 = vld [vmem:[%s6602_s5 + $0x128] sm:$0xff]  ;;  %v3718_v43 = vld [vmem:[%s6602_s5 + $0x350] sm:$0xff] }
 0x28d   : > { %1897 = vmatprep.subr.mxu1 %v3677_v34  ;;  %1832 = vmatprep.subr.mxu0 %v7127_v33  ;;  %v3719_v34 = vld [vmem:[%s6602_s5 + $0x120] sm:$0xff]  ;;  %v3720_v33 = vld [vmem:[%s6602_s5 + $0x348] sm:$0xff] }
 0x28e   : > { %1898 = vmatpush1.msra.mxu1 %v3678_v30  ;;  %1833 = vmatpush1.msra.mxu0 %v5103_v48  ;;  %v3682_v48 = vld [vmem:[%s6602_s5 + $0x260] sm:$0xff]  ;;  %v3721_v30 = vld [vmem:[%s6602_s5 + $0x118] sm:$0xff] }
 0x28f   : > { %1899 = vmatprep.subr.mxu1 %v3679_v45  ;;  %1834 = vmatprep.subr.mxu0 %v7128_v32  ;;  %v3722_v45 = vld [vmem:[%s6602_s5 + $0x340] sm:$0xff]  ;;  %v3723_v32 = vld [vmem:[%s6602_s5 + $0x110] sm:$0xff] }
 0x290   : > { %1900 = vmatpush1.msra.mxu1 %v3680_v44  ;;  %1835 = vmatpush1.msra.mxu0 %v5117_v50  ;;  %v7130_v50 = vld [vmem:[#allocation127_spill] sm:$0xff]  ;;  %v3724_v44 = vld [vmem:[%s6602_s5 + $0x338] sm:$0xff] }
 0x291   : > { %1901 = vmatprep.subr.mxu1 %v3681_v6  ;;  %1836 = vmatprep.subr.mxu0 %v5124_v51  ;;  %v7131_v51 = vld [vmem:[#allocation128_spill] sm:$0xff]  ;;  %v3725_v6 = vld [vmem:[%s6602_s5 + $0x108] sm:$0xff] }
 0x292   : > { %1902 = vmatpush1.msra.mxu1 %v3682_v48  ;;  %1837 = vmatpush1.msra.mxu0 %v7129_v53  ;;  %v1801_v48 = vsel %vm491_vm11, %v5611_v3, %v3603_v19  ;;  %v3726_v53 = vld [vmem:[%s6602_s5 + $0x330] sm:$0xff]  ;;  %v3729_v19 = vld [vmem:[%s6602_s5 + $0x320] sm:$0xff]  ;;  %v3730_v3 = vld [vmem:[%s6602_s5 + $0x4f8] sm:$0x7f] }
 0x293   : > { %1903 = vmatprep.subr.mxu1 %v3683_v46  ;;  %1838 = vmatprep.subr.mxu0 %v7130_v50  ;;  %v3727_v46 = vld [vmem:[%s6602_s5 + $0x100] sm:$0xff]  ;;  %v3728_v50 = vld [vmem:[%s6602_s5 + $0x328] sm:$0xff] }
 0x294   : > { %1904 = vmatpush1.msra.mxu1 %v3684_v49  ;;  %1839 = vmatpush1.msra.mxu0 %v7131_v51  ;;  %v3731_v49 = vld [vmem:[%s6602_s5 + $0x318] sm:$0xff]  ;;  %v3732_v51 = vld [vmem:[%s6602_s5 + $0x4f0] sm:$0x7f] }
 0x295   : > { %1905 = vmatprep.subr.mxu1 %v3685_v47  ;;  %1840 = vmatprep.subr.mxu0 %v5152_v55  ;;  %v3689_v55 = vld [vmem:[%s6602_s5 + $0x228] sm:$0xff]  ;;  %v3733_v47 = vld [vmem:[%s6602_s5 + $0x310] sm:$0xff] }
 0x296   : > { %1906 = vmatpush1.msra.mxu1 %v3686_v26  ;;  %1841 = vmatpush1.msra.mxu0 %v5159_v56  ;;  %v3690_v56 = vld [vmem:[%s6602_s5 + $0x220] sm:$0xff]  ;;  %v3734_v26 = vld [vmem:[%s6602_s5 + $0x4e8] sm:$0xff] }
 0x297   : > { %1907 = vmatprep.subr.mxu1 %v3687_v17  ;;  %1842 = vmatprep.subr.mxu0 %v5166_v57  ;;  %v3691_v57 = vld [vmem:[%s6602_s5 + $0x218] sm:$0xff]  ;;  %v3735_v17 = vld [vmem:[%s6602_s5 + $0x308] sm:$0xff] }
 0x298   : > { %1908 = vmatpush1.msra.mxu1 %v3688_v23  ;;  %1843 = vmatpush1.msra.mxu0 %v5173_v58  ;;  %v3692_v58 = vld [vmem:[%s6602_s5 + $0x210] sm:$0xff]  ;;  %v3736_v23 = vld [vmem:[%s6602_s5 + $0x4e0] sm:$0xff] }
 0x299   : > { %1909 = vmatprep.subr.mxu1 %v3689_v55  ;;  %1844 = vmatprep.subr.mxu0 %v5180_v59  ;;  %v3693_v59 = vld [vmem:[%s6602_s5 + $0x208] sm:$0xff]  ;;  %v1803_v55 = vsel %vm491_vm11, %v3604_v36, %v5637_v38  ;;  %v3741_v36 = vld [vmem:[%s6602_s5 + $0x4c0] sm:$0xff]  ;;  %v3742_v38 = vld [vmem:[%s6602_s5 + $0x4b8] sm:$0xff] }
 0x29a   : > { %1910 = vmatpush1.msra.mxu1 %v3690_v56  ;;  %1845 = vmatpush2.msra.mxu0 %v5187_v60  ;;  %v3694_v60 = vld [vmem:[%s6602_s5 + $0x200] sm:$0xff] }
 0x29b   : > { %1911 = vmatprep.subr.mxu1 %v3691_v57  ;;  %1846 = vmatprep.subr.mxu0 %v5194_v61  ;;  %v3695_v61 = vld [vmem:[%s6602_s5 + $0x3f8] sm:$0xff]  ;;  %v3737_v56 = vld [vmem:[%s6602_s5 + $0x300] sm:$0xff] }
 0x29c   : > { %1912 = vmatpush1.msra.mxu1 %v3692_v58  ;;  %1847 = vmatpush2.msra.mxu0 %v5201_v62  ;;  %v3696_v62 = vld [vmem:[%s6602_s5 + $0x3f0] sm:$0xff]  ;;  %v3738_v57 = vld [vmem:[%s6602_s5 + $0x4d8] sm:$0xff] }
 0x29d   : > { %1913 = vmatprep.subr.mxu1 %v3693_v59  ;;  %1848 = vmatprep.subr.mxu0 %v5208_v63  ;;  %v3697_v63 = vld [vmem:[%s6602_s5 + $0x3e8] sm:$0xff]  ;;  %v3739_v58 = vld [vmem:[%s6602_s5 + $0x4d0] sm:$0xff] }
 0x29e   : > { %1914 = vmatpush1.msra.mxu1 %v3694_v60  ;;  %1849 = vmatpush2.msra.mxu0 %v5215_v1  ;;  %v3698_v1 = vld [vmem:[%s6602_s5 + $0x3e0] sm:$0xff]  ;;  %v3743_v59 = vld [vmem:[%s6602_s5 + $0x4b0] sm:$0xff]  ;;  %v3744_v60 = vld [vmem:[%s6602_s5 + $0x4a8] sm:$0xff] }
 0x29f   : > { %1915 = vmatprep.subr.mxu1 %v3695_v61  ;;  %1850 = vmatprep.subr.mxu0 %v5222_v4  ;;  %v3699_v4 = vld [vmem:[%s6602_s5 + $0x3d8] sm:$0xff]  ;;  %v3745_v61 = vld [vmem:[%s6602_s5 + $0x4a0] sm:$0xff] }
 0x2a0   : > { %1916 = vmatpush2.msra.mxu1 %v3696_v62  ;;  %1851 = vmatpush2.msra.mxu0 %v5229_v7  ;;  %v3700_v7 = vld [vmem:[%s6602_s5 + $0x3d0] sm:$0xff]  ;;  %v3746_v62 = vld [vmem:[%s6602_s5 + $0x498] sm:$0xff] }
 0x2a1   : > { %1917 = vmatprep.subr.mxu1 %v3697_v63  ;;  %1852 = vmatprep.subr.mxu0 %v5236_v8  ;;  %v3701_v8 = vld [vmem:[%s6602_s5 + $0x3c8] sm:$0xff]  ;;  %v3747_v63 = vld [vmem:[%s6602_s5 + $0x490] sm:$0xff] }
 0x2a2   : > { %1918 = vmatpush2.msra.mxu1 %v3698_v1  ;;  %1853 = vmatpush2.msra.mxu0 %v5243_v9  ;;  %v3702_v9 = vld [vmem:[%s6602_s5 + $0x3c0] sm:$0xff]  ;;  %v3748_v1 = vld [vmem:[%s6602_s5 + $0x488] sm:$0xff] }
 0x2a3   : > { %1919 = vmatprep.subr.mxu1 %v3699_v4  ;;  %1854 = vmatprep.subr.mxu0 %v5250_v10  ;;  %v3703_v10 = vld [vmem:[%s6602_s5 + $0x3b8] sm:$0xff]  ;;  %v3749_v4 = vld [vmem:[%s6602_s5 + $0x480] sm:$0xff] }
 0x2a4   : > { %1920 = vmatpush2.msra.mxu1 %v3700_v7  ;;  %1855 = vmatpush2.msra.mxu0 %v5257_v11  ;;  %v3704_v11 = vld [vmem:[%s6602_s5 + $0x3b0] sm:$0xff]  ;;  %v3750_v7 = vld [vmem:[%s6602_s5 + $0x478] sm:$0xff] }
 0x2a5   : > { %1921 = vmatprep.subr.mxu1 %v3701_v8  ;;  %1856 = vmatprep.subr.mxu0 %v5264_v12  ;;  %v7132_v12 = vld [vmem:[#allocation129_spill] sm:$0xff]  ;;  %v3751_v8 = vld [vmem:[%s6602_s5 + $0x470] sm:$0xff] }
 0x2a6   : > { %1922 = vmatpush2.msra.mxu1 %v3702_v9  ;;  %1857 = vmatpush2.msra.mxu0 %v5271_v13  ;;  %v7133_v13 = vld [vmem:[#allocation130_spill] sm:$0xff] }
 0x2a7   : > { %1923 = vmatprep.subr.mxu1 %v3703_v10  ;;  %1858 = vmatprep.subr.mxu0 %v5278_v14  ;;  %v7134_v14 = vld [vmem:[#allocation131_spill] sm:$0xff]  ;;  %v3753_v10 = vld [vmem:[%s6602_s5 + $0x460] sm:$0xff] }
 0x2a8   : > { %1924 = vmatpush2.msra.mxu1 %v3704_v11  ;;  %1859 = vmatpush2.msra.mxu0 %v7132_v12  ;;  %v3752_v9 = vld [vmem:[%s6602_s5 + $0x468] sm:$0xff]  ;;  %v3754_v11 = vld [vmem:[%s6602_s5 + $0x458] sm:$0xff]  ;;  %v3755_v12 = vld [vmem:[%s6602_s5 + $0x450] sm:$0xff] }
 0x2a9   : > { %1925 = vmatprep.subr.mxu1 %v3705_v18  ;;  %1860 = vmatprep.subr.mxu0 %v7133_v13  ;;  %v3756_v18 = vld [vmem:[%s6602_s5 + $0x448] sm:$0xff]  ;;  %v3757_v13 = vld [vmem:[%s6602_s5 + $0x440] sm:$0xff] }
 0x2aa   : > { %1926 = vmatpush2.msra.mxu1 %v3706_v54  ;;  %1861 = vmatpush2.msra.mxu0 %v7134_v14  ;;  %v3758_v54 = vld [vmem:[%s6602_s5 + $0x438] sm:$0xff]  ;;  %v3759_v14 = vld [vmem:[%s6602_s5 + $0x430] sm:$0xff] }
 0x2ab   : > { %1927 = vmatprep.subr.mxu1 %v3707_v22  ;;  %1862 = vmatprep.subr.mxu0 %v7135_v25  ;;  %v3760_v22 = vld [vmem:[%s6602_s5 + $0x428] sm:$0xff]  ;;  %v3761_v25 = vld [vmem:[%s6602_s5 + $0x420] sm:$0xff] }
 0x2ac   : > { %1928 = vmatpush2.msra.mxu1 %v3708_v16  ;;  %1863 = vmatpush2.msra.mxu0 %v7136_v40  ;;  %v3762_v16 = vld [vmem:[%s6602_s5 + $0x418] sm:$0xff]  ;;  %v3763_v40 = vld [vmem:[%s6602_s5 + $0x410] sm:$0xff] }
 0x2ad   : > { %1929 = vmatprep.subr.mxu1 %v3709_v31  ;;  %1864 = vmatprep.subr.mxu0 %v7137_v2  ;;  %v1800_v31 = vpop.permute.xlu0 %1799  ;;  %v3764_v2 = vld [vmem:[%s6602_s5 + $0x408] sm:$0xff] }
 0x2ae   : > { %1930 = vmatpush2.msra.mxu1 %v3710_v29  ;;  %1865 = vmatpush2.msra.mxu0 %v7138_v28  ;;  %v1805_v29 = vsel %vm491_vm11, %v5631_v20, %v1800_v31  ;;  %v3765_v28 = vld [vmem:[%s6602_s5 + $0x400] sm:$0xff] }
 0x2af   : > { %1931 = vmatprep.subr.mxu1 %v3711_v24  ;;  %1866 = vmatprep.subr.mxu0 %v7139_v27  ;;  %v1168_v24 = vpop.f32.mrf.mxu1 }
 0x2b0   : > { %1932 = vmatpush2.msra.mxu1 %v3712_v21  ;;  %1867 = vmatpush2.msra.mxu0 %v7140_v15  ;;  %v1239_v21 = vpop.f32.mrf.mxu0 }
 0x2b1   : > { %1933 = vmatprep.subr.mxu1 %v3713_v0  ;;  %1868 = vmatprep.subr.mxu0 %v7141_v39  ;;  %v1170_v27 = vpop.f32.mrf.mxu1 }
 0x2b2   : > { %1934 = vmatpush2.msra.mxu1 %v3714_v5  ;;  %1869 = vmatpush2.msra.mxu0 %v3715_v42  ;;  %v1241_v0 = vpop.f32.mrf.mxu0 }
 0x2b3   : > { %1935 = vmatprep.subr.mxu1 %v3716_v37  ;;  %1870 = vmatprep.subr.mxu0 %v3717_v52  ;;  %v1310_v15 = vpop.f32.mrf.mxu1 }
 0x2b4   : > { %1936 = vmatpush2.msra.mxu1 %v3718_v43  ;;  %1871 = vmatpush2.msra.mxu0 %v3719_v34 }
 0x2b5   : > { %1937 = vmatprep.subr.mxu1 %v3720_v33  ;;  %1872 = vmatprep.subr.mxu0 %v3721_v30  ;;  %v1312_v39 = vpop.f32.mrf.mxu1 }
 0x2b6   : > { %1938 = vmatpush2.msra.mxu1 %v3722_v45  ;;  %1873 = vmatpush2.msra.mxu0 %v3723_v32 }
 0x2b7   : > { %1939 = vmatprep.subr.mxu1 %v3724_v44  ;;  %1874 = vmatprep.subr.mxu0 %v3725_v6 }
 0x2b8   : > { %1940 = vmatpush2.msra.mxu1 %v3726_v53  ;;  %1875 = vmatpush2.msra.mxu0 %v3727_v46 }
 0x2b9   : > { %1941 = vmatprep.subr.mxu1 %v3728_v50  ;;  %1877 = vmatmul.mubr.f32.vlgmr.msra.gmra.mxu0 %v1801_v48  ;;  %v1240_v50 = vadd.f32 %v1239_v21, %v1168_v24 }
 0x2ba   : > { %1942 = vmatpush2.msra.mxu1 %v3729_v19  ;;  %3209 = vmatprep.subr.msk.mxu0 %vm1095_vm0, %v3730_v3 }
 0x2bb   : > { %1943 = vmatprep.subr.mxu1 %v3731_v49  ;;  %3210 = vmatpush1.msk.msra.mxu0 %vm1095_vm0, %v3732_v51 }
 0x2bc   : > { %1944 = vmatpush2.msra.mxu1 %v3733_v47  ;;  %1956 = vmatprep.subr.mxu0 %v3734_v26  ;;  %v1311_v47 = vadd.f32 %v1310_v15, %v1240_v50 }
 0x2bd   : > { %1945 = vmatprep.subr.mxu1 %v3735_v17  ;;  %1957 = vmatpush1.msra.mxu0 %v3736_v23 }
 0x2be   : > { %1946 = vmatpush2.msra.mxu1 %v3737_v56  ;;  %1958 = vmatprep.subr.mxu0 %v3738_v57 }
 0x2bf   : > { %1948 = vmatmul.mubr.f32.vlgmr.msra.gmra.mxu1 %v1803_v55  ;;  %1959 = vmatpush1.msra.mxu0 %v3739_v58 }
 0x2c0   : > { %1960 = vmatprep.subr.mxu0 %v3740_v35  ;;  %2018 = vmatprep.mubr.f32.mxu0 %v7112_v41 }
 0x2c1   : > { %1961 = vmatpush1.msra.mxu0 %v3741_v36  ;;  %2213 = vmatprep.subr.mxu1 %v7112_v41 }
 0x2c2   : > { %1962 = vmatprep.subr.mxu0 %v3742_v38 }
 0x2c3   : > { %1963 = vmatpush1.msra.mxu0 %v3743_v59 }
 0x2c4   : > { %1964 = vmatprep.subr.mxu0 %v3744_v60  ;;  %v1242_v60 = vadd.f32 %v1241_v0, %v1170_v27 }
 0x2c5   : > { %1965 = vmatpush1.msra.mxu0 %v3745_v61 }
 0x2c6   : > { %1966 = vmatprep.subr.mxu0 %v3746_v62 }
 0x2c7   : > { %1967 = vmatpush1.msra.mxu0 %v3747_v63  ;;  %v1313_v63 = vadd.f32 %v1312_v39, %v1242_v60 }
 0x2c8   : > { %1968 = vmatprep.subr.mxu0 %v3748_v1 }
 0x2c9   : > { %1969 = vmatpush1.msra.mxu0 %v3749_v4 }
 0x2ca   : > { %1970 = vmatprep.subr.mxu0 %v3750_v7 }
 0x2cb   : > { %1971 = vmatpush1.msra.mxu0 %v3751_v8  ;;  %v2190_v8 = vld [vmem:[%s6601_s4] sm:$0xff] }
 0x2cc   : > { %1972 = vmatprep.subr.mxu0 %v3752_v9  ;;  %v2168_v9 = vld [vmem:[%s6600_s3 + $0x8] sm:$0xff] }
 0x2cd   : > { %1973 = vmatpush1.msra.mxu0 %v3753_v10  ;;  %3213 = vmatprep.mubr.msk.f32.mxu1 %vm2202_vm13, %v2168_v9  ;;  %v2191_v10 = vld [vmem:[%s6601_s4 + $0x8] sm:$0xff] }
 0x2ce   : > { %1974 = vmatprep.subr.mxu0 %v3754_v11  ;;  %v6069_v11 = vld [vmem:[%s6603_s6 + $0x48] sm:$0x7f] }
 0x2cf   : > { %1975 = vmatpush1.msra.mxu0 %v3755_v12  ;;  %v6074_v12 = vld [vmem:[%s6603_s6 + $0x40] sm:$0xff] }
 0x2d0   : > { %1976 = vmatprep.subr.mxu0 %v3756_v18  ;;  %v6083_v18 = vld [vmem:[%s6603_s6 + $0x38] sm:$0xff] }
 0x2d1   : > { %1977 = vmatpush1.msra.mxu0 %v3757_v13  ;;  %v6090_v13 = vld [vmem:[%s6603_s6 + $0x30] sm:$0xff] }
 0x2d2   : > { %1978 = vmatprep.subr.mxu0 %v3758_v54  ;;  %v6097_v54 = vld [vmem:[%s6603_s6 + $0x28] sm:$0xff] }
 0x2d3   : > { %1979 = vmatpush1.msra.mxu0 %v3759_v14  ;;  %v6104_v14 = vld [vmem:[%s6603_s6 + $0x20] sm:$0xff] }
 0x2d4   : > { %1980 = vmatprep.subr.mxu0 %v3760_v22 }
 0x2d5   : > { %1981 = vmatpush1.msra.mxu0 %v3761_v25  ;;  %v1405_v5 = vpop.f32.mrf.mxu0 }
 0x2d6   : > { %1982 = vmatprep.subr.mxu0 %v3762_v16 }
 0x2d7   : > { %1983 = vmatpush1.msra.mxu0 %v3763_v40  ;;  %v1407_v37 = vpop.f32.mrf.mxu0 }
 0x2d8   : > { %1984 = vmatprep.subr.mxu0 %v3764_v2 }
 0x2d9   : > { %1985 = vmatpush1.msra.mxu0 %v3765_v28 }
 0x2da   : > { %3211 = vmatmul.mubr.msk.f32.vlgmr.msra.gmra.mxu0 %vm446_vm3, %v1805_v29  ;;  %v1476_v42 = vpop.f32.mrf.mxu1  ;;  %3344 = vmatprep.subr.msk.mxu0 %vm1095_vm0, %v6069_v11  ;;  %vm2107_vm3 = vcmask 736256  }
 0x2db   : > { %v1477_v53 = vadd.f32 %v1476_v42, %v1405_v5  ;;  %3345 = vmatpush3.msk.msra.mxu0 %vm1095_vm0, %v6069_v11 }
 0x2dc   : > { %v1478_v52 = vpop.f32.mrf.mxu1  ;;  %3346 = vmatprep.subr.mxu0 %v6074_v12 }
 0x2dd   : > { %v1479_v36 = vadd.f32 %v1478_v52, %v1407_v37  ;;  %3347 = vmatpush3.msra.mxu0 %v6074_v12 }
 0x2de   : > { %3348 = vmatprep.subr.mxu0 %v6083_v18 }
 0x2df   : > { %3349 = vmatpush3.msra.mxu0 %v6083_v18 }
 0x2e0   : > { %3350 = vmatprep.subr.mxu0 %v6090_v13 }
 0x2e1   : > { %3351 = vmatpush3.msra.mxu0 %v6090_v13 }
 0x2e2   : > { %3352 = vmatprep.subr.mxu0 %v6097_v54 }
 0x2e3   : > { %3353 = vmatpush3.msra.mxu0 %v6097_v54 }
 0x2e4   : > { %3354 = vmatprep.subr.mxu0 %v6104_v14 }
 0x2e5   : > { %3355 = vmatpush3.msra.mxu0 %v6104_v14 }
 0x2f5   : > { %v1547_v43 = vpop.f32.mrf.mxu0 }
 0x2f6   : > { %v1548_v19 = vadd.f32 %v1547_v43, %v1477_v53 }
 0x2f7   : > { %v1549_v20 = vpop.f32.mrf.mxu0 }
 0x2f8   : > { %v2025_v23 = vmax.f32 %v1311_v47, %v1548_v19  ;;  %v1550_v61 = vadd.f32 %v1549_v20, %v1479_v36 }
 0x2fa   : > { %v2026_v4 = vmax.f32 %v1313_v63, %v1550_v61 }
 0x31b   : > { %v1642_v34 = vpop.f32.mrf.mxu1 }
 0x31d   : > { %v1644_v33 = vpop.f32.mrf.mxu1 }
 0x337   : > { %v1713_v30 = vpop.f32.mrf.mxu0 }
 0x338   : > { %v1714_v3 = vadd.f32 %v1713_v30, %v1642_v34 }
 0x339   : > { %v1715_v32 = vpop.f32.mrf.mxu0 }
 0x33a   : > { %v1716_v38 = vadd.f32 %v1715_v32, %v1644_v33 }
 0x33d   : > { %v1784_v45 = vpop.f32.mrf.mxu1 }
 0x33e   : > { %v1785_v26 = vadd.f32 %v1784_v45, %v1714_v3 }
 0x33f   : > { %v1786_v44 = vpop.f32.mrf.mxu1 }
 0x340   : > { %v1787_v62 = vadd.f32 %v1786_v44, %v1716_v38 }
 0x379   : > { %v1878_v6 = vpop.f32.mrf.mxu0 }
 0x37b   : > { %v1880_v46 = vpop.f32.mrf.mxu0 }
 0x37f   : > { %v1949_v48 = vpop.f32.mrf.mxu1 }
 0x380   : > { %v1950_v49 = vadd.f32 %v1949_v48, %v1878_v6 }
 0x381   : > { %v1951_v56 = vpop.f32.mrf.mxu1 }
 0x382   : > { %v1952_v35 = vadd.f32 %v1951_v56, %v1880_v46 }
 0x39a   : > { %v2020_v51 = vpop.f32.mrf.mxu0 }
 0x39b   : > { %v2021_v17 = vadd.f32 %v2020_v51, %v1950_v49 }
 0x39c   : > { %v2022_v58 = vpop.f32.mrf.mxu0 }
 0x39d   : > { %v2027_v55 = vmax.f32 %v1785_v26, %v2021_v17  ;;  %v2023_v59 = vadd.f32 %v2022_v58, %v1952_v35 }
 0x39f   : > { %v6018_v57 = vmax.f32 %v2025_v23, %v2027_v55  ;;  %v2028_v1 = vmax.f32 %v1787_v62, %v2023_v59 }
 0x3a1   : > { %2090 = vrot.lane.b32.xlu0 %v6018_v57, %s3854_s16  ;;  %2127 = vrot.lane.b32.xlu1 %v6018_v57, %s6821_s21  ;;  %2032 = vst.msk [vmem:[#allocation3] sm:$0x3f] %vm2031_vm7, %v6018_v57  ;;  %v2030_v7 = vmax.f32 %v2026_v4, %v2028_v1  ;;  %s3864_s16 = smov 104  }
 0x3a5   : > { %2078 = vrot.lane.b32.xlu0 %v6018_v57, %s3856_s22  ;;  %2135 = vrot.lane.b32.xlu1 %v6018_v57, %s3857_s1  ;;  %s6819_s22 = smov 112  }
 0x3a9   : > { %2074 = vrot.lane.b32.xlu0 %v6018_v57, %s3858_s2  ;;  %2111 = vrot.lane.b32.xlu1 %v6018_v57, %s3859_s17  ;;  %s3867_s2 = smov 115  }
 0x3ad   : > { %2119 = vrot.lane.b32.xlu1 %v6018_v57, %s3860_s30  ;;  %2129 = vrot.lane.b32.xlu0 %v2030_v7, %s6821_s21 }
 0x3b1   : > { %2103 = vrot.lane.b32.xlu1 %v6018_v57, %s3861_s0  ;;  %2137 = vrot.lane.b32.xlu0 %v2030_v7, %s3857_s1  ;;  %s3866_s1 = smov 113  }
 0x3b5   : > { %2095 = vrot.lane.b32.xlu1 %v6018_v57, %s3862_s23  ;;  %2113 = vrot.lane.b32.xlu0 %v2030_v7, %s3859_s17  ;;  %s3869_s17 = smov 116  }
 0x3b9   : > { %2086 = vrot.lane.b32.xlu1 %v6018_v57, %s6918_s24  ;;  %2121 = vrot.lane.b32.xlu0 %v2030_v7, %s3860_s30  ;;  %s3868_s24 = smov 114   ;;  %s7142_s30 = smov 124  }
 0x3bd   : > { %2082 = vrot.lane.b32.xlu1 %v6018_v57, %s3863_s15  ;;  %2105 = vrot.lane.b32.xlu0 %v2030_v7, %s3861_s0  ;;  %s7143_s0 = smov 126   ;;  %s3870_s15 = smov 76  }
 0x3c1   : > { %2070 = vrot.lane.b32.xlu1 %v6018_v57, %s3864_s16  ;;  %2097 = vrot.lane.b32.xlu0 %v2030_v7, %s3862_s23  ;;  %s7144_s23 = smov 125   ;;  %s3871_s16 = smov 78  }
 0x3c5   : > { %2066 = vrot.lane.b32.xlu1 %v6018_v57, %s6819_s22  ;;  %2062 = vrot.lane.b32.xlu0 %v6018_v57, %s3866_s1  ;;  %s3872_s1 = smov 77   ;;  %s3876_s22 = smov 48  }
 0x3c9   : > { %2054 = vrot.lane.b32.xlu1 %v6018_v57, %s3867_s2  ;;  %2058 = vrot.lane.b32.xlu0 %v6018_v57, %s3868_s24  ;;  %s7148_s24 = smov 16  }
 0x3cd   : > { %2050 = vrot.lane.b32.xlu1 %v6018_v57, %s3869_s17  ;;  %2046 = vrot.lane.b32.xlu0 %v6018_v57, %s7142_s30  ;;  %s429_s30 = sand.u32 1, %s3818_s26  }
 0x3d1   : > { %2038 = vrot.lane.b32.xlu1 %v6018_v57, %s7143_s0  ;;  %2042 = vrot.lane.b32.xlu0 %v6018_v57, %s7144_s23  ;;  %s3874_s23 = smov 32   ;;  %s7151_s0 = smov 112  }
 0x3d5   : > { %2034 = vrot.lane.b32.xlu1 %v6018_v57, %s6913_s20  ;;  %2159 = vrot.lane.b32.xlu0 %v6018_v57, %s3870_s15 }
 0x3d9   : > { %2161 = vrot.lane.b32.xlu1 %v2030_v7, %s3870_s15  ;;  %2143 = vrot.lane.b32.xlu0 %v6018_v57, %s3871_s16  ;;  %s3120_s15 = scalar_lea.sflag [#allocation6], %s429_s30 }
 0x3dd   : > { %2145 = vrot.lane.b32.xlu1 %v2030_v7, %s3871_s16  ;;  %2151 = vrot.lane.b32.xlu0 %v6018_v57, %s3872_s1  ;;  %s7150_s16 = smov 96  }
 0x3e1   : > { %2153 = vrot.lane.b32.xlu1 %v2030_v7, %s3872_s1  ;;  %2194 = vperm.xlu0 %3584, %v2190_v8   ;;  %s7149_s1 = smov 80  }
 0x3e5   : > { %2199 = vperm.xlu1 %3605, %v2191_v10  }
 0x413   : > { %v2091_v22 = vpop.permute.xlu0 %2090  ;;  %v2128_v25 = vpop.permute.xlu1 %2127 }
 0x414   : > { %2093 = vst.msk [vmem:[#allocation3 + $0x5a] sm:$0x3f] %vm2031_vm7, %v2091_v22 }
 0x417   : > { %v2079_v16 = vpop.permute.xlu0 %2078  ;;  %v2136_v40 = vpop.permute.xlu1 %2135 }
 0x418   : > { %2081 = vst.msk [vmem:[#allocation3 + $0x48] sm:$0x3f] %vm2031_vm7, %v2079_v16 }
 0x41b   : > { %v2075_v31 = vpop.permute.xlu0 %2074  ;;  %v2112_v2 = vpop.permute.xlu1 %2111 }
 0x41c   : > { %2077 = vst.msk [vmem:[#allocation3 + $0x42] sm:$0x3f] %vm2031_vm7, %v2075_v31 }
 0x41f   : > { %v2120_v29 = vpop.permute.xlu1 %2119  ;;  %v2130_v28 = vpop.permute.xlu0 %2129 }
 0x420   : > { %v2132_v24 = vsel %vm2131_vm14, %v2128_v25, %v2130_v28  ;;  %v6180_v28 = vld [vmem:[%s6603_s6 + $0x18] sm:$0xff] }
 0x421   : > { %2134 = vst.msk [vmem:[#allocation3 + $0x78] sm:$0x3f] %vm2031_vm7, %v2132_v24  ;;  %3356 = vmatprep.subr.mxu0 %v6180_v28  ;;  %v6188_v24 = vld [vmem:[%s6603_s6 + $0x10] sm:$0xff] }
 0x422   : > { %3357 = vmatpush3.msra.mxu0 %v6180_v28 }
 0x423   : > { %v2104_v27 = vpop.permute.xlu1 %2103  ;;  %v2138_v21 = vpop.permute.xlu0 %2137  ;;  %3358 = vmatprep.subr.mxu0 %v6188_v24 }
 0x424   : > { %v2140_v15 = vsel %vm2139_vm15, %v2136_v40, %v2138_v21  ;;  %v2167_v40 = vld [vmem:[%s6600_s3] sm:$0xff]  ;;  %3359 = vmatpush3.msra.mxu0 %v6188_v24 }
 0x425   : > { %2142 = vst.msk [vmem:[#allocation3 + $0x7e] sm:$0x3f] %vm2031_vm7, %v2140_v15  ;;  %v6206_v21 = vld [vmem:[%s6603_s6] sm:$0xff] }
 0x427   : > { %v2096_v0 = vpop.permute.xlu1 %2095  ;;  %v2114_v39 = vpop.permute.xlu0 %2113 }
 0x428   : > { %v2116_v5 = vsel %vm2115_vm1, %v2112_v2, %v2114_v39  ;;  %v2170_v2 = vld [vmem:[%s6600_s3 + $0x18] sm:$0xff] }
 0x429   : > { %2118 = vst.msk [vmem:[#allocation3 + $0x6c] sm:$0x3f] %vm2031_vm7, %v2116_v5 }
 0x42b   : > { %v2087_v42 = vpop.permute.xlu1 %2086  ;;  %v2122_v37 = vpop.permute.xlu0 %2121 }
 0x42c   : > { %2089 = vst.msk [vmem:[#allocation3 + $0x54] sm:$0x3f] %vm2031_vm7, %v2087_v42  ;;  %v2124_v52 = vsel %vm2123_vm2, %v2120_v29, %v2122_v37  ;;  %v2186_v43 = vld [vmem:[#allocation3 + $0x78] sm:$0xff]  ;;  %v2169_v29 = vld [vmem:[%s6600_s3 + $0x10] sm:$0xff] }
 0x42d   : > { %2126 = vst.msk [vmem:[#allocation3 + $0x72] sm:$0x3f] %vm2031_vm7, %v2124_v52  ;;  %2214 = vmatpush1.msra.mxu1 %v2186_v43 }
 0x42e   : > { %2215 = vmatprep.subr.mxu1 %v7112_v41 }
 0x42f   : > { %v2083_v34 = vpop.permute.xlu1 %2082  ;;  %v2106_v20 = vpop.permute.xlu0 %2105 }
 0x430   : > { %2085 = vst.msk [vmem:[#allocation3 + $0x4e] sm:$0x3f] %vm2031_vm7, %v2083_v34  ;;  %v2108_v33 = vsel %vm2107_vm3, %v2104_v27, %v2106_v20  ;;  %v6197_v27 = vld [vmem:[%s6603_s6 + $0x8] sm:$0xff] }
 0x431   : > { %2110 = vst.msk [vmem:[#allocation3 + $0x66] sm:$0x3f] %vm2031_vm7, %v2108_v33  ;;  %3360 = vmatprep.subr.mxu0 %v6197_v27 }
 0x432   : > { %3361 = vmatpush3.msra.mxu0 %v6197_v27 }
 0x433   : > { %v2071_v30 = vpop.permute.xlu1 %2070  ;;  %v2098_v45 = vpop.permute.xlu0 %2097  ;;  %v2182_v3 = vld [vmem:[#allocation3 + $0x58] sm:$0xff]  ;;  %3362 = vmatprep.subr.mxu0 %v6206_v21 }
 0x434   : > { %2073 = vst.msk [vmem:[#allocation3 + $0x3c] sm:$0x3f] %vm2031_vm7, %v2071_v30  ;;  %v2100_v32 = vsel %vm2099_vm4, %v2096_v0, %v2098_v45  ;;  %v2185_v44 = vld [vmem:[#allocation3 + $0x70] sm:$0xff]  ;;  %3363 = vmatpush3.msra.mxu0 %v6206_v21 }
 0x435   : > { %2102 = vst.msk [vmem:[#allocation3 + $0x60] sm:$0x3f] %vm2031_vm7, %v2100_v32  ;;  %2216 = vmatpush1.msra.mxu1 %v2185_v44  ;;  %3367 = vmatprep.subr.msk.mxu0 %vm1095_vm0, %v6069_v11 }
 0x436   : > { %2217 = vmatprep.subr.mxu1 %v7112_v41 }
 0x437   : > { %v2067_v6 = vpop.permute.xlu1 %2066  ;;  %v2063_v48 = vpop.permute.xlu0 %2062  ;;  %v2181_v47 = vld [vmem:[#allocation3 + $0x50] sm:$0xff]  ;;  %v2180_v26 = vld [vmem:[#allocation3 + $0x48] sm:$0xff] }
 0x438   : > { %2069 = vst.msk [vmem:[#allocation3 + $0x36] sm:$0x3f] %vm2031_vm7, %v2067_v6  ;;  %2065 = vst.msk [vmem:[#allocation3 + $0x30] sm:$0x3f] %vm2031_vm7, %v2063_v48  ;;  %v2184_v53 = vld [vmem:[#allocation3 + $0x68] sm:$0xff]  ;;  %v7145_v48 = vlaneseq }
 0x439   : > { %2218 = vmatpush1.msra.mxu1 %v2184_v53 }
 0x43a   : > { %2219 = vmatprep.subr.mxu1 %v7112_v41  ;;  %v6273_v53 = vshrl.u32 %v7145_v48, 7  ;;  %vm6279_vm10 = vcmp.lt.s32.totalorder %v7145_v48, 16  ;;  %vm2668_vm11 = vcmp.ge.s32.totalorder %v7145_v48, 16  ;;  %vm2669_vm12 = vcmp.lt.s32.totalorder %v7145_v48, 32 }
 0x43b   : > { %v2055_v46 = vpop.permute.xlu1 %2054  ;;  %v2059_v50 = vpop.permute.xlu0 %2058  ;;  %v2179_v55 = vld [vmem:[#allocation3 + $0x40] sm:$0xff]  ;;  %vm2685_vm1 = vcmp.lt.s32.totalorder %v7145_v48, 64  ;;  %vm6455_vm2 = vcmp.ge.s32.totalorder %v7145_v48, 64  ;;  %vm6460_vm3 = vcmp.lt.s32.totalorder %v7145_v48, 80 }
 0x43c   : > { %2057 = vst.msk [vmem:[#allocation3 + $0x24] sm:$0x3f] %vm2031_vm7, %v2055_v46  ;;  %2061 = vst.msk [vmem:[#allocation3 + $0x2a] sm:$0x3f] %vm2031_vm7, %v2059_v50  ;;  %v2183_v19 = vld [vmem:[#allocation3 + $0x60] sm:$0xff] }
 0x43d   : > { %2220 = vmatpush1.msra.mxu1 %v2183_v19 }
 0x43e   : > { %2221 = vmatprep.subr.mxu1 %v7112_v41 }
 0x43f   : > { %v2051_v49 = vpop.permute.xlu1 %2050  ;;  %2222 = vmatpush1.msra.mxu1 %v2182_v3  ;;  %v2047_v51 = vpop.permute.xlu0 %2046  ;;  %v2178_v56 = vld [vmem:[#allocation3 + $0x38] sm:$0xff]  ;;  %v2177_v35 = vld [vmem:[#allocation3 + $0x30] sm:$0xff] }
 0x440   : > { %2053 = vst.msk [vmem:[#allocation3 + $0x1e] sm:$0x3f] %vm2031_vm7, %v2051_v49  ;;  %2049 = vst.msk [vmem:[#allocation3 + $0x18] sm:$0x3f] %vm2031_vm7, %v2047_v51  ;;  %2223 = vmatprep.subr.mxu1 %v7112_v41 }
 0x441   : > { %2224 = vmatpush1.msra.mxu1 %v2181_v47 }
 0x442   : > { %2225 = vmatprep.subr.mxu1 %v7112_v41 }
 0x443   : > { %v2039_v17 = vpop.permute.xlu1 %2038  ;;  %2226 = vmatpush1.msra.mxu1 %v2180_v26  ;;  %v2043_v23 = vpop.permute.xlu0 %2042  ;;  %v2176_v36 = vld [vmem:[#allocation3 + $0x28] sm:$0xff] }
 0x444   : > { %2041 = vst.msk [vmem:[#allocation3 + $0xc] sm:$0x3f] %vm2031_vm7, %v2039_v17  ;;  %2045 = vst.msk [vmem:[#allocation3 + $0x12] sm:$0x3f] %vm2031_vm7, %v2043_v23  ;;  %2227 = vmatprep.subr.mxu1 %v7112_v41  ;;  %v2852_v23 = vld [vmem:[%s6604_s7 + $0xf8] sm:$0xff] }
 0x445   : > { %2228 = vmatpush1.msra.mxu1 %v2179_v55 }
 0x446   : > { %2229 = vmatprep.subr.mxu1 %v7112_v41 }
 0x447   : > { %v2035_v57 = vpop.permute.xlu1 %2034  ;;  %2230 = vmatpush1.msra.mxu1 %v2178_v56  ;;  %v2160_v58 = vpop.permute.xlu0 %2159  ;;  %v2175_v60 = vld [vmem:[#allocation3 + $0x20] sm:$0xff]  ;;  %v2174_v62 = vld [vmem:[#allocation3 + $0x18] sm:$0xff] }
 0x448   : > { %2037 = vst.msk [vmem:[#allocation3 + $0x6] sm:$0x3f] %vm2031_vm7, %v2035_v57  ;;  %2231 = vmatprep.subr.mxu1 %v7112_v41 }
 0x449   : > { %2232 = vmatpush1.msra.mxu1 %v2177_v35  ;;  %v2851_v35 = vld [vmem:[%s6604_s7 + $0xf0] sm:$0xff] }
 0x44a   : > { %2233 = vmatprep.subr.mxu1 %v7112_v41 }
 0x44b   : > { %v2162_v38 = vpop.permute.xlu1 %2161  ;;  %2234 = vmatpush1.msra.mxu1 %v2176_v36  ;;  %v2144_v61 = vpop.permute.xlu0 %2143  ;;  %v2173_v4 = vld [vmem:[#allocation3 + $0x10] sm:$0xff] }
 0x44c   : > { %v2164_v59 = vsel %vm2163_vm5, %v2160_v58, %v2162_v38  ;;  %2235 = vmatprep.subr.mxu1 %v7112_v41  ;;  %v2836_v58 = vld [vmem:[%s6604_s7 + $0x78] sm:$0xff]  ;;  %vm2708_vm5 = vmand %vm6455_vm2, %vm6460_vm3  ;;  %vm3039_vm2 = vcmask 687104   ;;  %vm3117_vm3 = vcmask 73728  }
 0x44d   : > { %2166 = vst.msk [vmem:[#allocation3 + $0x90] sm:$0x3f] %vm2031_vm7, %v2164_v59  ;;  %2236 = vmatpush1.msra.mxu1 %v2175_v60  ;;  %v2835_v59 = vld [vmem:[%s6604_s7 + $0x70] sm:$0xff]  ;;  %v2850_v60 = vld [vmem:[%s6604_s7 + $0xe8] sm:$0xff] }
 0x44e   : > { %2237 = vmatprep.subr.mxu1 %v7112_v41 }
 0x44f   : > { %v2146_v63 = vpop.permute.xlu1 %2145  ;;  %2238 = vmatpush1.msra.mxu1 %v2174_v62  ;;  %v2172_v7 = vld [vmem:[#allocation3 + $0x8] sm:$0xff]  ;;  %v2152_v8 = vpop.permute.xlu0 %2151  ;;  %v2171_v22 = vld [vmem:[#allocation3] sm:$0xff] }
 0x450   : > { %v2148_v1 = vsel %vm2147_vm6, %v2144_v61, %v2146_v63  ;;  %2239 = vmatprep.subr.mxu1 %v7112_v41  ;;  %v2834_v63 = vld [vmem:[%s6604_s7 + $0x68] sm:$0xff]  ;;  %vm6471_vm6 = vcmp.ge.s32.totalorder %v7145_v48, 80 }
 0x451   : > { %2150 = vst.msk [vmem:[#allocation3 + $0x84] sm:$0x3f] %vm2031_vm7, %v2148_v1  ;;  %2240 = vmatpush1.msra.mxu1 %v2173_v4  ;;  %v2849_v1 = vld [vmem:[%s6604_s7 + $0xe0] sm:$0xff] }
 0x452   : > { %2241 = vmatprep.subr.mxu1 %v7112_v41 }
 0x453   : > { %v2154_v9 = vpop.permute.xlu1 %2153  ;;  %2242 = vmatpush1.msra.mxu1 %v2172_v7 }
 0x454   : > { %v2156_v10 = vsel %vm2155_vm8, %v2152_v8, %v2154_v9  ;;  %2243 = vmatprep.subr.mxu1 %v7112_v41  ;;  %v2189_v25 = vld [vmem:[#allocation3 + $0x90] sm:$0x3f]  ;;  %vm2722_vm8 = vcmp.lt.s32.totalorder %v7145_v48, 96 }
 0x455   : > { %2158 = vst.msk [vmem:[#allocation3 + $0x8a] sm:$0x3f] %vm2031_vm7, %v2156_v10  ;;  %2244 = vmatpush1.msra.mxu1 %v2171_v22  ;;  %v2833_v10 = vld [vmem:[%s6604_s7 + $0x60] sm:$0xff]  ;;  %v2848_v22 = vld [vmem:[%s6604_s7 + $0xd8] sm:$0xff]  ;;  %vm2676_vm7 = vcmp.ge.s32.totalorder %v7145_v48, 32 }
 0x456   : > { %2271 = vmatprep.subr.mxu1 %v7112_v41 }
 0x457   : > { %3212 = vmatpush2.msk.msra.mxu1 %vm2209_vm9, %v2189_v25  ;;  %vm2723_vm9 = vmand %vm6471_vm6, %vm2722_vm8 }
 0x458   : > { %2273 = vmatprep.subr.mxu1 %v7112_v41  ;;  %v2187_v31 = vld [vmem:[#allocation3 + $0x80] sm:$0xff] }
 0x45c   : > { %v2188_v16 = vld [vmem:[#allocation3 + $0x88] sm:$0xff]  ;;  %v2195_v15 = vpop.permute.xlu0 %2194 }
 0x45d   : > { %2274 = vmatpush2.msra.mxu1 %v2188_v16 }
 0x45e   : > { %2275 = vmatprep.subr.mxu1 %v7112_v41 }
 0x45f   : > { %2276 = vmatpush2.msra.mxu1 %v2187_v31  ;;  %v2832_v31 = vld [vmem:[%s6604_s7 + $0x58] sm:$0xff] }
 0x460   : > { %2278 = vmatmul.mubr.f32.vlgmr.msra.gmra.mxu1 %v2167_v40  ;;  %3390 = vmatprep.subr.msk.mxu1 %vm1095_vm0, %v6069_v11  ;;  %v2200_v42 = vpop.permute.xlu1 %2199 }
 0x461   : > { %3214 = vmatprep.mubr.msk.f32.mxu1 %vm2202_vm13, %v2170_v2  ;;  %3391 = vmatpush3.msk.msra.mxu1 %vm1095_vm0, %v6069_v11  ;;  %v2847_v2 = vld [vmem:[%s6604_s7 + $0xd0] sm:$0xff]  ;;  %vm2677_vm13 = vcmp.lt.s32.totalorder %v7145_v48, 48 }
 0x462   : > { %3392 = vmatprep.subr.mxu1 %v6074_v12  ;;  %vm2678_vm14 = vmand %vm2676_vm7, %vm2677_vm13  ;;  %vm2738_vm7 = vcmp.lt.s32.totalorder %v7145_v48, 128 }
 0x463   : > { %3393 = vmatpush3.msra.mxu1 %v6074_v12 }
 0x464   : > { %2283 = vmatmul.mubr.f32.gmra.mxu1 %v2169_v29  ;;  %3394 = vmatprep.subr.mxu1 %v6083_v18 }
 0x465   : > { %3395 = vmatpush3.msra.mxu1 %v6083_v18 }
 0x466   : > { %3396 = vmatprep.subr.mxu1 %v6090_v13 }
 0x467   : > { %3397 = vmatpush3.msra.mxu1 %v6090_v13 }
 0x468   : > { %3398 = vmatprep.subr.mxu1 %v6097_v54 }
 0x469   : > { %3399 = vmatpush3.msra.mxu1 %v6097_v54 }
 0x46a   : > { %3400 = vmatprep.subr.mxu1 %v6104_v14 }
 0x46b   : > { %3401 = vmatpush3.msra.mxu1 %v6104_v14 }
 0x46c   : > { %3402 = vmatprep.subr.mxu1 %v6180_v28 }
 0x46d   : > { %3403 = vmatpush3.msra.mxu1 %v6180_v28 }
 0x46e   : > { %3404 = vmatprep.subr.mxu1 %v6188_v24 }
 0x46f   : > { %3405 = vmatpush3.msra.mxu1 %v6188_v24 }
 0x470   : > { %3406 = vmatprep.subr.mxu1 %v6197_v27 }
 0x471   : > { %3407 = vmatpush3.msra.mxu1 %v6197_v27 }
 0x472   : > { %3408 = vmatprep.subr.mxu1 %v6206_v21 }
 0x473   : > { %3409 = vmatpush3.msra.mxu1 %v6206_v21 }
 0x474   : > { %3281 = vmatprep.subr.mxu1 %v2852_v23 }
 0x520   : > { %v2279_v0 = vpop.f32.mrf.mxu1 }
 0x521   : > { %v2280_v39 = vadd.f32 %v2279_v0, %v2195_v15  ;;  %v2830_v0 = vld [vmem:[%s6604_s7 + $0x48] sm:$0xff] }
 0x522   : > { %v2281_v5 = vpop.f32.mrf.mxu1 }
 0x523   : > { %v2288_v37 = vmax.f32 %v2280_v39, 0.0  ;;  %v2845_v39 = vld [vmem:[%s6604_s7 + $0xc0] sm:$0xff] }
 0x524   : > { %v2284_v52 = vpop.f32.mrf.mxu1 }
 0x525   : > { %v2285_v43 = vadd.f32 %v2284_v52, %v2200_v42  ;;  %2384 = vrot.lane.b32.xlu0 %v2288_v37, %s6913_s20  ;;  %3364 = vmatprep.mubr.msk.f32.mxu0 %vm2139_vm15, %v2288_v37  ;;  %v2829_v42 = vld [vmem:[%s6604_s7 + $0x40] sm:$0xff] }
 0x526   : > { %v2286_v34 = vpop.f32.mrf.mxu1 }
 0x527   : > { %v2289_v20 = vmax.f32 %v2285_v43, 0.0  ;;  %v2828_v43 = vld [vmem:[%s6604_s7 + $0x38] sm:$0xff]  ;;  %v2843_v34 = vld [vmem:[%s6604_s7 + $0xb0] sm:$0xff] }
 0x529   : > { %2386 = vrot.lane.b32.xlu1 %v2289_v20, %s6913_s20  ;;  %2467 = vrot.lane.b32.xlu0 %v2288_v37, %s3869_s17  ;;  %s3875_s20 = smov 64  }
 0x52a   : > { %3365 = vmatmul.mubr.msk.f32.vlgmr.msra.gmra.mxu0 %vm2139_vm15, %v2289_v20 }
 0x52b   : > { %3368 = vmatpush3.msk.msra.mxu0 %vm1095_vm0, %v6069_v11 }
 0x52c   : > { %3369 = vmatprep.subr.mxu0 %v6074_v12 }
 0x52d   : > { %2550 = vrot.lane.b32.xlu1 %v2288_v37, %s3867_s2  ;;  %2469 = vrot.lane.b32.xlu0 %v2289_v20, %s3869_s17  ;;  %v2844_v37 = vld [vmem:[%s6604_s7 + $0xb8] sm:$0xff] }
 0x52e   : > { %3370 = vmatpush3.msra.mxu0 %v6074_v12 }
 0x52f   : > { %3371 = vmatprep.subr.mxu0 %v6083_v18 }
 0x530   : > { %3372 = vmatpush3.msra.mxu0 %v6083_v18 }
 0x531   : > { %2552 = vrot.lane.b32.xlu1 %v2289_v20, %s3867_s2  ;;  %3373 = vmatprep.subr.mxu0 %v6090_v13 }
 0x532   : > { %3374 = vmatpush3.msra.mxu0 %v6090_v13 }
 0x533   : > { %3375 = vmatprep.subr.mxu0 %v6097_v54 }
 0x534   : > { %3376 = vmatpush3.msra.mxu0 %v6097_v54 }
 0x535   : > { %3377 = vmatprep.subr.mxu0 %v6104_v14 }
 0x536   : > { %3378 = vmatpush3.msra.mxu0 %v6104_v14 }
 0x537   : > { %3379 = vmatprep.subr.mxu0 %v6180_v28 }
 0x538   : > { %3380 = vmatpush3.msra.mxu0 %v6180_v28 }
 0x539   : > { %3381 = vmatprep.subr.mxu0 %v6188_v24 }
 0x53a   : > { %3382 = vmatpush3.msra.mxu0 %v6188_v24 }
 0x53b   : > { %3383 = vmatprep.subr.mxu0 %v6197_v27 }
 0x53c   : > { %3384 = vmatpush3.msra.mxu0 %v6197_v27 }
 0x53d   : > { %3385 = vmatprep.subr.mxu0 %v6206_v21 }
 0x53e   : > { %3386 = vmatpush3.msra.mxu0 %v6206_v21 }
 0x53f   : > { %3413 = vmatprep.subr.msk.mxu0 %vm1095_vm0, %v6069_v11 }
 0x597   : > { %v2385_v33 = vpop.permute.xlu0 %2384 }
 0x598   : > { %3387 = vmatprep.mubr.msk.f32.mxu0 %vm2139_vm15, %v2385_v33 }
 0x59b   : > { %v2387_v30 = vpop.permute.xlu1 %2386  ;;  %v2468_v45 = vpop.permute.xlu0 %2467 }
 0x59c   : > { %3388 = vmatmul.mubr.msk.f32.vlgmr.msra.gmra.mxu0 %vm2139_vm15, %v2387_v30  ;;  %3410 = vmatprep.mubr.msk.f32.mxu1 %vm2139_vm15, %v2468_v45  ;;  %v2827_v30 = vld [vmem:[%s6604_s7 + $0x30] sm:$0xff]  ;;  %v2842_v45 = vld [vmem:[%s6604_s7 + $0xa8] sm:$0xff] }
 0x59d   : > { %3414 = vmatpush3.msk.msra.mxu0 %vm1095_vm0, %v6069_v11  ;;  %vm2670_vm0 = vmand %vm2668_vm11, %vm2669_vm12  ;;  %vm2730_vm11 = vcmp.lt.s32.totalorder %v7145_v48, 112 }
 0x59e   : > { %3415 = vmatprep.subr.mxu0 %v6074_v12 }
 0x59f   : > { %3416 = vmatpush3.msra.mxu0 %v6074_v12  ;;  %v2551_v32 = vpop.permute.xlu1 %2550  ;;  %v2470_v44 = vpop.permute.xlu0 %2469 }
 0x5a0   : > { %3417 = vmatprep.subr.mxu0 %v6083_v18  ;;  %3411 = vmatmul.mubr.msk.f32.vlgmr.msra.gmra.mxu1 %vm2139_vm15, %v2470_v44 }
 0x5a1   : > { %3418 = vmatpush3.msra.mxu0 %v6083_v18  ;;  %3433 = vmatprep.mubr.msk.f32.mxu0 %vm2139_vm15, %v2551_v32 }
 0x5a2   : > { %3419 = vmatprep.subr.mxu0 %v6090_v13  ;;  %3282 = vmatpush3.msra.mxu1 %v2836_v58  ;;  %v2947_v58 = vld [vmem:[%s6606_s9 + $0x58] sm:$0xff] }
 0x5a3   : > { %3420 = vmatpush3.msra.mxu0 %v6090_v13  ;;  %v2553_v11 = vpop.permute.xlu1 %2552  ;;  %v3873_v13 = vmov 1966171168   ;;  %3283 = vmatprep.subr.mxu1 %v2851_v35  ;;  %v2946_v35 = vld [vmem:[%s6606_s9 + $0x50] sm:$0xff] }
 0x5a4   : > { %3421 = vmatprep.subr.mxu0 %v6097_v54  ;;  %3284 = vmatpush3.msra.mxu1 %v2835_v59  ;;  %v2943_v59 = vld [vmem:[%s6606_s9 + $0x38] sm:$0xff] }
 0x5a5   : > { %3422 = vmatpush3.msra.mxu0 %v6097_v54  ;;  %v2644_v54 = vunpack.c.l.s4 %v3873_v13  ;;  %3285 = vmatprep.subr.mxu1 %v2850_v60  ;;  %v2942_v60 = vld [vmem:[%s6606_s9 + $0x30] sm:$0xff] }
 0x5a6   : > { %3423 = vmatprep.subr.mxu0 %v6104_v14  ;;  %3286 = vmatpush3.msra.mxu1 %v2834_v63 }
 0x5a7   : > { %3424 = vmatpush3.msra.mxu0 %v6104_v14  ;;  %v2645_v6 = vunpack.c.0.s8 %v2644_v54  ;;  %3287 = vmatprep.subr.mxu1 %v2849_v1  ;;  %v2840_v54 = vld [vmem:[%s6604_s7 + $0x98] sm:$0xff] }
 0x5a8   : > { %3425 = vmatprep.subr.mxu0 %v6180_v28  ;;  %3288 = vmatpush3.msra.mxu1 %v2833_v10 }
 0x5a9   : > { %3426 = vmatpush3.msra.mxu0 %v6180_v28  ;;  %v6276_v51 = vsub.s32 %v2645_v6, %v6273_v53  ;;  %3289 = vmatprep.subr.mxu1 %v2848_v22 }
 0x5aa   : > { %3427 = vmatprep.subr.mxu0 %v6188_v24  ;;  %3290 = vmatpush3.msra.mxu1 %v2832_v31 }
 0x5ab   : > { %3428 = vmatpush3.msra.mxu0 %v6188_v24  ;;  %3291 = vmatprep.subr.mxu1 %v2847_v2  ;;  %v2831_v24 = vld [vmem:[%s6604_s7 + $0x50] sm:$0xff] }
 0x5ac   : > { %3429 = vmatprep.subr.mxu0 %v6197_v27  ;;  %3292 = vmatpush3.msra.mxu1 %v2831_v24 }
 0x5ad   : > { %3430 = vmatpush3.msra.mxu0 %v6197_v27  ;;  %v2846_v27 = vld [vmem:[%s6604_s7 + $0xc8] sm:$0xff] }
 0x5ae   : > { %3431 = vmatprep.subr.mxu0 %v6206_v21  ;;  %3293 = vmatprep.subr.mxu1 %v2846_v27 }
 0x5af   : > { %3432 = vmatpush3.msra.mxu0 %v6206_v21  ;;  %3294 = vmatpush3.msra.mxu1 %v2830_v0 }
 0x5b0   : > { %3434 = vmatmul.mubr.msk.f32.vlgmr.msra.gmra.mxu0 %vm2139_vm15, %v2553_v11  ;;  %3436 = vmatprep.subr.mxu0 %v7112_v41  ;;  %v2826_v11 = vld [vmem:[%s6604_s7 + $0x28] sm:$0xff]  ;;  %vm6449_vm15 = vcmp.ge.s32.totalorder %v7145_v48, 48 }
 0x5b1   : > { %3295 = vmatprep.subr.mxu1 %v2845_v39  ;;  %vm2686_vm4 = vmand %vm6449_vm15, %vm2685_vm1  ;;  %vm3043_vm15 = vcmask 1043456   ;;  %vm2952_vm1 = vcmask 982016  }
 0x5b2   : > { %3296 = vmatpush3.msra.mxu1 %v2829_v42  ;;  %v2939_v42 = vld [vmem:[%s6606_s9 + $0x18] sm:$0xff] }
 0x5b3   : > { %3297 = vmatprep.subr.mxu1 %v2844_v37  ;;  %v2937_v37 = vld [vmem:[%s6606_s9 + $0x8] sm:$0xff] }
 0x5b4   : > { %3298 = vmatpush3.msra.mxu1 %v2828_v43  ;;  %v3037_v43 = vld [vmem:[%s6608_s11 + $0x50] sm:$0xf] }
 0x5b5   : > { %3299 = vmatprep.subr.mxu1 %v2843_v34  ;;  %v3036_v34 = vld [vmem:[%s6608_s11 + $0x48] sm:$0xff] }
 0x5b6   : > { %3300 = vmatpush3.msra.mxu1 %v2827_v30  ;;  %v3033_v30 = vld [vmem:[%s6608_s11 + $0x30] sm:$0xff] }
 0x5b7   : > { %3301 = vmatprep.subr.mxu1 %v2842_v45  ;;  %v3032_v45 = vld [vmem:[%s6608_s11 + $0x28] sm:$0xff] }
 0x5b8   : > { %3302 = vmatpush3.msra.mxu1 %v2826_v11 }
 0x5ea   : > { %v3366_v12 = vpop.f32.mrf.mxu0 }
 0x5ec   : > { %v2375_v18 = vpop.f32.mrf.mxu0 }
 0x65c   : > { %v3389_v14 = vpop.f32.mrf.mxu0 }
 0x65d   : > { %v2634_v3 = vmax.f32 %v3366_v12, %v3389_v14  ;;  %v2841_v12 = vld [vmem:[%s6604_s7 + $0xa0] sm:$0xff]  ;;  %v2824_v14 = vld [vmem:[%s6604_s7 + $0x18] sm:$0xff] }
 0x65e   : > { %v2458_v46 = vpop.f32.mrf.mxu0  ;;  %3303 = vmatprep.subr.mxu1 %v2841_v12  ;;  %v2853_v12 = vld [vmem:[%s6605_s8] sm:$0x1] }
 0x65f   : > { %v2633_v55 = vmax.f32 %v2375_v18, %v2458_v46  ;;  %v2825_v18 = vld [vmem:[%s6604_s7 + $0x20] sm:$0xff]  ;;  %v2839_v46 = vld [vmem:[%s6604_s7 + $0x90] sm:$0xff] }
 0x660   : > { %v3412_v50 = vpop.f32.mrf.mxu1  ;;  %3304 = vmatpush3.msra.mxu1 %v2825_v18 }
 0x661   : > { %3305 = vmatprep.subr.mxu1 %v2840_v54 }
 0x662   : > { %v2541_v47 = vpop.f32.mrf.mxu1  ;;  %3306 = vmatpush3.msra.mxu1 %v2824_v14 }
 0x663   : > { %3307 = vmatprep.subr.mxu1 %v2839_v46  ;;  %v3028_v46 = vld [vmem:[%s6608_s11 + $0x8] sm:$0xff] }
 0x670   : > { %v3435_v19 = vpop.f32.mrf.mxu0 }
 0x671   : > { %v2636_v49 = vmax.f32 %v3412_v50, %v3435_v19  ;;  %v2823_v50 = vld [vmem:[%s6604_s7 + $0x10] sm:$0xff] }
 0x672   : > { %v2624_v26 = vpop.f32.mrf.mxu0  ;;  %3308 = vmatpush3.msra.mxu1 %v2823_v50  ;;  %v3027_v50 = vld [vmem:[%s6608_s11] sm:$0xff] }
 0x673   : > { %v2638_v56 = vmax.f32 %v2634_v3, %v2636_v49  ;;  %v2635_v57 = vmax.f32 %v2541_v47, %v2624_v26  ;;  %v2838_v3 = vld [vmem:[%s6604_s7 + $0x88] sm:$0xff]  ;;  %v2837_v47 = vld [vmem:[%s6604_s7 + $0x80] sm:$0xff] }
 0x674   : > { %v2822_v49 = vld [vmem:[%s6604_s7 + $0x8] sm:$0xff]  ;;  %3309 = vmatprep.subr.mxu1 %v2838_v3  ;;  %v2821_v26 = vld [vmem:[%s6604_s7] sm:$0xff] }
 0x675   : > { %v2749_v36 = vrot.slane %v2638_v56, %v6276_v51  ;;  %v2637_v38 = vmax.f32 %v2633_v55, %v2635_v57  ;;  %2741 = vst.msk [vmem:[#allocation4 + $0x1] sm:$0x1] %vm6279_vm10, %v2638_v56  ;;  %v2779_v4 = vcombine.high %v2638_v56, %v2638_v56  ;;  %3310 = vmatpush3.msra.mxu1 %v2822_v49  ;;  %v2950_v55 = vld [vmem:[%s6606_s9 + $0x70] sm:$0xff]  ;;  %v2949_v56 = vld [vmem:[%s6606_s9 + $0x68] sm:$0xff]  ;;  %v2948_v57 = vld [vmem:[%s6606_s9 + $0x60] sm:$0xff] }
 0x676   : > { %3311 = vmatprep.subr.mxu1 %v2837_v47  ;;  %3437 = vmatpush3.msra.mxu0 %v2950_v55 }
 0x677   : > { %v2649_v61 = vrot.slane %v2637_v38, %v6276_v51  ;;  %v2750_v62 = vcombine.high %v2749_v36, %v2749_v36  ;;  %2641 = vst.msk [vmem:[#allocation4] sm:$0x1] %vm6279_vm10, %v2637_v38  ;;  %v2757_v9 = vrot.slane %v2749_v36, %v6276_v51  ;;  %v2688_v25 = vcombine.high %v2637_v38, %v2637_v38  ;;  %v2945_v36 = vld [vmem:[%s6606_s9 + $0x48] sm:$0xff]  ;;  %v2944_v38 = vld [vmem:[%s6606_s9 + $0x40] sm:$0xff] }
 0x678   : > { %v2786_v28 = vrot.slane %v2779_v4, %v6276_v51  ;;  %3312 = vmatpush3.msra.mxu1 %v2821_v26  ;;  %3438 = vmatprep.subr.mxu0 %v7112_v41  ;;  %vm2729_vm10 = vcmp.ge.s32.totalorder %v7145_v48, 96  ;;  %v3038_v26 = vld [vmem:[%s6609_s12] sm:$0x1] }
 0x679   : > { %v2764_v7 = vrot.slane %v2750_v62, %v6276_v51  ;;  %v2650_v8 = vcombine.high %v2649_v61, %v2649_v61  ;;  %v2657_v40 = vrot.slane %v2649_v61, %v6276_v51  ;;  %v2769_v29 = vcombine.high %v2757_v9, %v2757_v9  ;;  %3469 = vmatprep.subr.mxu1 %v7112_v41  ;;  %v2941_v61 = vld [vmem:[%s6606_s9 + $0x28] sm:$0xff]  ;;  %vm2731_vm12 = vmand %vm2729_vm10, %vm2730_vm11 }
 0x67a   : > { %v2695_v15 = vrot.slane %v2688_v25, %v6276_v51  ;;  %v2793_v5 = vrot.slane %v2786_v28, %v6276_v51  ;;  %v2798_v33 = vcombine.high %v2786_v28, %v2786_v28  ;;  %3439 = vmatpush3.msra.mxu0 %v2949_v56 }
 0x67b   : > { %2765 = vrot.lane.b32.xlu1 %v2764_v7, %s7148_s24  ;;  %v2664_v16 = vrot.slane %v2650_v8, %v6276_v51  ;;  %v2672_v21 = vcombine.high %v2657_v40, %v2657_v40  ;;  %v2774_v20 = vcombine.high %v2764_v7, %v2764_v7  ;;  %3440 = vmatprep.subr.mxu0 %v7112_v41 }
 0x67c   : > { %v2702_v52 = vrot.slane %v2695_v15, %v6276_v51  ;;  %v2710_v44 = vcombine.high %v2695_v15, %v2695_v15  ;;  %v2805_v13 = vrot.slane %v2798_v33, %v6276_v51  ;;  %v2810_v19 = vcombine.high %v2793_v5, %v2793_v5  ;;  %3441 = vmatpush3.msra.mxu0 %v2948_v57  ;;  %v3034_v33 = vld [vmem:[%s6608_s11 + $0x38] sm:$0xff] }
 0x67d   : > { %2665 = vrot.lane.b32.xlu0 %v2664_v16, %s7148_s24  ;;  %v2680_v32 = vcombine.high %v2664_v16, %v2664_v16  ;;  %3442 = vmatprep.subr.mxu0 %v7112_v41  ;;  %v2861_v15 = vsub.s32 1, %v6273_v53 }
 0x67e   : > { %v2717_v6 = vrot.slane %v2710_v44, %v6276_v51  ;;  %v2725_v51 = vcombine.high %v2702_v52, %v2702_v52  ;;  %v2815_v17 = vcombine.high %v2805_v13, %v2805_v13  ;;  %3443 = vmatpush3.msra.mxu0 %v2947_v58  ;;  %v3030_v44 = vld [vmem:[%s6608_s11 + $0x18] sm:$0xff] }
 0x67f   : > { %2770 = vrot.lane.b32.xlu1 %v2769_v29, %s3874_s23  ;;  %3444 = vmatprep.subr.mxu0 %v7112_v41 }
 0x680   : > { %v2733_v23 = vcombine.high %v2717_v6, %v2717_v6  ;;  %3445 = vmatpush3.msra.mxu0 %v2946_v35 }
 0x681   : > { %2673 = vrot.lane.b32.xlu0 %v2672_v21, %s3874_s23  ;;  %3446 = vmatprep.subr.mxu0 %v7112_v41  ;;  %v2857_v21 = vsub.s32 0, %v6273_v53  ;;  %v2938_v53 = vld [vmem:[%s6606_s9 + $0x10] sm:$0xff] }
 0x682   : > { %3447 = vmatpush3.msra.mxu0 %v2945_v36 }
 0x683   : > { %2794 = vrot.lane.b32.xlu1 %v2793_v5, %s3875_s20  ;;  %3448 = vmatprep.subr.mxu0 %v7112_v41 }
 0x684   : > { %3449 = vmatpush3.msra.mxu0 %v2944_v38 }
 0x685   : > { %2703 = vrot.lane.b32.xlu0 %v2702_v52, %s3875_s20  ;;  %3450 = vmatprep.subr.mxu0 %v7112_v41  ;;  %v2936_v52 = vld [vmem:[%s6606_s9] sm:$0xff] }
 0x686   : > { %3451 = vmatpush3.msra.mxu0 %v2943_v59 }
 0x687   : > { %2775 = vrot.lane.b32.xlu1 %v2774_v20, %s3876_s22  ;;  %3452 = vmatprep.subr.mxu0 %v7112_v41  ;;  %v3035_v20 = vld [vmem:[%s6608_s11 + $0x40] sm:$0xff] }
 0x688   : > { %3453 = vmatpush3.msra.mxu0 %v2942_v60 }
 0x689   : > { %2681 = vrot.lane.b32.xlu0 %v2680_v32, %s3876_s22  ;;  %3454 = vmatprep.subr.mxu0 %v7112_v41  ;;  %v3031_v32 = vld [vmem:[%s6608_s11 + $0x20] sm:$0xff]  ;;  %s430_s22 = scalar_lea.vmem [#allocation5], %s429_s30 }
 0x68a   : > { %3455 = vmatpush3.msra.mxu0 %v2941_v61  ;;  %s3132_s20 = sshll.u32 %s430_s22, 4  ;;  %s3133_s20 = int_to_ptr.vmem [resolvable:$true] %s3132_s20 }
 0x68b   : > { %2806 = vrot.lane.b32.xlu1 %v2805_v13, %s7149_s1  ;;  %3456 = vmatprep.subr.mxu0 %v7112_v41 }
 0x68d   : > { %2718 = vrot.lane.b32.xlu0 %v2717_v6, %s7149_s1  ;;  %v3029_v6 = vld [vmem:[%s6608_s11 + $0x10] sm:$0xff] }
 0x68f   : > { %2811 = vrot.lane.b32.xlu1 %v2810_v19, %s7150_s16  ;;  %v2951_v19 = vld [vmem:[%s6607_s10] sm:$0x1] }
 0x691   : > { %2726 = vrot.lane.b32.xlu0 %v2725_v51, %s7150_s16  ;;  %s3766_s16 = scalar_lea.vmem %s3133_s20, 16 }
 0x692   : > { %p3767_p11 = scmp.ne.s32.totalorder %s3133_s20, %s3766_s16 }
 0x693   : > { %2816 = vrot.lane.b32.xlu1 %v2815_v17, %s7151_s0 }
 0x694   : > { %p3768_p12 = pnand %p3767_p11, %p3987_p5 }
 0x695   : > { %2734 = vrot.lane.b32.xlu0 %v2733_v23, %s7151_s0  ;;  %s3230_s0 = sshll.u32 %s3970_s29, 4  ;;  %s3878_s29 = smov [#allocation5]  }
 0x696   : > { %s6562_s23 = scalar_lea.hbm %s6610_s13, %s3230_s0  ;;  %p3769_p13 = pneg %p3768_p12 }
 0x697   : > { %s3770_s24 = sshll.u32 %s3878_s29, 4  ;;  %s3771_s24 = int_to_ptr.vmem [resolvable:$false] %s3770_s24 }
 0x698   : > { %s3772_s1 = scalar_lea.vmem %s3771_s24, 32  ;;  %p3773_p0 = scmp.lt.s32.totalorder %s3133_s20, %s3771_s24 }
 0x699   : > { %p3774_p1 = scmp.lt.s32.totalorder %s3772_s1, %s3766_s16 }
 0x69b   : > { %p3775_p2 = por %p3774_p1, %p3773_p0 }
 0x69d   : > { %p3776_p3 = pnand %p3775_p2, %p3769_p13 }
 0x6ed   : > { %v2766_v62 = vpop.permute.xlu1 %2765 }
 0x6ee   : > { %2768 = vst.msk [vmem:[#allocation4 + $0x1] sm:$0x1] %vm2670_vm0, %v2766_v62 }
 0x6ef   : > { %v2666_v63 = vpop.permute.xlu0 %2665 }
 0x6f0   : > { %2671 = vst.msk [vmem:[#allocation4] sm:$0x1] %vm2670_vm0, %v2666_v63  ;;  %vm2737_vm0 = vcmp.ge.s32.totalorder %v7145_v48, 112  ;;  %v2940_v48 = vld [vmem:[%s6606_s9 + $0x20] sm:$0xff] }
 0x6f1   : > { %v2771_v1 = vpop.permute.xlu1 %2770  ;;  %vm2739_vm13 = vmand %vm2737_vm0, %vm2738_vm7  ;;  %3457 = vmatpush3.msra.mxu0 %v2940_v48 }
 0x6f2   : > { %2773 = vst.msk [vmem:[#allocation4 + $0x1] sm:$0x1] %vm2678_vm14, %v2771_v1  ;;  %3458 = vmatprep.subr.mxu0 %v7112_v41 }
 0x6f3   : > { %v2674_v4 = vpop.permute.xlu0 %2673  ;;  %3459 = vmatpush3.msra.mxu0 %v2939_v42 }
 0x6f4   : > { %2679 = vst.msk [vmem:[#allocation4] sm:$0x1] %vm2678_vm14, %v2674_v4  ;;  %3460 = vmatprep.subr.mxu0 %v7112_v41  ;;  %vm3877_vm14 = vmmov 0  }
 0x6f5   : > { %v2795_v8 = vpop.permute.xlu1 %2794  ;;  %3461 = vmatpush3.msra.mxu0 %v2938_v53  ;;  %3466 = vmatprep.mubr.msk.f32.mxu0 %vm3877_vm14, %v7112_v41 }
 0x6f6   : > { %3462 = vmatprep.subr.mxu0 %v7112_v41 }
 0x6f7   : > { %v2704_v22 = vpop.permute.xlu0 %2703  ;;  %3463 = vmatpush3.msra.mxu0 %v2937_v37 }
 0x6f8   : > { %3464 = vmatprep.subr.mxu0 %v7112_v41 }
 0x6f9   : > { %v2776_v16 = vpop.permute.xlu1 %2775  ;;  %3465 = vmatpush3.msra.mxu0 %v2936_v52 }
 0x6fa   : > { %2778 = vst.msk [vmem:[#allocation4 + $0x1] sm:$0x1] %vm2686_vm4, %v2776_v16 }
 0x6fb   : > { %v2682_v40 = vpop.permute.xlu0 %2681  ;;  %2797 = vst.msk [vmem:[#allocation4 + $0x1] sm:$0x1] %vm2708_vm5, %v2795_v8 }
 0x6fc   : > { %2687 = vst.msk [vmem:[#allocation4] sm:$0x1] %vm2686_vm4, %v2682_v40 }
 0x6fd   : > { %v2807_v31 = vpop.permute.xlu1 %2806  ;;  %2709 = vst.msk [vmem:[#allocation4] sm:$0x1] %vm2708_vm5, %v2704_v22 }
 0x6fe   : > { %2809 = vst.msk [vmem:[#allocation4 + $0x1] sm:$0x1] %vm2723_vm9, %v2807_v31 }
 0x6ff   : > { %v2719_v2 = vpop.permute.xlu0 %2718 }
 0x700   : > { %2724 = vst.msk [vmem:[#allocation4] sm:$0x1] %vm2723_vm9, %v2719_v2 }
 0x701   : > { %v2812_v29 = vpop.permute.xlu1 %2811 }
 0x702   : > { %2814 = vst.msk [vmem:[#allocation4 + $0x1] sm:$0x1] %vm2731_vm12, %v2812_v29 }
 0x703   : > { %v2727_v28 = vpop.permute.xlu0 %2726 }
 0x704   : > { %2732 = vst.msk [vmem:[#allocation4] sm:$0x1] %vm2731_vm12, %v2727_v28 }
 0x705   : > { %v2817_v24 = vpop.permute.xlu1 %2816 }
 0x706   : > { %2819 = vst.msk [vmem:[#allocation4 + $0x1] sm:$0x1] %vm2739_vm13, %v2817_v24 }
 0x707   : > { %v2735_v27 = vpop.permute.xlu0 %2734 }
 0x708   : > { %2740 = vst.msk [vmem:[#allocation4] sm:$0x1] %vm2739_vm13, %v2735_v27 }
 0x70f   : > { %v2820_v0 = vld [vmem:[#allocation4] sm:$0x3] }
 0x710   : > { %v2858_v39 = vrot.slane %v2820_v0, %v2857_v21  ;;  %v2862_v5 = vrot.slane %v2820_v0, %v2861_v15 }
 0x712   : > { %2929 = vmatprep.mubr.f32.mxu1 %v2862_v5 }
 0x713   : > { %2930 = vmatmul.mubr.f32.vlgmr.msra.gmra.mxu1 %v2858_v39 }
 0x714   : > { %3491 = vmatprep.mubr.msk.f32.mxu1 %vm3877_vm14, %v7112_v41  ;;  %3470 = vmatpush3.msk.msra.mxu1 %vm3043_vm15, %v3037_v43 }
 0x715   : > { %3471 = vmatprep.subr.mxu1 %v7112_v41 }
 0x716   : > { %3472 = vmatpush3.msra.mxu1 %v3036_v34 }
 0x717   : > { %3473 = vmatprep.subr.mxu1 %v7112_v41 }
 0x718   : > { %3474 = vmatpush3.msra.mxu1 %v3035_v20 }
 0x719   : > { %3475 = vmatprep.subr.mxu1 %v7112_v41 }
 0x71a   : > { %3476 = vmatpush3.msra.mxu1 %v3034_v33 }
 0x71b   : > { %3477 = vmatprep.subr.mxu1 %v7112_v41 }
 0x71c   : > { %3478 = vmatpush3.msra.mxu1 %v3033_v30 }
 0x71d   : > { %3479 = vmatprep.subr.mxu1 %v7112_v41 }
 0x71e   : > { %3480 = vmatpush3.msra.mxu1 %v3032_v45 }
 0x71f   : > { %3481 = vmatprep.subr.mxu1 %v7112_v41 }
 0x720   : > { %3482 = vmatpush3.msra.mxu1 %v3031_v32 }
 0x721   : > { %3483 = vmatprep.subr.mxu1 %v7112_v41 }
 0x722   : > { %3484 = vmatpush3.msra.mxu1 %v3030_v44 }
 0x723   : > { %3485 = vmatprep.subr.mxu1 %v7112_v41 }
 0x724   : > { %3486 = vmatpush3.msra.mxu1 %v3029_v6 }
 0x725   : > { %3487 = vmatprep.subr.mxu1 %v7112_v41 }
 0x726   : > { %3488 = vmatpush3.msra.mxu1 %v3028_v46 }
 0x727   : > { %3489 = vmatprep.subr.mxu1 %v7112_v41 }
 0x728   : > { %3490 = vmatpush3.msra.mxu1 %v3027_v50 }
 0x7d3   : > { %v3313_v11 = vpop.f32.mrf.mxu1 }
 0x7d5   : > { %v3314_v18 = vpop.f32.mrf.mxu1 }
 0x7d6   : > { %v3315_v13 = vadd.f32 %v3314_v18, %v3313_v11 }
 0x7d8   : > { %v2932_v54 = vadd.f32 %v3315_v13, %v2853_v12 }
 0x7da   : > { %v2935_v14 = vmax.f32 %v2932_v54, 0.0 }
 0x7dc   : > { %3467 = vmatmul.mubr.msk.f32.vlgmr.msra.gmra.mxu0 %vm2952_vm1, %v2935_v14 }
 0x89c   : > { %v3022_v3 = vpop.f32.mrf.mxu0 }
 0x89d   : > { %v3023_v49 = vadd.f32 %v3022_v3, %v2951_v19 }
 0x89e   : > { %v3468_v51 = vpop.f32.mrf.mxu0 }
 0x89f   : > { %v3026_v47 = vmax.f32 %v3023_v49, 0.0 }
 0x8a1   : > { %3492 = vmatmul.mubr.msk.f32.vlgmr.msra.gmra.mxu1 %vm3039_vm2, %v3026_v47 }
 0x961   : > { %v3113_v41 = vpop.f32.mrf.mxu1 }
 0x962   : > { %v3114_v17 = vadd.f32 %v3113_v41, %v3038_v26 }
 0x963   : > { %v3493_v23 = vpop.f32.mrf.mxu1 }
 0x964   : > { %3118 = vst.msk [vmem:[%s430_s22] sm:$0x1] %vm3117_vm3, %v3114_v17 }
 0x965   : > { %3779 = shalt.err (!%p3776_p3)
}
 0x966   : > { %s3780_s21 = scalar_lea.hbm %s6562_s23, 16  ;;  %s3784_s22 = scalar_lea.hbm %s6610_s13, 32 }
 0x967   : > { %p3781_p4 = scmp.ne.s32.totalorder %s6562_s23, %s3780_s21  ;;  %p3785_p9 = scmp.lt.s32.totalorder %s6562_s23, %s6610_s13 }
 0x968   : > { %p3786_p10 = scmp.lt.s32.totalorder %s3784_s22, %s3780_s21 }
 0x969   : > { %p3782_p7 = pnand %p3781_p4, %p3987_p5 }
 0x96a   : > { %p3787_p11 = por %p3786_p10, %p3785_p9 }
 0x96b   : > { %p3783_p8 = pneg %p3782_p7 }
 0x96d   : > { %p3788_p12 = pnand %p3787_p11, %p3783_p8 }
 0x96f   : > { %3791 = shalt.err (!%p3788_p12)
}
 0x970   : > { %3495 = dma.vmem_to_hbm [thread:$0]  (%p3987_p5), %s3133_s20, 16, %s6562_s23, %s3120_s15  }
 0x971 PF: > { %p3501_p13 = scmp.ge.s32.totalorder %s3826_s28, 2  ;;  %s3144_s16 = sand.u32 1, %s3814_s25  }
 0x972   : > { %s3145_s29 = scalar_lea.sflag [#allocation6], %s3144_s16 }
 0x973   : > { %p3498_p0 = pnand %p3501_p13, %p3991_p6 }
 0x975   : > { %p3499_p1 = pneg %p3498_p0 }
 0x977   : > { %3809 = dma.done.wait (%p3499_p1), %s3145_s29, 16  }
 0x978   : > { %3811 = vsyncadd (%p3499_p1), %s3145_s29, 4294967280  ;;  %s7160_s24 = sld [smem:[#allocation8_spill]]  ;;  %p23_p2 = scmp.ge.s32.totalorder %s3974_s14, 4  }
 0x979   : > { %s7161_s25 = smov %s3818_s26  ;;  %s7162_s26 = smov %s3822_s27 }
 0x97a   : > { %s7164_s28 = smov %s3974_s14  ;;  %25 = sbr.rel (!%p23_p2) target bundleno = 7 (0x7), region = 131 }
 0x97e   : > { %s7163_s27 = smov %s7160_s24 }
 0x97f   :  { %3149 = vsyncpa [#allocation6], 1 }
 0x980   :  { %3151 = vsyncpa [#allocation6 + $0x1], 1 }

</bundles_post_ra>
